<compile_context>
chip_gen: v5e
topology: v5e:2x2
jax: 0.10.0
libtpu: 0.0.40
codegen_flags: <defaults>
</compile_context>

<pallas_src>
import numpy as np
import jax
import jax.numpy as jnp
from jax.experimental import pallas as pl
from jax.experimental.pallas import tpu as pltpu

_EPS = 1e-5      # nn.BatchNorm2d default eps
_LANE = 128


def _round_up(v, m):
    return (v + m - 1) // m * m


# --------------------------- generation-aware knobs ---------------------------

_VMEM_LIMIT = None


def _vmem_limit_bytes():
    """~80% of this generation's VMEM capacity (v7x: ~51 MiB, v5e/v6e: ~102 MiB)."""
    global _VMEM_LIMIT
    if _VMEM_LIMIT is None:
        cap = 128 * 1024 * 1024
        try:
            info = pltpu.get_tpu_info()
            cap = int(getattr(info, "vmem_capacity_bytes", cap) or cap)
        except Exception:
            pass
        _VMEM_LIMIT = int(cap * 0.8)
    return _VMEM_LIMIT


_BUFFERED_OK = None


def _buffered_supported():
    """Feature-detect BlockSpec(pipeline_mode=pl.Buffered(1)) on this jax version."""
    global _BUFFERED_OK
    if _BUFFERED_OK is None:
        try:
            pl.BlockSpec((8, 128), lambda i, j: (0, 0), pipeline_mode=pl.Buffered(1))
            _BUFFERED_OK = True
        except Exception:
            _BUFFERED_OK = False
    return _BUFFERED_OK


# ----------------------------- Pallas kernel ---------------------------------

def _make_conv_kernel(*, stride, wps, ch, prologue, epilogue, shortcut):
    """Fused 3x3-conv kernel body.

    Grid = (image n, Cout tile j).  The input activation arrives as stride*stride
    phase images, spatially padded and row-flattened to (s*s, R, Cin_p).  Each of
    the 9 taps is a shifted contiguous row-window of one phase, so the conv is 9
    accumulated MXU matmuls -- no im2col tensor ever exists in HBM.
    """
    s = stride
    taps = [(dh, dw) for dh in range(3) for dw in range(3)]

    def kernel(*refs):
        refs = list(refs)
        x_ref = refs.pop(0)            # (1, s*s, R, Cin_p)   f32 or bf16
        w_ref = refs.pop(0)            # (9, Cin_p, TN)       bf16
        s1 = b1 = s2 = b2 = xs_ref = ws_ref = None
        if prologue:
            s1 = refs.pop(0)           # (1, Cin_p)  f32
            b1 = refs.pop(0)
        if epilogue:
            s2 = refs.pop(0)           # (1, TN) f32
            b2 = refs.pop(0)
        if shortcut is not None:
            xs_ref = refs.pop(0)       # project: (1, CH, Cin_p) bf16 ; identity: (1, CH, TN) f32
            if shortcut == "project":
                ws_ref = refs.pop(0)   # (Cin_p, TN) bf16
        o_ref = refs.pop(0)            # (1, CH, TN)
        x32_ref = refs.pop(0)          # scratch (s*s, R, Cin_p) f32

        tn = o_ref.shape[-1]

        # bn1+relu prologue (or plain f32 up-cast) applied ONCE over the whole
        # activation slab into VMEM scratch; the 9 taps below only slice it.
        # The Cout-tile axis is marked "arbitrary" so this runs once per image.
        @pl.when(pl.program_id(1) == 0)
        def _():
            a = x_ref[0].astype(jnp.float32)
            if prologue:                              # fused bn1 + relu
                a = jnp.maximum(a * s1[...] + b1[...], 0.0)
            x32_ref[...] = a

        # Shortcut / residual contribution initializes the accumulator (fused add).
        if shortcut == "project":
            acc = jnp.dot(xs_ref[0], ws_ref[...],
                          preferred_element_type=jnp.float32)
        elif shortcut == "identity":
            acc = xs_ref[0].astype(jnp.float32)
        else:
            acc = jnp.zeros((ch, tn), jnp.float32)

        for t, (dh, dw) in enumerate(taps):
            phase = (dh % s) * s + (dw % s)
            off = (dh // s) * wps + (dw // s)
            a = x32_ref[phase, off:off + ch, :]       # (CH, Cin_p) f32 slice of scratch
            # TODO(synk): per-tap bf16 cast + sublane-unaligned slice copies could be
            # removed by 8-aligning wps and pre-shifting the dw taps (pltpu.roll).
            acc = acc + jnp.dot(a.astype(jnp.bfloat16), w_ref[t],
                                preferred_element_type=jnp.float32)

        if epilogue:                                  # fused bn2 + relu
            acc = jnp.maximum(acc * s2[...] + b2[...], 0.0)
        o_ref[0] = acc.astype(o_ref.dtype)

    return kernel


def _fused_conv3x3(x_ph, w_taps, *, stride, wps, ch,
                   prologue=None, epilogue=None, shortcut=None,
                   out_dtype=jnp.float32):
    n, ssq, r, cin_p = x_ph.shape
    cout_p = w_taps.shape[-1]
    # Cout tile: 256 feeds the full 2x256 MXU on v6e/v7x; 128 otherwise (and always
    # divides the lane-padded channel count).
    tn = 256 if cout_p % 256 == 0 else 128
    jt = cout_p // tn
    sc_mode = shortcut[0] if shortcut is not None else None

    def build(use_buffered):
        def const_spec(shape, index_map):
            # Grid-invariant operand: single-buffer it (no point double-buffering
            # data that is never re-DMA'd).
            if use_buffered:
                return pl.BlockSpec(shape, index_map, pipeline_mode=pl.Buffered(1))
            return pl.BlockSpec(shape, index_map)

        args = [x_ph, w_taps]
        in_specs = [
            pl.BlockSpec((1, ssq, r, cin_p), lambda i, j: (i, 0, 0, 0)),
            pl.BlockSpec((9, cin_p, tn), lambda i, j: (0, 0, j)),   # streamed per Cout tile
        ]
        if prologue is not None:
            for v in prologue:
                args.append(v.reshape(1, cin_p).astype(jnp.float32))
                in_specs.append(const_spec((1, cin_p), lambda i, j: (0, 0)))
        if epilogue is not None:
            for v in epilogue:
                args.append(v.reshape(1, cout_p).astype(jnp.float32))
                in_specs.append(pl.BlockSpec((1, tn), lambda i, j: (0, j)))
        if shortcut is not None:
            xs = shortcut[1]
            args.append(xs)
            if sc_mode == "project":
                in_specs.append(pl.BlockSpec((1, ch, xs.shape[-1]),
                                             lambda i, j: (i, 0, 0)))
                ws = shortcut[2]
                args.append(ws)
                in_specs.append(pl.BlockSpec((cin_p, tn), lambda i, j: (0, j)))
            else:
                in_specs.append(pl.BlockSpec((1, ch, tn), lambda i, j: (i, 0, j)))

        kernel = _make_conv_kernel(stride=stride, wps=wps, ch=ch,
                                   prologue=prologue is not None,
                                   epilogue=epilogue is not None,
                                   shortcut=sc_mode)

        flops = 2 * 9 * n * ch * cin_p * cout_p
        if sc_mode == "project":
            flops += 2 * n * ch * cin_p * cout_p
        bytes_accessed = sum(int(a.size) * int(a.dtype.itemsize) for a in args)
        bytes_accessed += n * ch * cout_p * int(np.dtype(out_dtype).itemsize)

        return pl.pallas_call(
            kernel,
            out_shape=jax.ShapeDtypeStruct((n, ch, cout_p), out_dtype),
            grid=(n, jt),
            in_specs=in_specs,
            out_specs=pl.BlockSpec((1, ch, tn), lambda i, j: (i, 0, j)),
            scratch_shapes=[pltpu.VMEM((ssq, r, cin_p), jnp.float32)],
            compiler_params=pltpu.CompilerParams(
                # Batch axis shards across TensorCores; the Cout-tile axis is kept
                # "arbitrary" because the prologue scratch is computed at j == 0 and
                # reused across the remaining Cout tiles of the same image.
                dimension_semantics=("parallel", "arbitrary"),
                vmem_limit_bytes=_vmem_limit_bytes()),
            cost_estimate=pl.CostEstimate(flops=flops, transcendentals=0,
                                          bytes_accessed=bytes_accessed),
        )(*args)

    use_buf = _buffered_supported()
    try:
        return build(use_buf)
    except Exception:
        if not use_buf:
            raise
        return build(False)      # retry without pipeline_mode if it was the culprit


# --------------------------- JAX glue (layout only) ---------------------------

def _conv_geometry(h, w, stride):
    """Output size, phase-image width, rows-per-image and padded row count."""
    ho = (h + 2 - 3) // stride + 1
    wo = (w + 2 - 3) // stride + 1
    hps = -(-(h + 2) // stride)
    wps = -(-(w + 2) // stride)
    max_off = (2 // stride) * wps + (2 // stride)
    ch = ho * wps                       # accumulator rows produced per image
    r = _round_up(max(max_off + ch, hps * wps), 8)
    return ho, wo, wps, ch, r


def _phase_decompose(x_pad, stride, r_rows):
    """(N, Hp, Wp, C) -> (N, s*s, r_rows, C): space-to-depth + row flatten.

    Pure layout ops; phase (p, q) row-major image ends up at index p*s + q.
    """
    n, hp, wp, c = x_pad.shape
    s = stride
    hps, wps = -(-hp // s), -(-wp // s)
    xp = jnp.pad(x_pad, ((0, 0), (0, hps * s - hp), (0, wps * s - wp), (0, 0)))
    xp = xp.reshape(n, hps, s, wps, s, c).transpose(0, 2, 4, 1, 3, 5)
    xp = xp.reshape(n, s * s, hps * wps, c)
    return jnp.pad(xp, ((0, 0), (0, 0), (0, r_rows - hps * wps), (0, 0)))


def _conv_w_taps(w_oihw, cin_p, cout_p):
    """(Cout, Cin, 3, 3) -> (9, Cin_p, Cout_p) bf16, tap index = dh*3 + dw."""
    cout, cin, kh, kw = w_oihw.shape
    w = jnp.transpose(w_oihw, (2, 3, 1, 0)).reshape(kh * kw, cin, cout)
    w = jnp.pad(w, ((0, 0), (0, cin_p - cin), (0, cout_p - cout)))
    return w.astype(jnp.bfloat16)


def wide_basic_block_forward(x_nchw, params, stride):
    """WideBasicBlock.forward in eval mode (BN running stats, Dropout = id)."""
    # TODO(synk): training-mode BatchNorm (batch statistics) and stochastic Dropout are
    # not implemented; this matches module.eval() semantics.
    x = jnp.transpose(x_nchw, (0, 2, 3, 1)).astype(jnp.float32)        # NHWC
    n, h, w, cin = x.shape
    cout = params["w1"].shape[0]
    cin_p = _round_up(cin, _LANE)
    cout_p = _round_up(cout, _LANE)

    # Fold BatchNorms into per-channel scale/bias (zero-padded to lane width).
    s1 = params["gamma1"] * jax.lax.rsqrt(params["var1"] + _EPS)
    b1 = params["beta1"] - params["mean1"] * s1
    s2 = params["gamma2"] * jax.lax.rsqrt(params["var2"] + _EPS)
    b2 = params["beta2"] - params["mean2"] * s2
    s1p = jnp.pad(s1, (0, cin_p - cin))
    b1p = jnp.pad(b1, (0, cin_p - cin))
    s2p = jnp.pad(s2, (0, cout_p - cout))
    b2p = jnp.pad(b2, (0, cout_p - cout))

    # ---- conv1 (+ fused bn1/relu prologue and bn2/relu epilogue) ----
    ho, wo, wps1, ch1, r1 = _conv_geometry(h, w, stride)
    x_c = jnp.pad(x, ((0, 0), (0, 0), (0, 0), (0, cin_p - cin)))
    # Spatial border value chosen so relu(v*s1 + b1) == 0, i.e. the fused bn1+relu
    # prologue reproduces the zero padding conv1 sees in PyTorch.
    # TODO(synk): degenerate gamma1 == 0 channels with beta1 > 0 have no such pad
    # value; that pathological BN state is not handled.
    pad_val = jnp.where(s1p > 0, -1e30, jnp.where(s1p < 0, 1e30, 0.0))
    x_sp = jnp.broadcast_to(pad_val.astype(jnp.float32),
                            (n, h + 2, w + 2, cin_p))
    x_sp = x_sp.at[:, 1:-1, 1:-1, :].set(x_c)
    x_ph = _phase_decompose(x_sp, stride, r1)

    w1 = _conv_w_taps(params["w1"], cin_p, cout_p)
    # y = relu(bn2(conv1(relu(bn1(x)))));  dropout is identity in eval mode.
    # Emitted as bf16: it only feeds the bf16 MXU in call 2, so this halves the
    # HBM traffic of the inter-call layout ops without changing the numeric path.
    y = _fused_conv3x3(x_ph, w1, stride=stride, wps=wps1, ch=ch1,
                       prologue=(s1p, b1p), epilogue=(s2p, b2p),
                       out_dtype=jnp.bfloat16)

    # ---- conv2 + shortcut + residual add (single fused kernel) ----
    y = y.reshape(n, ho, wps1, cout_p)[:, :, :wo, :]                   # (N,Ho,Wo,Cp) bf16
    _, _, wps2, ch2, r2 = _conv_geometry(ho, wo, 1)
    y_sp = jnp.pad(y, ((0, 0), (1, 1), (1, 1), (0, 0)))                # zero border
    y_ph = _phase_decompose(y_sp, 1, r2)
    # TODO(synk): call 1 could write directly into this padded row-flattened layout
    # (and the shortcut could be gathered in-kernel from HBM); not implemented here.

    w2 = _conv_w_taps(params["w2"], cout_p, cout_p)

    xs = x[:, ::stride, ::stride, :][:, :ho, :wo, :]                   # (N,Ho,Wo,Cin)
    if stride != 1 or cin != cout:
        xs_p = jnp.pad(xs, ((0, 0), (0, 0), (0, wps2 - wo), (0, cin_p - cin)))
        xs_p = xs_p.reshape(n, ch2, cin_p).astype(jnp.bfloat16)
        ws = jnp.pad(params["ws"].reshape(cout, cin).T,
                     ((0, cin_p - cin), (0, cout_p - cout))).astype(jnp.bfloat16)
        shortcut = ("project", xs_p, ws)
    else:
        xs_p = jnp.pad(xs, ((0, 0), (0, 0), (0, wps2 - wo), (0, cout_p - cout)))
        shortcut = ("identity", xs_p.reshape(n, ch2, cout_p))

    out = _fused_conv3x3(y_ph, w2, stride=1, wps=wps2, ch=ch2,
                         shortcut=shortcut, out_dtype=jnp.float32)
    out = out.reshape(n, ho, wps2, cout_p)[:, :, :wo, :cout]
    return jnp.transpose(out, (0, 3, 1, 2))                            # NCHW


# --------------------------- pure-JAX reference -------------------------------

def _ref_forward(x, p, stride):
    def bn(t, g, b, m, v):
        s = g / jnp.sqrt(v + _EPS)
        return (t - m[None, :, None, None]) * s[None, :, None, None] \
            + b[None, :, None, None]

    def conv(t, w, s, pad):
        return jax.lax.conv_general_dilated(
            t, w, (s, s), ((pad, pad), (pad, pad)),
            dimension_numbers=("NCHW", "OIHW", "NCHW"),
            precision=jax.lax.Precision.HIGHEST)

    out = conv(jnp.maximum(bn(x, p["gamma1"], p["beta1"], p["mean1"], p["var1"]), 0.0),
               p["w1"], stride, 1)
    out = conv(jnp.maximum(bn(out, p["gamma2"], p["beta2"], p["mean2"], p["var2"]), 0.0),
               p["w2"], 1, 1)
    cin, cout = p["w1"].shape[1], p["w1"].shape[0]
    sc = conv(x, p["ws"], stride, 0) if (stride != 1 or cin != cout) else x
    return out + sc


# --------------------------- main --------------------------------------------

def _make_params(key, cin, cout):
    ks = jax.random.split(key, 11)
    return {
        "gamma1": 1.0 + 0.1 * jax.random.normal(ks[0], (cin,)),
        "beta1": 0.1 * jax.random.normal(ks[1], (cin,)),
        "mean1": 0.1 * jax.random.normal(ks[2], (cin,)),
        "var1": jnp.abs(1.0 + 0.1 * jax.random.normal(ks[3], (cin,))),
        "w1": 0.1 * jax.random.normal(ks[4], (cout, cin, 3, 3)),
        "gamma2": 1.0 + 0.1 * jax.random.normal(ks[5], (cout,)),
        "beta2": 0.1 * jax.random.normal(ks[6], (cout,)),
        "mean2": 0.1 * jax.random.normal(ks[7], (cout,)),
        "var2": jnp.abs(1.0 + 0.1 * jax.random.normal(ks[8], (cout,))),
        "w2": 0.1 * jax.random.normal(ks[9], (cout, cout, 3, 3)),
        "ws": 0.1 * jax.random.normal(ks[10], (cout, cin, 1, 1)),
    }


if __name__ == "__main__":
    n, h, w = 2, 16, 16
    key = jax.random.PRNGKey(0)

    # Exercise both block variants: projection shortcut (stride 2, Cin != Cout) and
    # identity shortcut (stride 1, Cin == Cout).
    configs = [
        (4, 8, 2),
        (8, 8, 1),
    ]
    for idx, (cin, cout, stride) in enumerate(configs):
        kp, kx = jax.random.split(jax.random.fold_in(key, idx))
        params = _make_params(kp, cin, cout)
        x = jax.random.normal(kx, (n, cin, h, w), dtype=jnp.float32)

        out = wide_basic_block_forward(x, params, stride)
        jax.block_until_ready(out)

        ref = _ref_forward(x, params, stride)
        assert out.shape == ref.shape, (out.shape, ref.shape)
        max_err = float(jnp.max(jnp.abs(out - ref)))
        # bf16 MXU inputs / bf16 intermediate with f32 accumulation -> slightly looser
        # tolerance than pure f32.
        assert jnp.allclose(out, ref, atol=2e-2, rtol=2e-2), max_err

    print("KERNEL_OK")
</pallas_src>

<mosaic_0001>
module attributes {stable_mosaic.version = 11 : i64} {
  func.func @kernel(%arg0: i32, %arg1: i32, %arg2: memref<1x4x88x128xf32, #tpu.memory_space<vmem>>, %arg3: memref<9x128x128xbf16, #tpu.memory_space<vmem>>, %arg4: memref<1x128xf32, #tpu.memory_space<vmem>>, %arg5: memref<1x128xf32, #tpu.memory_space<vmem>>, %arg6: memref<1x128xf32, #tpu.memory_space<vmem>>, %arg7: memref<1x128xf32, #tpu.memory_space<vmem>>, %arg8: memref<1x72x128xbf16, #tpu.memory_space<vmem>>, %arg9: memref<4x88x128xf32, #tpu.memory_space<vmem>>) attributes {dimension_semantics = [#tpu.dimension_semantics<parallel>, #tpu.dimension_semantics<arbitrary>], iteration_bounds = array<i64: 2, 1>, scalar_prefetch = 0 : i64, scratch_operands = 1 : i64, tpu.core_type = #tpu.core_type<tc>, window_params = [{transform_indices = @transform_0, window_bounds = array<i64: 1, 4, 88, 128>}, {transform_indices = @transform_1, window_bounds = array<i64: 9, 128, 128>}, {pipeline_mode = #tpu.pipeline_mode<synchronous>, transform_indices = @transform_2, window_bounds = array<i64: 1, 128>}, {pipeline_mode = #tpu.pipeline_mode<synchronous>, transform_indices = @transform_3, window_bounds = array<i64: 1, 128>}, {transform_indices = @transform_4, window_bounds = array<i64: 1, 128>}, {transform_indices = @transform_5, window_bounds = array<i64: 1, 128>}, {transform_indices = @transform_6, window_bounds = array<i64: 1, 72, 128>}]} {
    %c0_i32 = arith.constant 0 : i32
    %0 = arith.cmpi eq, %arg1, %c0_i32 : i32
    %1 = arith.extui %0 : i1 to i32
    %c0_i32_0 = arith.constant 0 : i32
    %2 = arith.cmpi ne, %1, %c0_i32_0 : i32
    scf.if %2 {
      %c0_61 = arith.constant 0 : index
      %c0_62 = arith.constant 0 : index
      %c0_63 = arith.constant 0 : index
      %c0_64 = arith.constant 0 : index
      %79 = vector.load %arg2[%c0_61, %c0_62, %c0_63, %c0_64] : memref<1x4x88x128xf32, #tpu.memory_space<vmem>>, vector<1x4x88x128xf32>
      %80 = vector.shape_cast %79 : vector<1x4x88x128xf32> to vector<4x88x128xf32>
      %c0_65 = arith.constant 0 : index
      %c0_66 = arith.constant 0 : index
      %81 = vector.load %arg4[%c0_65, %c0_66] : memref<1x128xf32, #tpu.memory_space<vmem>>, vector<1x128xf32>
      %82 = vector.shape_cast %81 : vector<1x128xf32> to vector<1x1x128xf32>
      %83 = vector.broadcast %82 : vector<1x1x128xf32> to vector<4x88x128xf32>
      %84 = arith.mulf %80, %83 : vector<4x88x128xf32>
      %c0_67 = arith.constant 0 : index
      %c0_68 = arith.constant 0 : index
      %85 = vector.load %arg5[%c0_67, %c0_68] : memref<1x128xf32, #tpu.memory_space<vmem>>, vector<1x128xf32>
      %86 = vector.shape_cast %85 : vector<1x128xf32> to vector<1x1x128xf32>
      %87 = vector.broadcast %86 : vector<1x1x128xf32> to vector<4x88x128xf32>
      %88 = arith.addf %84, %87 : vector<4x88x128xf32>
      %cst_69 = arith.constant 0.000000e+00 : f32
      %89 = vector.broadcast %cst_69 : f32 to vector<4x88x128xf32>
      %90 = arith.maximumf %88, %89 : vector<4x88x128xf32>
      %c0_70 = arith.constant 0 : index
      %c0_71 = arith.constant 0 : index
      %c0_72 = arith.constant 0 : index
      %91 = vector.load %arg9[%c0_70, %c0_71, %c0_72] : memref<4x88x128xf32, #tpu.memory_space<vmem>>, vector<4x88x128xf32>
      tpu.vector_store %arg9[%c0_70, %c0_71, %c0_72], %90 {strides = array<i32>} : memref<4x88x128xf32, #tpu.memory_space<vmem>>, vector<4x88x128xf32>,
    } else {
    }
    %cst = arith.constant 0.000000e+00 : f32
    %3 = vector.broadcast %cst : f32 to vector<72x128xf32>
    %c0 = arith.constant 0 : index
    %c0_1 = arith.constant 0 : index
    %c0_2 = arith.constant 0 : index
    %4 = vector.load %arg9[%c0, %c0_1, %c0_2] : memref<4x88x128xf32, #tpu.memory_space<vmem>>, vector<1x72x128xf32>
    %5 = vector.shape_cast %4 : vector<1x72x128xf32> to vector<72x128xf32>
    %6 = arith.truncf %5 : vector<72x128xf32> to vector<72x128xbf16>
    %c0_3 = arith.constant 0 : index
    %c0_4 = arith.constant 0 : index
    %c0_5 = arith.constant 0 : index
    %7 = vector.load %arg3[%c0_3, %c0_4, %c0_5] : memref<9x128x128xbf16, #tpu.memory_space<vmem>>, vector<1x128x128xbf16>
    %8 = vector.shape_cast %7 : vector<1x128x128xbf16> to vector<128x128xbf16>
    %cst_6 = arith.constant dense<0.000000e+00> : vector<72x128xf32>
    %9 = tpu.matmul %6, %8, %cst_6 {dimension_numbers = #tpu.dot_dimension_numbers<[1], [0], [0], [1], [0, 0, 1, 1], [], []>} : vector<72x128xbf16>, vector<128x128xbf16>, vector<72x128xf32> -> vector<72x128xf32>
    %10 = arith.addf %3, %9 : vector<72x128xf32>
    %c1 = arith.constant 1 : index
    %c0_7 = arith.constant 0 : index
    %c0_8 = arith.constant 0 : index
    %11 = vector.load %arg9[%c1, %c0_7, %c0_8] : memref<4x88x128xf32, #tpu.memory_space<vmem>>, vector<1x72x128xf32>
    %12 = vector.shape_cast %11 : vector<1x72x128xf32> to vector<72x128xf32>
    %13 = arith.truncf %12 : vector<72x128xf32> to vector<72x128xbf16>
    %c1_9 = arith.constant 1 : index
    %c0_10 = arith.constant 0 : index
    %c0_11 = arith.constant 0 : index
    %14 = vector.load %arg3[%c1_9, %c0_10, %c0_11] : memref<9x128x128xbf16, #tpu.memory_space<vmem>>, vector<1x128x128xbf16>
    %15 = vector.shape_cast %14 : vector<1x128x128xbf16> to vector<128x128xbf16>
    %cst_12 = arith.constant dense<0.000000e+00> : vector<72x128xf32>
    %16 = tpu.matmul %13, %15, %cst_12 {dimension_numbers = #tpu.dot_dimension_numbers<[1], [0], [0], [1], [0, 0, 1, 1], [], []>} : vector<72x128xbf16>, vector<128x128xbf16>, vector<72x128xf32> -> vector<72x128xf32>
    %17 = arith.addf %10, %16 : vector<72x128xf32>
    %c0_13 = arith.constant 0 : index
    %c1_14 = arith.constant 1 : index
    %c0_15 = arith.constant 0 : index
    %18 = vector.load %arg9[%c0_13, %c1_14, %c0_15] : memref<4x88x128xf32, #tpu.memory_space<vmem>>, vector<1x72x128xf32>
    %19 = vector.shape_cast %18 : vector<1x72x128xf32> to vector<72x128xf32>
    %20 = arith.truncf %19 : vector<72x128xf32> to vector<72x128xbf16>
    %c2 = arith.constant 2 : index
    %c0_16 = arith.constant 0 : index
    %c0_17 = arith.constant 0 : index
    %21 = vector.load %arg3[%c2, %c0_16, %c0_17] : memref<9x128x128xbf16, #tpu.memory_space<vmem>>, vector<1x128x128xbf16>
    %22 = vector.shape_cast %21 : vector<1x128x128xbf16> to vector<128x128xbf16>
    %cst_18 = arith.constant dense<0.000000e+00> : vector<72x128xf32>
    %23 = tpu.matmul %20, %22, %cst_18 {dimension_numbers = #tpu.dot_dimension_numbers<[1], [0], [0], [1], [0, 0, 1, 1], [], []>} : vector<72x128xbf16>, vector<128x128xbf16>, vector<72x128xf32> -> vector<72x128xf32>
    %24 = arith.addf %17, %23 : vector<72x128xf32>
    %c2_19 = arith.constant 2 : index
    %c0_20 = arith.constant 0 : index
    %c0_21 = arith.constant 0 : index
    %25 = vector.load %arg9[%c2_19, %c0_20, %c0_21] : memref<4x88x128xf32, #tpu.memory_space<vmem>>, vector<1x72x128xf32>
    %26 = vector.shape_cast %25 : vector<1x72x128xf32> to vector<72x128xf32>
    %27 = arith.truncf %26 : vector<72x128xf32> to vector<72x128xbf16>
    %c3 = arith.constant 3 : index
    %c0_22 = arith.constant 0 : index
    %c0_23 = arith.constant 0 : index
    %28 = vector.load %arg3[%c3, %c0_22, %c0_23] : memref<9x128x128xbf16, #tpu.memory_space<vmem>>, vector<1x128x128xbf16>
    %29 = vector.shape_cast %28 : vector<1x128x128xbf16> to vector<128x128xbf16>
    %cst_24 = arith.constant dense<0.000000e+00> : vector<72x128xf32>
    %30 = tpu.matmul %27, %29, %cst_24 {dimension_numbers = #tpu.dot_dimension_numbers<[1], [0], [0], [1], [0, 0, 1, 1], [], []>} : vector<72x128xbf16>, vector<128x128xbf16>, vector<72x128xf32> -> vector<72x128xf32>
    %31 = arith.addf %24, %30 : vector<72x128xf32>
    %c3_25 = arith.constant 3 : index
    %c0_26 = arith.constant 0 : index
    %c0_27 = arith.constant 0 : index
    %32 = vector.load %arg9[%c3_25, %c0_26, %c0_27] : memref<4x88x128xf32, #tpu.memory_space<vmem>>, vector<1x72x128xf32>
    %33 = vector.shape_cast %32 : vector<1x72x128xf32> to vector<72x128xf32>
    %34 = arith.truncf %33 : vector<72x128xf32> to vector<72x128xbf16>
    %c4 = arith.constant 4 : index
    %c0_28 = arith.constant 0 : index
    %c0_29 = arith.constant 0 : index
    %35 = vector.load %arg3[%c4, %c0_28, %c0_29] : memref<9x128x128xbf16, #tpu.memory_space<vmem>>, vector<1x128x128xbf16>
    %36 = vector.shape_cast %35 : vector<1x128x128xbf16> to vector<128x128xbf16>
    %cst_30 = arith.constant dense<0.000000e+00> : vector<72x128xf32>
    %37 = tpu.matmul %34, %36, %cst_30 {dimension_numbers = #tpu.dot_dimension_numbers<[1], [0], [0], [1], [0, 0, 1, 1], [], []>} : vector<72x128xbf16>, vector<128x128xbf16>, vector<72x128xf32> -> vector<72x128xf32>
    %38 = arith.addf %31, %37 : vector<72x128xf32>
    %c2_31 = arith.constant 2 : index
    %c1_32 = arith.constant 1 : index
    %c0_33 = arith.constant 0 : index
    %39 = vector.load %arg9[%c2_31, %c1_32, %c0_33] : memref<4x88x128xf32, #tpu.memory_space<vmem>>, vector<1x72x128xf32>
    %40 = vector.shape_cast %39 : vector<1x72x128xf32> to vector<72x128xf32>
    %41 = arith.truncf %40 : vector<72x128xf32> to vector<72x128xbf16>
    %c5 = arith.constant 5 : index
    %c0_34 = arith.constant 0 : index
    %c0_35 = arith.constant 0 : index
    %42 = vector.load %arg3[%c5, %c0_34, %c0_35] : memref<9x128x128xbf16, #tpu.memory_space<vmem>>, vector<1x128x128xbf16>
    %43 = vector.shape_cast %42 : vector<1x128x128xbf16> to vector<128x128xbf16>
    %cst_36 = arith.constant dense<0.000000e+00> : vector<72x128xf32>
    %44 = tpu.matmul %41, %43, %cst_36 {dimension_numbers = #tpu.dot_dimension_numbers<[1], [0], [0], [1], [0, 0, 1, 1], [], []>} : vector<72x128xbf16>, vector<128x128xbf16>, vector<72x128xf32> -> vector<72x128xf32>
    %45 = arith.addf %38, %44 : vector<72x128xf32>
    %c0_37 = arith.constant 0 : index
    %c9 = arith.constant 9 : index
    %c0_38 = arith.constant 0 : index
    %46 = vector.load %arg9[%c0_37, %c9, %c0_38] : memref<4x88x128xf32, #tpu.memory_space<vmem>>, vector<1x72x128xf32>
    %47 = vector.shape_cast %46 : vector<1x72x128xf32> to vector<72x128xf32>
    %48 = arith.truncf %47 : vector<72x128xf32> to vector<72x128xbf16>
    %c6 = arith.constant 6 : index
    %c0_39 = arith.constant 0 : index
    %c0_40 = arith.constant 0 : index
    %49 = vector.load %arg3[%c6, %c0_39, %c0_40] : memref<9x128x128xbf16, #tpu.memory_space<vmem>>, vector<1x128x128xbf16>
    %50 = vector.shape_cast %49 : vector<1x128x128xbf16> to vector<128x128xbf16>
    %cst_41 = arith.constant dense<0.000000e+00> : vector<72x128xf32>
    %51 = tpu.matmul %48, %50, %cst_41 {dimension_numbers = #tpu.dot_dimension_numbers<[1], [0], [0], [1], [0, 0, 1, 1], [], []>} : vector<72x128xbf16>, vector<128x128xbf16>, vector<72x128xf32> -> vector<72x128xf32>
    %52 = arith.addf %45, %51 : vector<72x128xf32>
    %c1_42 = arith.constant 1 : index
    %c9_43 = arith.constant 9 : index
    %c0_44 = arith.constant 0 : index
    %53 = vector.load %arg9[%c1_42, %c9_43, %c0_44] : memref<4x88x128xf32, #tpu.memory_space<vmem>>, vector<1x72x128xf32>
    %54 = vector.shape_cast %53 : vector<1x72x128xf32> to vector<72x128xf32>
    %55 = arith.truncf %54 : vector<72x128xf32> to vector<72x128xbf16>
    %c7 = arith.constant 7 : index
    %c0_45 = arith.constant 0 : index
    %c0_46 = arith.constant 0 : index
    %56 = vector.load %arg3[%c7, %c0_45, %c0_46] : memref<9x128x128xbf16, #tpu.memory_space<vmem>>, vector<1x128x128xbf16>
    %57 = vector.shape_cast %56 : vector<1x128x128xbf16> to vector<128x128xbf16>
    %cst_47 = arith.constant dense<0.000000e+00> : vector<72x128xf32>
    %58 = tpu.matmul %55, %57, %cst_47 {dimension_numbers = #tpu.dot_dimension_numbers<[1], [0], [0], [1], [0, 0, 1, 1], [], []>} : vector<72x128xbf16>, vector<128x128xbf16>, vector<72x128xf32> -> vector<72x128xf32>
    %59 = arith.addf %52, %58 : vector<72x128xf32>
    %c0_48 = arith.constant 0 : index
    %c10 = arith.constant 10 : index
    %c0_49 = arith.constant 0 : index
    %60 = vector.load %arg9[%c0_48, %c10, %c0_49] : memref<4x88x128xf32, #tpu.memory_space<vmem>>, vector<1x72x128xf32>
    %61 = vector.shape_cast %60 : vector<1x72x128xf32> to vector<72x128xf32>
    %62 = arith.truncf %61 : vector<72x128xf32> to vector<72x128xbf16>
    %c8 = arith.constant 8 : index
    %c0_50 = arith.constant 0 : index
    %c0_51 = arith.constant 0 : index
    %63 = vector.load %arg3[%c8, %c0_50, %c0_51] : memref<9x128x128xbf16, #tpu.memory_space<vmem>>, vector<1x128x128xbf16>
    %64 = vector.shape_cast %63 : vector<1x128x128xbf16> to vector<128x128xbf16>
    %cst_52 = arith.constant dense<0.000000e+00> : vector<72x128xf32>
    %65 = tpu.matmul %62, %64, %cst_52 {dimension_numbers = #tpu.dot_dimension_numbers<[1], [0], [0], [1], [0, 0, 1, 1], [], []>} : vector<72x128xbf16>, vector<128x128xbf16>, vector<72x128xf32> -> vector<72x128xf32>
    %66 = arith.addf %59, %65 : vector<72x128xf32>
    %c0_53 = arith.constant 0 : index
    %c0_54 = arith.constant 0 : index
    %67 = vector.load %arg6[%c0_53, %c0_54] : memref<1x128xf32, #tpu.memory_space<vmem>>, vector<1x128xf32>
    %68 = vector.broadcast %67 : vector<1x128xf32> to vector<72x128xf32>
    %69 = arith.mulf %66, %68 : vector<72x128xf32>
    %c0_55 = arith.constant 0 : index
    %c0_56 = arith.constant 0 : index
    %70 = vector.load %arg7[%c0_55, %c0_56] : memref<1x128xf32, #tpu.memory_space<vmem>>, vector<1x128xf32>
    %71 = vector.broadcast %70 : vector<1x128xf32> to vector<72x128xf32>
    %72 = arith.addf %69, %71 : vector<72x128xf32>
    %cst_57 = arith.constant 0.000000e+00 : f32
    %73 = vector.broadcast %cst_57 : f32 to vector<72x128xf32>
    %74 = arith.maximumf %72, %73 : vector<72x128xf32>
    %75 = arith.truncf %74 : vector<72x128xf32> to vector<72x128xbf16>
    %c0_58 = arith.constant 0 : index
    %c0_59 = arith.constant 0 : index
    %c0_60 = arith.constant 0 : index
    %76 = vector.load %arg8[%c0_58, %c0_59, %c0_60] : memref<1x72x128xbf16, #tpu.memory_space<vmem>>, vector<1x72x128xbf16>
    %77 = vector.shape_cast %76 : vector<1x72x128xbf16> to vector<72x128xbf16>
    %78 = vector.shape_cast %75 : vector<72x128xbf16> to vector<1x72x128xbf16>
    tpu.vector_store %arg8[%c0_58, %c0_59, %c0_60], %78 {strides = array<i32>} : memref<1x72x128xbf16, #tpu.memory_space<vmem>>, vector<1x72x128xbf16>,
    return
  }
  func.func @transform_0(%arg0: i32, %arg1: i32) -> (i32, i32, i32, i32) {
    %c0_i32 = arith.constant 0 : i32
    %c0_i32_0 = arith.constant 0 : i32
    %c0_i32_1 = arith.constant 0 : i32
    %c0_i32_2 = arith.constant 0 : i32
    return %arg0, %c0_i32, %c0_i32_0, %c0_i32_1 : i32, i32, i32, i32
  }
  func.func @transform_1(%arg0: i32, %arg1: i32) -> (i32, i32, i32) {
    %c0_i32 = arith.constant 0 : i32
    %c0_i32_0 = arith.constant 0 : i32
    %c0_i32_1 = arith.constant 0 : i32
    return %c0_i32, %c0_i32_0, %arg1 : i32, i32, i32
  }
  func.func @transform_2(%arg0: i32, %arg1: i32) -> (i32, i32) {
    %c0_i32 = arith.constant 0 : i32
    %c0_i32_0 = arith.constant 0 : i32
    %c0_i32_1 = arith.constant 0 : i32
    return %c0_i32, %c0_i32_0 : i32, i32
  }
  func.func @transform_3(%arg0: i32, %arg1: i32) -> (i32, i32) {
    %c0_i32 = arith.constant 0 : i32
    %c0_i32_0 = arith.constant 0 : i32
    %c0_i32_1 = arith.constant 0 : i32
    return %c0_i32, %c0_i32_0 : i32, i32
  }
  func.func @transform_4(%arg0: i32, %arg1: i32) -> (i32, i32) {
    %c0_i32 = arith.constant 0 : i32
    %c0_i32_0 = arith.constant 0 : i32
    return %c0_i32, %arg1 : i32, i32
  }
  func.func @transform_5(%arg0: i32, %arg1: i32) -> (i32, i32) {
    %c0_i32 = arith.constant 0 : i32
    %c0_i32_0 = arith.constant 0 : i32
    return %c0_i32, %arg1 : i32, i32
  }
  func.func @transform_6(%arg0: i32, %arg1: i32) -> (i32, i32, i32) {
    %c0_i32 = arith.constant 0 : i32
    %c0_i32_0 = arith.constant 0 : i32
    return %arg0, %c0_i32, %arg1 : i32, i32, i32
  }
}

module attributes {stable_mosaic.version = 11 : i64} {
  func.func @kernel(%arg0: i32, %arg1: i32, %arg2: memref<1x4x88x128xf32, #tpu.memory_space<vmem>>, %arg3: memref<9x128x128xbf16, #tpu.memory_space<vmem>>, %arg4: memref<1x128xf32, #tpu.memory_space<vmem>>, %arg5: memref<1x128xf32, #tpu.memory_space<vmem>>, %arg6: memref<1x128xf32, #tpu.memory_space<vmem>>, %arg7: memref<1x128xf32, #tpu.memory_space<vmem>>, %arg8: memref<1x72x128xbf16, #tpu.memory_space<vmem>>, %arg9: memref<4x88x128xf32, #tpu.memory_space<vmem>>) attributes {dimension_semantics = [#tpu.dimension_semantics<parallel>, #tpu.dimension_semantics<arbitrary>], iteration_bounds = array<i64: 2, 1>, scalar_prefetch = 0 : i64, scratch_operands = 1 : i64, tpu.core_type = #tpu.core_type<tc>, window_params = [{transform_indices = @transform_0, window_bounds = array<i64: 1, 4, 88, 128>}, {transform_indices = @transform_1, window_bounds = array<i64: 9, 128, 128>}, {pipeline_mode = #tpu.pipeline_mode<synchronous>, transform_indices = @transform_2, window_bounds = array<i64: 1, 128>}, {pipeline_mode = #tpu.pipeline_mode<synchronous>, transform_indices = @transform_3, window_bounds = array<i64: 1, 128>}, {transform_indices = @transform_4, window_bounds = array<i64: 1, 128>}, {transform_indices = @transform_5, window_bounds = array<i64: 1, 128>}, {transform_indices = @transform_6, window_bounds = array<i64: 1, 72, 128>}]} {
    %c0_i32 = arith.constant 0 : i32
    %0 = arith.cmpi eq, %arg1, %c0_i32 : i32
    %1 = arith.extui %0 : i1 to i32
    %c0_i32_0 = arith.constant 0 : i32
    %2 = arith.cmpi ne, %1, %c0_i32_0 : i32
    scf.if %2 {
      %c0_61 = arith.constant 0 : index
      %c0_62 = arith.constant 0 : index
      %c0_63 = arith.constant 0 : index
      %c0_64 = arith.constant 0 : index
      %79 = vector.load %arg2[%c0_61, %c0_62, %c0_63, %c0_64] : memref<1x4x88x128xf32, #tpu.memory_space<vmem>>, vector<1x4x88x128xf32>
      %80 = vector.shape_cast %79 : vector<1x4x88x128xf32> to vector<4x88x128xf32>
      %c0_65 = arith.constant 0 : index
      %c0_66 = arith.constant 0 : index
      %81 = vector.load %arg4[%c0_65, %c0_66] : memref<1x128xf32, #tpu.memory_space<vmem>>, vector<1x128xf32>
      %82 = vector.shape_cast %81 : vector<1x128xf32> to vector<1x1x128xf32>
      %83 = vector.broadcast %82 : vector<1x1x128xf32> to vector<4x88x128xf32>
      %84 = arith.mulf %80, %83 : vector<4x88x128xf32>
      %c0_67 = arith.constant 0 : index
      %c0_68 = arith.constant 0 : index
      %85 = vector.load %arg5[%c0_67, %c0_68] : memref<1x128xf32, #tpu.memory_space<vmem>>, vector<1x128xf32>
      %86 = vector.shape_cast %85 : vector<1x128xf32> to vector<1x1x128xf32>
      %87 = vector.broadcast %86 : vector<1x1x128xf32> to vector<4x88x128xf32>
      %88 = arith.addf %84, %87 : vector<4x88x128xf32>
      %cst_69 = arith.constant 0.000000e+00 : f32
      %89 = vector.broadcast %cst_69 : f32 to vector<4x88x128xf32>
      %90 = arith.maximumf %88, %89 : vector<4x88x128xf32>
      %c0_70 = arith.constant 0 : index
      %c0_71 = arith.constant 0 : index
      %c0_72 = arith.constant 0 : index
      %91 = vector.load %arg9[%c0_70, %c0_71, %c0_72] : memref<4x88x128xf32, #tpu.memory_space<vmem>>, vector<4x88x128xf32>
      tpu.vector_store %arg9[%c0_70, %c0_71, %c0_72], %90 {strides = array<i32>} : memref<4x88x128xf32, #tpu.memory_space<vmem>>, vector<4x88x128xf32>,
    } else {
    }
    %cst = arith.constant 0.000000e+00 : f32
    %3 = vector.broadcast %cst : f32 to vector<72x128xf32>
    %c0 = arith.constant 0 : index
    %c0_1 = arith.constant 0 : index
    %c0_2 = arith.constant 0 : index
    %4 = vector.load %arg9[%c0, %c0_1, %c0_2] : memref<4x88x128xf32, #tpu.memory_space<vmem>>, vector<1x72x128xf32>
    %5 = vector.shape_cast %4 : vector<1x72x128xf32> to vector<72x128xf32>
    %6 = arith.truncf %5 : vector<72x128xf32> to vector<72x128xbf16>
    %c0_3 = arith.constant 0 : index
    %c0_4 = arith.constant 0 : index
    %c0_5 = arith.constant 0 : index
    %7 = vector.load %arg3[%c0_3, %c0_4, %c0_5] : memref<9x128x128xbf16, #tpu.memory_space<vmem>>, vector<1x128x128xbf16>
    %8 = vector.shape_cast %7 : vector<1x128x128xbf16> to vector<128x128xbf16>
    %cst_6 = arith.constant dense<0.000000e+00> : vector<72x128xf32>
    %9 = tpu.matmul %6, %8, %cst_6 {dimension_numbers = #tpu.dot_dimension_numbers<[1], [0], [0], [1], [0, 0, 1, 1], [], []>} : vector<72x128xbf16>, vector<128x128xbf16>, vector<72x128xf32> -> vector<72x128xf32>
    %10 = arith.addf %3, %9 : vector<72x128xf32>
    %c1 = arith.constant 1 : index
    %c0_7 = arith.constant 0 : index
    %c0_8 = arith.constant 0 : index
    %11 = vector.load %arg9[%c1, %c0_7, %c0_8] : memref<4x88x128xf32, #tpu.memory_space<vmem>>, vector<1x72x128xf32>
    %12 = vector.shape_cast %11 : vector<1x72x128xf32> to vector<72x128xf32>
    %13 = arith.truncf %12 : vector<72x128xf32> to vector<72x128xbf16>
    %c1_9 = arith.constant 1 : index
    %c0_10 = arith.constant 0 : index
    %c0_11 = arith.constant 0 : index
    %14 = vector.load %arg3[%c1_9, %c0_10, %c0_11] : memref<9x128x128xbf16, #tpu.memory_space<vmem>>, vector<1x128x128xbf16>
    %15 = vector.shape_cast %14 : vector<1x128x128xbf16> to vector<128x128xbf16>
    %cst_12 = arith.constant dense<0.000000e+00> : vector<72x128xf32>
    %16 = tpu.matmul %13, %15, %cst_12 {dimension_numbers = #tpu.dot_dimension_numbers<[1], [0], [0], [1], [0, 0, 1, 1], [], []>} : vector<72x128xbf16>, vector<128x128xbf16>, vector<72x128xf32> -> vector<72x128xf32>
    %17 = arith.addf %10, %16 : vector<72x128xf32>
    %c0_13 = arith.constant 0 : index
    %c1_14 = arith.constant 1 : index
    %c0_15 = arith.constant 0 : index
    %18 = vector.load %arg9[%c0_13, %c1_14, %c0_15] : memref<4x88x128xf32, #tpu.memory_space<vmem>>, vector<1x72x128xf32>
    %19 = vector.shape_cast %18 : vector<1x72x128xf32> to vector<72x128xf32>
    %20 = arith.truncf %19 : vector<72x128xf32> to vector<72x128xbf16>
    %c2 = arith.constant 2 : index
    %c0_16 = arith.constant 0 : index
    %c0_17 = arith.constant 0 : index
    %21 = vector.load %arg3[%c2, %c0_16, %c0_17] : memref<9x128x128xbf16, #tpu.memory_space<vmem>>, vector<1x128x128xbf16>
    %22 = vector.shape_cast %21 : vector<1x128x128xbf16> to vector<128x128xbf16>
    %cst_18 = arith.constant dense<0.000000e+00> : vector<72x128xf32>
    %23 = tpu.matmul %20, %22, %cst_18 {dimension_numbers = #tpu.dot_dimension_numbers<[1], [0], [0], [1], [0, 0, 1, 1], [], []>} : vector<72x128xbf16>, vector<128x128xbf16>, vector<72x128xf32> -> vector<72x128xf32>
    %24 = arith.addf %17, %23 : vector<72x128xf32>
    %c2_19 = arith.constant 2 : index
    %c0_20 = arith.constant 0 : index
    %c0_21 = arith.constant 0 : index
    %25 = vector.load %arg9[%c2_19, %c0_20, %c0_21] : memref<4x88x128xf32, #tpu.memory_space<vmem>>, vector<1x72x128xf32>
    %26 = vector.shape_cast %25 : vector<1x72x128xf32> to vector<72x128xf32>
    %27 = arith.truncf %26 : vector<72x128xf32> to vector<72x128xbf16>
    %c3 = arith.constant 3 : index
    %c0_22 = arith.constant 0 : index
    %c0_23 = arith.constant 0 : index
    %28 = vector.load %arg3[%c3, %c0_22, %c0_23] : memref<9x128x128xbf16, #tpu.memory_space<vmem>>, vector<1x128x128xbf16>
    %29 = vector.shape_cast %28 : vector<1x128x128xbf16> to vector<128x128xbf16>
    %cst_24 = arith.constant dense<0.000000e+00> : vector<72x128xf32>
    %30 = tpu.matmul %27, %29, %cst_24 {dimension_numbers = #tpu.dot_dimension_numbers<[1], [0], [0], [1], [0, 0, 1, 1], [], []>} : vector<72x128xbf16>, vector<128x128xbf16>, vector<72x128xf32> -> vector<72x128xf32>
    %31 = arith.addf %24, %30 : vector<72x128xf32>
    %c3_25 = arith.constant 3 : index
    %c0_26 = arith.constant 0 : index
    %c0_27 = arith.constant 0 : index
    %32 = vector.load %arg9[%c3_25, %c0_26, %c0_27] : memref<4x88x128xf32, #tpu.memory_space<vmem>>, vector<1x72x128xf32>
    %33 = vector.shape_cast %32 : vector<1x72x128xf32> to vector<72x128xf32>
    %34 = arith.truncf %33 : vector<72x128xf32> to vector<72x128xbf16>
    %c4 = arith.constant 4 : index
    %c0_28 = arith.constant 0 : index
    %c0_29 = arith.constant 0 : index
    %35 = vector.load %arg3[%c4, %c0_28, %c0_29] : memref<9x128x128xbf16, #tpu.memory_space<vmem>>, vector<1x128x128xbf16>
    %36 = vector.shape_cast %35 : vector<1x128x128xbf16> to vector<128x128xbf16>
    %cst_30 = arith.constant dense<0.000000e+00> : vector<72x128xf32>
    %37 = tpu.matmul %34, %36, %cst_30 {dimension_numbers = #tpu.dot_dimension_numbers<[1], [0], [0], [1], [0, 0, 1, 1], [], []>} : vector<72x128xbf16>, vector<128x128xbf16>, vector<72x128xf32> -> vector<72x128xf32>
    %38 = arith.addf %31, %37 : vector<72x128xf32>
    %c2_31 = arith.constant 2 : index
    %c1_32 = arith.constant 1 : index
    %c0_33 = arith.constant 0 : index
    %39 = vector.load %arg9[%c2_31, %c1_32, %c0_33] : memref<4x88x128xf32, #tpu.memory_space<vmem>>, vector<1x72x128xf32>
    %40 = vector.shape_cast %39 : vector<1x72x128xf32> to vector<72x128xf32>
    %41 = arith.truncf %40 : vector<72x128xf32> to vector<72x128xbf16>
    %c5 = arith.constant 5 : index
    %c0_34 = arith.constant 0 : index
    %c0_35 = arith.constant 0 : index
    %42 = vector.load %arg3[%c5, %c0_34, %c0_35] : memref<9x128x128xbf16, #tpu.memory_space<vmem>>, vector<1x128x128xbf16>
    %43 = vector.shape_cast %42 : vector<1x128x128xbf16> to vector<128x128xbf16>
    %cst_36 = arith.constant dense<0.000000e+00> : vector<72x128xf32>
    %44 = tpu.matmul %41, %43, %cst_36 {dimension_numbers = #tpu.dot_dimension_numbers<[1], [0], [0], [1], [0, 0, 1, 1], [], []>} : vector<72x128xbf16>, vector<128x128xbf16>, vector<72x128xf32> -> vector<72x128xf32>
    %45 = arith.addf %38, %44 : vector<72x128xf32>
    %c0_37 = arith.constant 0 : index
    %c9 = arith.constant 9 : index
    %c0_38 = arith.constant 0 : index
    %46 = vector.load %arg9[%c0_37, %c9, %c0_38] : memref<4x88x128xf32, #tpu.memory_space<vmem>>, vector<1x72x128xf32>
    %47 = vector.shape_cast %46 : vector<1x72x128xf32> to vector<72x128xf32>
    %48 = arith.truncf %47 : vector<72x128xf32> to vector<72x128xbf16>
    %c6 = arith.constant 6 : index
    %c0_39 = arith.constant 0 : index
    %c0_40 = arith.constant 0 : index
    %49 = vector.load %arg3[%c6, %c0_39, %c0_40] : memref<9x128x128xbf16, #tpu.memory_space<vmem>>, vector<1x128x128xbf16>
    %50 = vector.shape_cast %49 : vector<1x128x128xbf16> to vector<128x128xbf16>
    %cst_41 = arith.constant dense<0.000000e+00> : vector<72x128xf32>
    %51 = tpu.matmul %48, %50, %cst_41 {dimension_numbers = #tpu.dot_dimension_numbers<[1], [0], [0], [1], [0, 0, 1, 1], [], []>} : vector<72x128xbf16>, vector<128x128xbf16>, vector<72x128xf32> -> vector<72x128xf32>
    %52 = arith.addf %45, %51 : vector<72x128xf32>
    %c1_42 = arith.constant 1 : index
    %c9_43 = arith.constant 9 : index
    %c0_44 = arith.constant 0 : index
    %53 = vector.load %arg9[%c1_42, %c9_43, %c0_44] : memref<4x88x128xf32, #tpu.memory_space<vmem>>, vector<1x72x128xf32>
    %54 = vector.shape_cast %53 : vector<1x72x128xf32> to vector<72x128xf32>
    %55 = arith.truncf %54 : vector<72x128xf32> to vector<72x128xbf16>
    %c7 = arith.constant 7 : index
    %c0_45 = arith.constant 0 : index
    %c0_46 = arith.constant 0 : index
    %56 = vector.load %arg3[%c7, %c0_45, %c0_46] : memref<9x128x128xbf16, #tpu.memory_space<vmem>>, vector<1x128x128xbf16>
    %57 = vector.shape_cast %56 : vector<1x128x128xbf16> to vector<128x128xbf16>
    %cst_47 = arith.constant dense<0.000000e+00> : vector<72x128xf32>
    %58 = tpu.matmul %55, %57, %cst_47 {dimension_numbers = #tpu.dot_dimension_numbers<[1], [0], [0], [1], [0, 0, 1, 1], [], []>} : vector<72x128xbf16>, vector<128x128xbf16>, vector<72x128xf32> -> vector<72x128xf32>
    %59 = arith.addf %52, %58 : vector<72x128xf32>
    %c0_48 = arith.constant 0 : index
    %c10 = arith.constant 10 : index
    %c0_49 = arith.constant 0 : index
    %60 = vector.load %arg9[%c0_48, %c10, %c0_49] : memref<4x88x128xf32, #tpu.memory_space<vmem>>, vector<1x72x128xf32>
    %61 = vector.shape_cast %60 : vector<1x72x128xf32> to vector<72x128xf32>
    %62 = arith.truncf %61 : vector<72x128xf32> to vector<72x128xbf16>
    %c8 = arith.constant 8 : index
    %c0_50 = arith.constant 0 : index
    %c0_51 = arith.constant 0 : index
    %63 = vector.load %arg3[%c8, %c0_50, %c0_51] : memref<9x128x128xbf16, #tpu.memory_space<vmem>>, vector<1x128x128xbf16>
    %64 = vector.shape_cast %63 : vector<1x128x128xbf16> to vector<128x128xbf16>
    %cst_52 = arith.constant dense<0.000000e+00> : vector<72x128xf32>
    %65 = tpu.matmul %62, %64, %cst_52 {dimension_numbers = #tpu.dot_dimension_numbers<[1], [0], [0], [1], [0, 0, 1, 1], [], []>} : vector<72x128xbf16>, vector<128x128xbf16>, vector<72x128xf32> -> vector<72x128xf32>
    %66 = arith.addf %59, %65 : vector<72x128xf32>
    %c0_53 = arith.constant 0 : index
    %c0_54 = arith.constant 0 : index
    %67 = vector.load %arg6[%c0_53, %c0_54] : memref<1x128xf32, #tpu.memory_space<vmem>>, vector<1x128xf32>
    %68 = vector.broadcast %67 : vector<1x128xf32> to vector<72x128xf32>
    %69 = arith.mulf %66, %68 : vector<72x128xf32>
    %c0_55 = arith.constant 0 : index
    %c0_56 = arith.constant 0 : index
    %70 = vector.load %arg7[%c0_55, %c0_56] : memref<1x128xf32, #tpu.memory_space<vmem>>, vector<1x128xf32>
    %71 = vector.broadcast %70 : vector<1x128xf32> to vector<72x128xf32>
    %72 = arith.addf %69, %71 : vector<72x128xf32>
    %cst_57 = arith.constant 0.000000e+00 : f32
    %73 = vector.broadcast %cst_57 : f32 to vector<72x128xf32>
    %74 = arith.maximumf %72, %73 : vector<72x128xf32>
    %75 = arith.truncf %74 : vector<72x128xf32> to vector<72x128xbf16>
    %c0_58 = arith.constant 0 : index
    %c0_59 = arith.constant 0 : index
    %c0_60 = arith.constant 0 : index
    %76 = vector.load %arg8[%c0_58, %c0_59, %c0_60] : memref<1x72x128xbf16, #tpu.memory_space<vmem>>, vector<1x72x128xbf16>
    %77 = vector.shape_cast %76 : vector<1x72x128xbf16> to vector<72x128xbf16>
    %78 = vector.shape_cast %75 : vector<72x128xbf16> to vector<1x72x128xbf16>
    tpu.vector_store %arg8[%c0_58, %c0_59, %c0_60], %78 {strides = array<i32>} : memref<1x72x128xbf16, #tpu.memory_space<vmem>>, vector<1x72x128xbf16>,
    return
  }
  func.func @transform_0(%arg0: i32, %arg1: i32) -> (i32, i32, i32, i32) {
    %c0_i32 = arith.constant 0 : i32
    %c0_i32_0 = arith.constant 0 : i32
    %c0_i32_1 = arith.constant 0 : i32
    %c0_i32_2 = arith.constant 0 : i32
    return %arg0, %c0_i32, %c0_i32_0, %c0_i32_1 : i32, i32, i32, i32
  }
  func.func @transform_1(%arg0: i32, %arg1: i32) -> (i32, i32, i32) {
    %c0_i32 = arith.constant 0 : i32
    %c0_i32_0 = arith.constant 0 : i32
    %c0_i32_1 = arith.constant 0 : i32
    return %c0_i32, %c0_i32_0, %arg1 : i32, i32, i32
  }
  func.func @transform_2(%arg0: i32, %arg1: i32) -> (i32, i32) {
    %c0_i32 = arith.constant 0 : i32
    %c0_i32_0 = arith.constant 0 : i32
    %c0_i32_1 = arith.constant 0 : i32
    return %c0_i32, %c0_i32_0 : i32, i32
  }
  func.func @transform_3(%arg0: i32, %arg1: i32) -> (i32, i32) {
    %c0_i32 = arith.constant 0 : i32
    %c0_i32_0 = arith.constant 0 : i32
    %c0_i32_1 = arith.constant 0 : i32
    return %c0_i32, %c0_i32_0 : i32, i32
  }
  func.func @transform_4(%arg0: i32, %arg1: i32) -> (i32, i32) {
    %c0_i32 = arith.constant 0 : i32
    %c0_i32_0 = arith.constant 0 : i32
    return %c0_i32, %arg1 : i32, i32
  }
  func.func @transform_5(%arg0: i32, %arg1: i32) -> (i32, i32) {
    %c0_i32 = arith.constant 0 : i32
    %c0_i32_0 = arith.constant 0 : i32
    return %c0_i32, %arg1 : i32, i32
  }
  func.func @transform_6(%arg0: i32, %arg1: i32) -> (i32, i32, i32) {
    %c0_i32 = arith.constant 0 : i32
    %c0_i32_0 = arith.constant 0 : i32
    return %arg0, %c0_i32, %arg1 : i32, i32, i32
  }
}

</mosaic_0001>

<bundles_post_ra>
// kernel: tpu_custom_call.1
= control target key start
LH: loop header
LB: loop body
LE: loop exit
PB: predicated region body
PF: predicated region fallthrough
CT: control target
= control target key end

     0   :  { %s3068_s0 = inlined_call_operand.hbm [shape: f32[2,4,88,128], index: 0, kind: input, shape index: {}]   ;;  %s3069_s1 = inlined_call_operand.hbm [shape: bf16[9,128,128], index: 1, kind: input, shape index: {}]   ;;  %s3070_s2 = inlined_call_operand.vmem [shape: f32[1,128], index: 2, kind: input, shape index: {}]   ;;  %s3071_s3 = inlined_call_operand.vmem [shape: f32[1,128], index: 3, kind: input, shape index: {}]   ;;  %s3072_s4 = inlined_call_operand.vmem [shape: f32[1,128], index: 4, kind: input, shape index: {}]   ;;  %s3073_s5 = inlined_call_operand.vmem [shape: f32[1,128], index: 5, kind: input, shape index: {}]   ;;  %s3074_s6 = inlined_call_operand.hbm [shape: bf16[2,72,128], index: 6, kind: output, shape index: {}]  }
   0x1   :  { %3077 = sst [smem:[#allocation14_spill]] %s3069_s1 }
   0x2   :  { %11 = vsyncpa [#allocation4], 0 }
   0x3   :  { %13 = vsyncpa [#allocation4 + $0x1], 0 }
   0x4   :  { %14 = vsyncpa [#allocation7], 0 }
   0x5   :  { %15 = vsyncpa [#allocation5], 0 }
   0x6   :  { %17 = vsyncpa [#allocation5 + $0x1], 0  ;;  %s2522_s21 = smov 0   ;;  %s2524_s22 = smov 0  }
   0x7   :  { %s2526_s23 = smov 0   ;;  %s2528_s24 = smov 0  }
   0x8   :  { %s2530_s25 = smov 0   ;;  %s2532_s26 = smov 0  }
   0x9 LB: > { %s1832_s27 = sadd.s32 4294967295, %s2478_s26   ;;  %s1833_s28 = sadd.s32 4294967294, %s2478_s26   ;;  %s2478_s26 = sphi %s2532_s26, %s23_s26   ;;  %s2474_s25 = sphi %s2530_s25, %s3093_s25   ;;  %s2470_s24 = sphi %s2528_s24, %s3092_s24   ;;  %s2466_s23 = sphi %s2526_s23, %s3091_s23   ;;  %s2462_s22 = sphi %s2524_s22, %s3090_s22   ;;  %s2458_s21 = sphi %s2522_s21, %s3089_s21  }
   0xa   : > { %p55_p0 = scmp.ne.s32.totalorder %s2462_s22, %s2458_s21  ;;  %p2556_p1 = scmp.eq.s32.totalorder %s1832_s27, 0 }
   0xb   : > { %p2560_p2 = scmp.eq.s32.totalorder %s1832_s27, 1  ;;  %p207_p3 = scmp.eq.s32.totalorder %s1833_s28, 1 }
   0xc   : > { %p2566_p4 = por %p2556_p1, %p55_p0  ;;  %p1834_p5 = scmp.ge.s32.totalorder %s2478_s26, 1 }
   0xd   : > { %p2571_p6 = por %p207_p3, %p55_p0  ;;  %p214_p7 = scmp.lt.s32.totalorder %s2478_s26, 3 }
   0xe   : > { %s3083_s1 = sld [smem:[#allocation14_spill]]  ;;  %s2480_s13 = smov [#allocation6]  }
   0xf   : > { %s3081_s8 = scalar_select %p2571_p6, 1, 0 }
  0x10   : > { %p2579_p8 = pnand %p1834_p5, %p214_p7  ;;  %s229_s14 = sshll.u32 %s2480_s13, 4  ;;  %s230_s14 = int_to_ptr.vmem [resolvable:$true] %s229_s14 }
  0x11   : > { %3082 = sst [smem:[#allocation12_spill]] %s3081_s8  ;;  %p1838_p11 = scmp.ge.s32.totalorder %s2478_s26, 2 }
  0x12   : > { %p2257_p9 = pneg %p2579_p8  ;;  %s2481_s15 = smov 64  }
  0x13   : > { %s2482_s16 = smov 4   ;;  %s35_s17 = sadd.s32 1, %s2474_s25 }
  0x14   : > { %s227_s11 = sshll.u32 %s3083_s1, 4  ;;  %p2258_p10 = pnand %p2257_p9, %p2556_p1  ;;  %s228_s11 = int_to_ptr.hbm [resolvable:$true] %s227_s11 }
  0x15   : > { %p37_p12 = scmp.ge.s32.totalorder %s35_s17, 2  ;;  %s42_s18 = sadd.s32 1, %s2466_s23 }
  0x16   : > { %2260 = dma.hbm_to_vmem [thread:$0]  (!%p2258_p10), %s228_s11, 9216, %s230_s14, [#allocation7], %s2481_s15, %s2481_s15, %s2482_s16  }
  0x17   : > { %p49_p13 = scmp.ne.s32.totalorder %s2466_s23, %s2462_s22  ;;  %p50_p0 = scmp.eq.s32.totalorder %s2478_s26, 0 }
  0x18   : > { %s3095_s17 = smov (%p37_p12, %s35_s17), 0  ;;  %p2270_p7 = scmp.lt.s32.totalorder %s2478_s26, 2 }
  0x19   : > { %3085 = sst [smem:[#allocation13_spill]] %s3095_s17  ;;  %p51_p3 = por %p50_p0, %p49_p13 }
  0x1a   : > { %p2597_p5 = por %p2560_p2, %p49_p13  ;;  %s39_s20 = ssub.s32 %s2474_s25, %s3095_s17 }
  0x1b   : > { %p40_p9 = scmp.eq.s32.totalorder %s39_s20, 0  ;;  %s261_s27 = sand.u32 1, %s2466_s23  }
  0x1c   : > { %s2244_s28 = smul.u32 352, %s261_s27  ;;  %p2262_p10 = pnand %p2270_p7, %p51_p3 }
  0x1d   : > { %s2606_s9 = scalar_select %p40_p9, %s2466_s23, %s42_s18  }
  0x1e   : > { %s2245_s10 = smul.u32 352, %s2474_s25  ;;  %s265_s11 = scalar_lea.vmem [#allocation3], %s2244_s28 }
  0x1f   : > { %s273_s13 = sshll.u32 %s265_s11, 4  ;;  %s262_s1 = scalar_lea.sflag [#allocation4], %s261_s27  ;;  %s274_s13 = int_to_ptr.vmem [resolvable:$true] %s273_s13 }
  0x20   : > { %s270_s16 = scalar_lea.hbm %s3068_s0, %s2245_s10  ;;  %s2483_s8 = smov 128  }
  0x21   : > { %s271_s30 = sshll.u32 %s270_s16, 4  ;;  %s2484_s17 = smov 8   ;;  %s272_s30 = int_to_ptr.hbm [resolvable:$true] %s271_s30 }
  0x22   : > { %2264 = dma.hbm_to_vmem [thread:$0]  (!%p2262_p10), %s272_s30, 5632, %s274_s13, %s262_s1, %s2483_s8, %s2483_s8, %s2484_s17  }
  0x23   : > { %285 = sbr.rel (%p2579_p8) target bundleno = 404 (0x194), region = 44  ;;  %s2615_s18 = sand.u32 (!%p2579_p8), 1, %s2462_s22  }
  0x24   : > { %s2246_s20 = smul.u32 (!%p2579_p8), 352, %s2615_s18  ;;  %s288_s28 = scalar_lea.sflag (!%p2579_p8), [#allocation4], %s2615_s18 }
  0x26   : > { %s2619_s11 = scalar_lea.vmem (!%p2579_p8), [#allocation3], %s2246_s20 }
  0x28   : > { %2445 = dma.done.wait (%p2566_p4), %s288_s28, 5632  }
  0x29   : > { %2447 = vsyncadd (%p2566_p4), %s288_s28, 4294961664 }
  0x2a   : > { %2449 = dma.done.wait (%p2556_p1), [#allocation7], 9216  }
  0x2b   : > { %2451 = vsyncadd (%p2556_p1), [#allocation7], 4294958080  ;;  %v2632_v0 = vld [vmem:[%s3070_s2] ss:$0 sm:$0xff]  ;;  %v2148_v1 = vld [vmem:[#allocation6 + $0x78] sm:$0xff]  ;;  %s2247_s13 = smul.u32 36, %s2615_s18 }
  0x2c   : > { %v2637_v2 = vld [vmem:[%s3071_s3] ss:$0 sm:$0xff]  ;;  %680 = vmatpush.bf16.msra.mxu0 %v2148_v1  ;;  %2228 = vmatpush.bf16.msra.mxu1 %v2148_v1  ;;  %v2147_v3 = vld [vmem:[#allocation6 + $0x70] sm:$0xff]  ;;  %v2164_v4 = vld [vmem:[#allocation6 + $0xf8] sm:$0xff]  ;;  %s2248_s15 = smul.u32 36, %s2470_s24  ;;  %s2412_s29 = scalar_lea.hbm %s3074_s6, 72 }
  0x2d   : > { %2229 = vmatpush.bf16.msra.mxu2 %v2148_v1  ;;  %v2163_v5 = vld [vmem:[#allocation6 + $0xf0] sm:$0xff]  ;;  %995 = vmatpush.bf16.msra.mxu3 %v2164_v4  ;;  %v353_v6 = vld [vmem:[%s2619_s11 + $0x58] sm:$0xff]  ;;  %v354_v7 = vld [vmem:[%s2619_s11 + $0x60] sm:$0xff]  ;;  %s3003_s14 = scalar_lea.vmem [#allocation8], %s2247_s13 }
  0x2e   : > { %v357_v8 = vld [vmem:[%s2619_s11 + $0x78] sm:$0xff]  ;;  %v401_v9 = vmul.f32 %v2632_v0, %v353_v6  ;;  %v358_v10 = vld [vmem:[%s2619_s11 + $0x80] sm:$0xff]  ;;  %v2146_v11 = vld [vmem:[#allocation6 + $0x68] sm:$0xff]  ;;  %v402_v12 = vmul.f32 %v2632_v0, %v354_v7  ;;  %s1709_s20 = scalar_lea.hbm %s3074_s6, %s2248_s15  ;;  %s1710_s24 = sshll.u32 %s3003_s14, 4  ;;  %s1711_s24 = int_to_ptr.vmem [resolvable:$true] %s1710_s24 }
  0x2f   : > { %v405_v13 = vmul.f32 %v2632_v0, %v357_v8  ;;  %v406_v14 = vmul.f32 %v2632_v0, %v358_v10  ;;  %v361_v16 = vld [vmem:[%s2619_s11 + $0x98] sm:$0xff]  ;;  %v2162_v20 = vld [vmem:[#allocation6 + $0xe8] sm:$0xff]  ;;  %v2145_v21 = vld [vmem:[#allocation6 + $0x60] sm:$0xff]  ;;  %s1712_s28 = sshll.u32 %s1709_s20, 4  ;;  %s1713_s28 = int_to_ptr.hbm [resolvable:$true] %s1712_s28 }
  0x30   : > { %681 = vmatpush.bf16.msra.mxu0 %v2147_v3  ;;  %2230 = vmatpush.bf16.msra.mxu1 %v2147_v3  ;;  %v2648_v15 = vadd.f32 %v2637_v2, %v401_v9  ;;  %v2652_v17 = vadd.f32 %v2637_v2, %v402_v12  ;;  %v409_v23 = vmul.f32 %v2632_v0, %v361_v16  ;;  %v355_v24 = vld [vmem:[%s2619_s11 + $0x68] sm:$0xff]  ;;  %v356_v26 = vld [vmem:[%s2619_s11 + $0x70] sm:$0xff]  ;;  %v2161_v35 = vld [vmem:[#allocation6 + $0xe0] sm:$0xff]  ;;  %s2406_s1 = sshra.s32 %s1713_s28, 4  ;;  %s2407_s1 = int_to_ptr.hbm [resolvable:$true] %s2406_s1 }
  0x31   : > { %2231 = vmatpush.bf16.msra.mxu2 %v2147_v3  ;;  %996 = vmatpush.bf16.msra.mxu3 %v2163_v5  ;;  %v2655_v18 = vadd.f32 %v2637_v2, %v405_v13  ;;  %v2658_v19 = vadd.f32 %v2637_v2, %v406_v14  ;;  %v403_v27 = vmul.f32 %v2632_v0, %v355_v24  ;;  %v359_v28 = vld [vmem:[%s2619_s11 + $0x88] sm:$0xff]  ;;  %v360_v29 = vld [vmem:[%s2619_s11 + $0x90] sm:$0xff]  ;;  %v2144_v37 = vld [vmem:[#allocation6 + $0x58] sm:$0xff]  ;;  %s2408_s8 = scalar_lea.hbm %s2407_s1, 36  ;;  %p2413_p8 = scmp.lt.s32.totalorder %s2407_s1, %s3074_s6 }
  0x32   : > { %v493_v22 = vmax.f32 %v2648_v15, 0.0  ;;  %v494_v25 = vmax.f32 %v2652_v17, 0.0  ;;  %v457_v31 = vadd.f32 %v2637_v2, %v409_v23  ;;  %v404_v32 = vmul.f32 %v2632_v0, %v356_v26  ;;  %v342_v43 = vld [vmem:[%s2619_s11] sm:$0xff]  ;;  %v343_v44 = vld [vmem:[%s2619_s11 + $0x8] sm:$0xff]  ;;  %v344_v45 = vld [vmem:[%s2619_s11 + $0x10] sm:$0xff]  ;;  %p2409_p1 = scmp.ne.s32.totalorder %s2407_s1, %s2408_s8  ;;  %p2414_p12 = scmp.lt.s32.totalorder %s2412_s29, %s2408_s8 }
  0x33   : > { %v497_v30 = vmax.f32 %v2655_v18, 0.0  ;;  %v407_v33 = vmul.f32 %v2632_v0, %v359_v28  ;;  %v498_v34 = vmax.f32 %v2658_v19, 0.0  ;;  %v2676_v36 = vadd.f32 %v2637_v2, %v403_v27  ;;  %v2160_v48 = vld [vmem:[#allocation6 + $0xd8] sm:$0xff]  ;;  %v364_v50 = vld [vmem:[%s2619_s11 + $0xb0] sm:$0xff]  ;;  %v2142_v6 = vld [vmem:[#allocation6 + $0x48] sm:$0xff] }
  0x34   : > { %682 = vmatpush.bf16.msra.mxu0 %v2146_v11  ;;  %2232 = vmatpush.bf16.msra.mxu1 %v2146_v11  ;;  %538 = vst [vmem:[#allocation2 + $0x60] sm:$0xff] %v494_v25  ;;  %v2680_v38 = vmax.f32 %v457_v31, 0.0  ;;  %v2683_v39 = vadd.f32 %v2637_v2, %v404_v32  ;;  %v408_v40 = vmul.f32 %v2632_v0, %v360_v29  ;;  %v365_v51 = vld [vmem:[%s2619_s11 + $0xb8] sm:$0xff]  ;;  %v2143_v58 = vld [vmem:[#allocation6 + $0x50] sm:$0xff]  ;;  %v2158_v9 = vld [vmem:[#allocation6 + $0xc8] sm:$0xff]  ;;  %p2410_p2 = pnand %p2409_p1, %p2597_p5  ;;  %p2415_p13 = por %p2414_p12, %p2413_p8 }
  0x35   : > { %2233 = vmatpush.bf16.msra.mxu2 %v2146_v11  ;;  %997 = vmatpush.bf16.msra.mxu3 %v2162_v20  ;;  %541 = vst [vmem:[#allocation2 + $0x78] sm:$0xff] %v497_v30  ;;  %v2687_v41 = vadd.f32 %v2637_v2, %v407_v33  ;;  %v495_v42 = vmax.f32 %v2676_v36, 0.0  ;;  %v390_v52 = vmul.f32 %v2632_v0, %v342_v43  ;;  %v2159_v1 = vld [vmem:[#allocation6 + $0xd0] sm:$0xff]  ;;  %v375_v10 = vld [vmem:[%s2619_s11 + $0x108] sm:$0xff]  ;;  %v2141_v12 = vld [vmem:[#allocation6 + $0x40] sm:$0xff] }
  0x36   : > { %542 = vst [vmem:[#allocation2 + $0x80] sm:$0xff] %v498_v34  ;;  %v496_v46 = vmax.f32 %v2683_v39, 0.0  ;;  %v2698_v47 = vadd.f32 %v2637_v2, %v408_v40  ;;  %v391_v53 = vmul.f32 %v2632_v0, %v343_v44  ;;  %v392_v54 = vmul.f32 %v2632_v0, %v344_v45  ;;  %v376_v11 = vld [vmem:[%s2619_s11 + $0x110] sm:$0xff]  ;;  %v2140_v16 = vld [vmem:[#allocation6 + $0x38] sm:$0xff]  ;;  %v2157_v29 = vld [vmem:[#allocation6 + $0xc0] sm:$0xff]  ;;  %p2411_p4 = pneg %p2410_p2 }
  0x37   : > { %545 = vst [vmem:[#allocation2 + $0x98] sm:$0xff] %v2680_v38  ;;  %v499_v49 = vmax.f32 %v2687_v41, 0.0  ;;  %v412_v56 = vmul.f32 %v2632_v0, %v364_v50  ;;  %v413_v57 = vmul.f32 %v2632_v0, %v365_v51  ;;  %v2716_v59 = vadd.f32 %v2637_v2, %v390_v52  ;;  %v2156_v20 = vld [vmem:[#allocation6 + $0xb8] sm:$0xff]  ;;  %v346_v15 = vld [vmem:[%s2619_s11 + $0x20] sm:$0xff]  ;;  %v2155_v17 = vld [vmem:[#allocation6 + $0xb0] sm:$0xff] }
  0x38   : > { %683 = vmatpush.bf16.msra.mxu0 %v2145_v21  ;;  %2234 = vmatpush.bf16.msra.mxu1 %v2145_v21  ;;  %539 = vst [vmem:[#allocation2 + $0x68] sm:$0xff] %v495_v42  ;;  %v500_v55 = vmax.f32 %v2698_v47, 0.0  ;;  %v2719_v60 = vadd.f32 %v2637_v2, %v391_v53  ;;  %v2722_v61 = vadd.f32 %v2637_v2, %v392_v54  ;;  %v345_v32 = vld [vmem:[%s2619_s11 + $0x18] sm:$0xff]  ;;  %v2171_v33 = vld [vmem:[#allocation6 + $0x130] sm:$0xff]  ;;  %v2138_v45 = vld [vmem:[#allocation6 + $0x28] sm:$0xff]  ;;  %p2416_p0 = pnand %p2415_p13, %p2411_p4 }
  0x39   : > { %2235 = vmatpush.bf16.msra.mxu2 %v2145_v21  ;;  %998 = vmatpush.bf16.msra.mxu3 %v2161_v35  ;;  %540 = vst [vmem:[#allocation2 + $0x70] sm:$0xff] %v496_v46  ;;  %v460_v62 = vadd.f32 %v2637_v2, %v412_v56  ;;  %v461_v63 = vadd.f32 %v2637_v2, %v413_v57  ;;  %v482_v3 = vmax.f32 %v2716_v59, 0.0  ;;  %v2172_v21 = vld [vmem:[#allocation6 + $0x138] sm:$0xff]  ;;  %v366_v35 = vld [vmem:[%s2619_s11 + $0xc0] sm:$0xff]  ;;  %v2195_v51 = vld [vmem:[#allocation6 + $0x1f0] sm:$0xff] }
  0x3a   : > { %543 = vst [vmem:[#allocation2 + $0x88] sm:$0xff] %v499_v49  ;;  %v483_v5 = vmax.f32 %v2719_v60, 0.0  ;;  %v484_v8 = vmax.f32 %v2722_v61, 0.0  ;;  %v423_v13 = vmul.f32 %v2632_v0, %v375_v10  ;;  %v424_v14 = vmul.f32 %v2632_v0, %v376_v11  ;;  %v2196_v18 = vld [vmem:[#allocation6 + $0x1f8] sm:$0xff]  ;;  %v2154_v53 = vld [vmem:[#allocation6 + $0xa8] sm:$0xff]  ;;  %v2167_v41 = vld [vmem:[#allocation6 + $0x110] sm:$0xff] }
  0x3b   : > { %544 = vst [vmem:[#allocation2 + $0x90] sm:$0xff] %v500_v55  ;;  %v504_v4 = vmax.f32 %v460_v62, 0.0  ;;  %v505_v7 = vmax.f32 %v461_v63, 0.0  ;;  %v610_v26 = vpack.c.bf16 %v494_v25, %v493_v22  ;;  %v612_v27 = vpack.c.bf16 %v498_v34, %v497_v30  ;;  %v2139_v22 = vld [vmem:[#allocation6 + $0x30] sm:$0xff]  ;;  %v2170_v54 = vld [vmem:[#allocation6 + $0x128] sm:$0xff]  ;;  %v2137_v62 = vld [vmem:[#allocation6 + $0x20] sm:$0xff] }
  0x3c   : > { %684 = vmatpush.bf16.msra.mxu0 %v2144_v37  ;;  %2236 = vmatpush.bf16.msra.mxu1 %v2144_v37  ;;  %526 = vst [vmem:[#allocation2] sm:$0xff] %v482_v3  ;;  %v2742_v23 = vadd.f32 %v2637_v2, %v423_v13  ;;  %v2745_v24 = vadd.f32 %v2637_v2, %v424_v14  ;;  %v2153_v63 = vld [vmem:[#allocation6 + $0xa0] sm:$0xff]  ;;  %v2136_v10 = vld [vmem:[#allocation6 + $0x18] sm:$0xff]  ;;  %v2203_v59 = vld [vmem:[#allocation6 + $0x230] sm:$0xff] }
  0x3d   : > { %2237 = vmatpush.bf16.msra.mxu2 %v2144_v37  ;;  %999 = vmatpush.bf16.msra.mxu3 %v2160_v48  ;;  %548 = vst [vmem:[#allocation2 + $0xb0] sm:$0xff] %v504_v4  ;;  %v614_v28 = vpack.c.bf16 %v2680_v38, %v2680_v38  ;;  %v393_v25 = vmul.f32 %v2632_v0, %v345_v32  ;;  %v367_v37 = vld [vmem:[%s2619_s11 + $0xc8] sm:$0xff]  ;;  %v2152_v11 = vld [vmem:[#allocation6 + $0x98] sm:$0xff] }
  0x3e   : > { %549 = vst [vmem:[#allocation2 + $0xb8] sm:$0xff] %v505_v7  ;;  %v515_v31 = vmax.f32 %v2742_v23, 0.0  ;;  %v516_v19 = vmax.f32 %v2745_v24, 0.0  ;;  %v394_v30 = vmul.f32 %v2632_v0, %v346_v15  ;;  %v925_v34 = vpack.c.bf16 %v505_v7, %v504_v4  ;;  %v377_v4 = vld [vmem:[%s2619_s11 + $0x118] sm:$0xff]  ;;  %v370_v24 = vld [vmem:[%s2619_s11 + $0xe0] sm:$0xff] }
  0x3f   : > { %527 = vst [vmem:[#allocation2 + $0x8] sm:$0xff] %v483_v5  ;;  %v414_v38 = vmul.f32 %v2632_v0, %v366_v35  ;;  %v415_v40 = vmul.f32 %v2632_v0, %v367_v37  ;;  %v2768_v43 = vadd.f32 %v2637_v2, %v393_v25  ;;  %v425_v7 = vmul.f32 %v2632_v0, %v377_v4  ;;  %v369_v47 = vld [vmem:[%s2619_s11 + $0xd8] sm:$0xff]  ;;  %v2166_v35 = vld [vmem:[#allocation6 + $0x108] sm:$0xff] }
  0x40   : > { %685 = vmatpush.bf16.msra.mxu0 %v2143_v58  ;;  %2238 = vmatpush.bf16.msra.mxu1 %v2143_v58  ;;  %528 = vst [vmem:[#allocation2 + $0x10] sm:$0xff] %v484_v8  ;;  %v2771_v44 = vadd.f32 %v2637_v2, %v394_v30  ;;  %v417_v15 = vmul.f32 %v2632_v0, %v369_v47 }
  0x41   : > { %2239 = vmatpush.bf16.msra.mxu2 %v2143_v58  ;;  %1000 = vmatpush.bf16.msra.mxu3 %v2159_v1  ;;  %v462_v48 = vadd.f32 %v2637_v2, %v414_v38  ;;  %v463_v50 = vadd.f32 %v2637_v2, %v415_v40  ;;  %v485_v52 = vmax.f32 %v2768_v43, 0.0  ;;  %v2169_v1 = vld [vmem:[#allocation6 + $0x120] sm:$0xff]  ;;  %v2786_v13 = vadd.f32 %v2637_v2, %v425_v7  ;;  %v2191_v43 = vld [vmem:[#allocation6 + $0x1d0] sm:$0xff] }
  0x42   : > { %v486_v56 = vmax.f32 %v2771_v44, 0.0  ;;  %v465_v30 = vadd.f32 %v2637_v2, %v417_v15 }
  0x43   : > { %v506_v57 = vmax.f32 %v462_v48, 0.0  ;;  %529 = vst [vmem:[#allocation2 + $0x18] sm:$0xff] %v485_v52  ;;  %v507_v58 = vmax.f32 %v463_v50, 0.0  ;;  %v2133_v48 = vld [vmem:[#allocation6] sm:$0xff] }
  0x44   : > { %686 = vmatpush.bf16.msra.mxu0 %v2142_v6  ;;  %2240 = vmatpush.bf16.msra.mxu1 %v2142_v6  ;;  %530 = vst [vmem:[#allocation2 + $0x20] sm:$0xff] %v486_v56  ;;  %v509_v40 = vmax.f32 %v465_v30, 0.0  ;;  %v2165_v50 = vld [vmem:[#allocation6 + $0x100] sm:$0xff] }
  0x45   : > { %2241 = vmatpush.bf16.msra.mxu2 %v2142_v6  ;;  %1001 = vmatpush.bf16.msra.mxu3 %v2158_v9  ;;  %550 = vst [vmem:[#allocation2 + $0xc0] sm:$0xff] %v506_v57  ;;  %v378_v6 = vld [vmem:[%s2619_s11 + $0x120] sm:$0xff] }
  0x46   : > { %551 = vst [vmem:[#allocation2 + $0xc8] sm:$0xff] %v507_v58  ;;  %v426_v9 = vmul.f32 %v2632_v0, %v378_v6  ;;  %v2185_v30 = vld [vmem:[#allocation6 + $0x1a0] sm:$0xff] }
  0x47   : > { %553 = vst [vmem:[#allocation2 + $0xd8] sm:$0xff] %v509_v40 }
  0x48   : > { %687 = vmatpush.bf16.msra.mxu0 %v2141_v12  ;;  %2242 = vmatpush.bf16.msra.mxu1 %v2141_v12  ;;  %v2789_v14 = vadd.f32 %v2637_v2, %v426_v9 }
  0x49   : > { %2243 = vmatpush.bf16.msra.mxu2 %v2141_v12  ;;  %1002 = vmatpush.bf16.msra.mxu3 %v2157_v29  ;;  %v2168_v12 = vld [vmem:[#allocation6 + $0x118] sm:$0xff]  ;;  %v2135_v29 = vld [vmem:[#allocation6 + $0x10] sm:$0xff] }
  0x4a   : > { %v518_v32 = vmax.f32 %v2789_v14, 0.0 }
  0x4b   : > { %688 = vmatmul.bf16.vlgmr.msra.gmra.mxu0 %v610_v26  ;;  %698 = vmatmul.bf16.vlgmr.msra.gmra.mxu1 %v612_v27  ;;  %v347_v26 = vld [vmem:[%s2619_s11 + $0x28] sm:$0xff]  ;;  %v348_v27 = vld [vmem:[%s2619_s11 + $0x30] sm:$0xff] }
  0x4c   : > { %761 = vmatpush.bf16.msrb.mxu1 %v2140_v16  ;;  %1117 = vmatpush.bf16.msrb.mxu0 %v2172_v21  ;;  %v611_v16 = vpack.c.bf16 %v496_v46, %v495_v42  ;;  %v517_v21 = vmax.f32 %v2786_v13, 0.0  ;;  %v395_v36 = vmul.f32 %v2632_v0, %v347_v26  ;;  %v396_v39 = vmul.f32 %v2632_v0, %v348_v27  ;;  %v368_v46 = vld [vmem:[%s2619_s11 + $0xd0] sm:$0xff]  ;;  %v349_v26 = vld [vmem:[%s2619_s11 + $0x38] sm:$0xff]  ;;  %v350_v27 = vld [vmem:[%s2619_s11 + $0x40] sm:$0xff] }
  0x4d   : > { %873 = vmatpush.bf16.msrb.mxu2 %v2156_v20  ;;  %1480 = vmatpush.bf16.msrb.mxu3 %v2196_v18  ;;  %v613_v20 = vpack.c.bf16 %v500_v55, %v499_v49  ;;  %v926_v42 = vpack.c.bf16 %v507_v58, %v506_v57  ;;  %v2194_v49 = vld [vmem:[#allocation6 + $0x1e8] sm:$0xff]  ;;  %v416_v55 = vmul.f32 %v2632_v0, %v368_v46  ;;  %v2180_v57 = vld [vmem:[#allocation6 + $0x178] sm:$0xff] }
  0x4e   : > { %708 = vmatmul.bf16.vlgmr.msra.gmra.mxu2 %v614_v28  ;;  %1003 = vmatmul.bf16.vlgmr.msra.gmra.mxu3 %v925_v34  ;;  %v2151_v28 = vld [vmem:[#allocation6 + $0x90] sm:$0xff]  ;;  %v2134_v18 = vld [vmem:[#allocation6 + $0x8] sm:$0xff] }
  0x4f   : > { %v464_v25 = vadd.f32 %v2637_v2, %v416_v55  ;;  %v2150_v34 = vld [vmem:[#allocation6 + $0x88] sm:$0xff]  ;;  %v2192_v55 = vld [vmem:[#allocation6 + $0x1d8] sm:$0xff] }
  0x50   : > { %762 = vmatpush.bf16.msrb.mxu1 %v2139_v22  ;;  %1118 = vmatpush.bf16.msrb.mxu0 %v2171_v33  ;;  %v2813_v22 = vadd.f32 %v2637_v2, %v396_v39  ;;  %v379_v58 = vld [vmem:[%s2619_s11 + $0x128] sm:$0xff] }
  0x51   : > { %874 = vmatpush.bf16.msrb.mxu2 %v2155_v17  ;;  %1481 = vmatpush.bf16.msrb.mxu3 %v2195_v51  ;;  %v2810_v17 = vadd.f32 %v2637_v2, %v395_v36  ;;  %v508_v38 = vmax.f32 %v464_v25, 0.0  ;;  %v794_v51 = vld [vmem:[#allocation2 + $0x1] sm:$0xff] }
  0x52   : > { %v488_v37 = vmax.f32 %v2813_v22, 0.0  ;;  %v2186_v39 = vld [vmem:[#allocation6 + $0x1a8] sm:$0xff] }
  0x53   : > { %v487_v33 = vmax.f32 %v2810_v17, 0.0  ;;  %552 = vst [vmem:[#allocation2 + $0xd0] sm:$0xff] %v508_v38  ;;  %v927_v23 = vpack.c.bf16 %v509_v40, %v508_v38  ;;  %v2202_v46 = vld [vmem:[#allocation6 + $0x228] sm:$0xff]  ;;  %v2201_v38 = vld [vmem:[#allocation6 + $0x220] sm:$0xff]  ;;  %v2866_v40 = vld [vmem:[#allocation2 + $0x11] sm:$0xff] }
  0x54   : > { %763 = vmatpush.bf16.msrb.mxu1 %v2138_v45  ;;  %1119 = vmatpush.bf16.msrb.mxu0 %v2170_v54  ;;  %532 = vst [vmem:[#allocation2 + $0x30] sm:$0xff] %v488_v37  ;;  %v2149_v45 = vld [vmem:[#allocation6 + $0x80] sm:$0xff]  ;;  %v2188_v54 = vld [vmem:[#allocation6 + $0x1b8] sm:$0xff] }
  0x55   : > { %875 = vmatpush.bf16.msrb.mxu2 %v2154_v53  ;;  %1482 = vmatpush.bf16.msrb.mxu3 %v2194_v49  ;;  %531 = vst [vmem:[#allocation2 + $0x28] sm:$0xff] %v487_v33  ;;  %v2823_v53 = vld [vmem:[#allocation2 + $0x9] sm:$0xff]  ;;  %v2173_v17 = vld [vmem:[#allocation6 + $0x140] sm:$0xff] }
  0x56   : > { %v803_v6 = vpack.c.bf16 %v2823_v53, %v794_v51  ;;  %v2184_v51 = vld [vmem:[#allocation6 + $0x198] sm:$0xff]  ;;  %v1289_v44 = vpack.c.bf16 %v2866_v40, %v2823_v53 }
  0x58   : > { %764 = vmatpush.bf16.msrb.mxu1 %v2137_v62  ;;  %1120 = vmatpush.bf16.msrb.mxu0 %v2169_v1  ;;  %v380_v62 = vld [vmem:[%s2619_s11 + $0x130] sm:$0xff]  ;;  %v427_v1 = vmul.f32 %v2632_v0, %v379_v58 }
  0x59   : > { %876 = vmatpush.bf16.msrb.mxu2 %v2153_v63  ;;  %v2204_v63 = vld [vmem:[#allocation6 + $0x238] sm:$0xff]  ;;  %v428_v4 = vmul.f32 %v2632_v0, %v380_v62 }
  0x5a   : > { %v2831_v7 = vadd.f32 %v2637_v2, %v427_v1 }
  0x5b   : > { %693 = vmatmul.bf16.gmra.mxu0 %v611_v16  ;;  %703 = vmatmul.bf16.gmra.mxu1 %v613_v20  ;;  %v2834_v9 = vadd.f32 %v2637_v2, %v428_v4  ;;  %v2179_v16 = vld [vmem:[#allocation6 + $0x170] sm:$0xff]  ;;  %v580_v4 = vpack.c.bf16 %v485_v52, %v484_v8 }
  0x5c   : > { %765 = vmatpush.bf16.msrb.mxu1 %v2136_v10  ;;  %1121 = vmatpush.bf16.msrb.mxu0 %v2168_v12  ;;  %v579_v10 = vpack.c.bf16 %v483_v5, %v482_v3  ;;  %v2187_v12 = vld [vmem:[#allocation6 + $0x1b0] sm:$0xff]  ;;  %v519_v20 = vmax.f32 %v2831_v7, 0.0  ;;  %v397_v3 = vmul.f32 %v2632_v0, %v349_v26  ;;  %v398_v5 = vmul.f32 %v2632_v0, %v350_v27 }
  0x5d   : > { %877 = vmatpush.bf16.msrb.mxu2 %v2152_v11  ;;  %v1047_v11 = vpack.c.bf16 %v516_v19, %v515_v31  ;;  %v520_v60 = vmax.f32 %v2834_v9, 0.0  ;;  %v371_v31 = vld [vmem:[%s2619_s11 + $0xe8] sm:$0xff]  ;;  %v418_v19 = vmul.f32 %v2632_v0, %v370_v24  ;;  %v372_v27 = vld [vmem:[%s2619_s11 + $0xf0] sm:$0xff] }
  0x5e   : > { %1008 = vmatmul.bf16.gmra.mxu3 %v926_v42  ;;  %v2855_v36 = vadd.f32 %v2637_v2, %v397_v3  ;;  %v446_v42 = vadd.f32 %v2637_v2, %v398_v5  ;;  %v2175_v52 = vld [vmem:[#allocation6 + $0x150] sm:$0xff]  ;;  %v420_v13 = vmul.f32 %v2632_v0, %v372_v27  ;;  %v1524_v27 = vld [vmem:[#allocation2 + $0x1a] sm:$0xff] }
  0x5f   : > { %v466_v47 = vadd.f32 %v2637_v2, %v418_v19  ;;  %v2900_v24 = vld [vmem:[#allocation2 + $0x29] sm:$0xff] }
  0x60   : > { %766 = vmatpush.bf16.msrb.mxu1 %v2135_v29  ;;  %1122 = vmatpush.bf16.msrb.mxu0 %v2167_v41  ;;  %v419_v29 = vmul.f32 %v2632_v0, %v371_v31  ;;  %v2178_v41 = vld [vmem:[#allocation6 + $0x168] sm:$0xff]  ;;  %v489_v15 = vmax.f32 %v2855_v36, 0.0  ;;  %v1403_v36 = vld [vmem:[#allocation2 + $0x71] sm:$0xff] }
  0x61   : > { %878 = vmatpush.bf16.msrb.mxu2 %v2151_v28  ;;  %v2193_v28 = vld [vmem:[#allocation6 + $0x1e0] sm:$0xff]  ;;  %v510_v25 = vmax.f32 %v466_v47, 0.0  ;;  %v383_v31 = vld [vmem:[%s2619_s11 + $0x148] sm:$0xff] }
  0x62   : > { %1483 = vmatpush.bf16.msrb.mxu3 %v2193_v28  ;;  %v467_v49 = vadd.f32 %v2637_v2, %v419_v29  ;;  %533 = vst [vmem:[#allocation2 + $0x38] sm:$0xff] %v489_v15  ;;  %v2190_v28 = vld [vmem:[#allocation6 + $0x1c8] sm:$0xff]  ;;  %v431_v19 = vmul.f32 %v2632_v0, %v383_v31  ;;  %v582_v9 = vpack.c.bf16 %v489_v15, %v488_v37  ;;  %v1404_v15 = vld [vmem:[#allocation2 + $0x79] sm:$0xff] }
  0x63   : > { %554 = vst [vmem:[#allocation2 + $0xe0] sm:$0xff] %v510_v25  ;;  %v2174_v47 = vld [vmem:[#allocation6 + $0x148] sm:$0xff] }
  0x64   : > { %767 = vmatpush.bf16.msrb.mxu1 %v2134_v18  ;;  %1123 = vmatpush.bf16.msrb.mxu0 %v2166_v35  ;;  %v2861_v18 = vmax.f32 %v446_v42, 0.0  ;;  %v511_v35 = vmax.f32 %v467_v49, 0.0  ;;  %v1049_v42 = vpack.c.bf16 %v520_v60, %v519_v20  ;;  %v2197_v20 = vld [vmem:[#allocation6 + $0x200] sm:$0xff] }
  0x65   : > { %879 = vmatpush.bf16.msrb.mxu2 %v2150_v34  ;;  %v2177_v34 = vld [vmem:[#allocation6 + $0x160] sm:$0xff] }
  0x66   : > { %534 = vst [vmem:[#allocation2 + $0x40] sm:$0xff] %v2861_v18  ;;  %1484 = vmatpush.bf16.msrb.mxu3 %v2192_v55  ;;  %v928_v8 = vpack.c.bf16 %v511_v35, %v510_v25  ;;  %v2181_v55 = vld [vmem:[#allocation6 + $0x180] sm:$0xff]  ;;  %v2198_v25 = vld [vmem:[#allocation6 + $0x208] sm:$0xff]  ;;  %v583_v22 = vpack.c.bf16 %v2861_v18, %v2861_v18 }
  0x67   : > { %555 = vst [vmem:[#allocation2 + $0xe8] sm:$0xff] %v511_v35  ;;  %v1401_v60 = vld [vmem:[#allocation2 + $0x61] sm:$0xff] }
  0x68   : > { %768 = vmatpush.bf16.msrb.mxu1 %v2133_v48  ;;  %1124 = vmatpush.bf16.msrb.mxu0 %v2165_v50  ;;  %v381_v48 = vld [vmem:[%s2619_s11 + $0x138] sm:$0xff]  ;;  %v382_v50 = vld [vmem:[%s2619_s11 + $0x140] sm:$0xff] }
  0x69   : > { %880 = vmatpush.bf16.msrb.mxu2 %v2149_v45  ;;  %v2868_v45 = vld [vmem:[#allocation2 + $0x19] sm:$0xff]  ;;  %v430_v58 = vmul.f32 %v2632_v0, %v382_v50 }
  0x6a   : > { %v804_v62 = vpack.c.bf16 %v2868_v45, %v2866_v40  ;;  %1485 = vmatpush.bf16.msrb.mxu3 %v2191_v43  ;;  %v362_v50 = vld [vmem:[%s2619_s11 + $0xa0] sm:$0xff] }
  0x6b   : > { %769 = vmatmul.bf16.vlgmr.msrb.gmra.mxu1 %v579_v10  ;;  %1125 = vmatmul.bf16.vlgmr.msrb.gmra.mxu0 %v1047_v11  ;;  %v2880_v1 = vadd.f32 %v2637_v2, %v430_v58  ;;  %v351_v11 = vld [vmem:[%s2619_s11 + $0x48] sm:$0xff] }
  0x6c   : > { %1238 = vmatpush.bf16.msra.mxu1 %v2180_v57  ;;  %1601 = vmatpush.bf16.msra.mxu0 %v2204_v63  ;;  %v429_v57 = vmul.f32 %v2632_v0, %v381_v48  ;;  %v399_v61 = vmul.f32 %v2632_v0, %v351_v11  ;;  %v1411_v48 = vpack.c.bf16 %v1404_v15, %v1403_v36  ;;  %v1522_v58 = vld [vmem:[#allocation2 + $0xa] sm:$0xff] }
  0x6d   : > { %1359 = vmatpush.bf16.msra.mxu2 %v2188_v54  ;;  %v2176_v54 = vld [vmem:[#allocation6 + $0x158] sm:$0xff]  ;;  %v522_v26 = vmax.f32 %v2880_v1, 0.0 }
  0x6e   : > { %881 = vmatmul.bf16.vlgmr.msrb.gmra.mxu2 %v803_v6  ;;  %1013 = vmatmul.bf16.gmra.mxu3 %v927_v23  ;;  %v2877_v63 = vadd.f32 %v2637_v2, %v429_v57  ;;  %v1048_v6 = vpack.c.bf16 %v518_v32, %v517_v21  ;;  %v447_v14 = vadd.f32 %v2637_v2, %v399_v61  ;;  %v2182_v21 = vld [vmem:[#allocation6 + $0x188] sm:$0xff]  ;;  %v2199_v32 = vld [vmem:[#allocation6 + $0x210] sm:$0xff]  ;;  %v1160_v57 = vld [vmem:[#allocation2 + $0xb9] sm:$0xff] }
  0x6f   : > { %1486 = vmatpush.bf16.msrb.mxu3 %v2190_v28  ;;  %v2898_v23 = vld [vmem:[#allocation2 + $0x21] sm:$0xff]  ;;  %v1162_v61 = vld [vmem:[#allocation2 + $0xc9] sm:$0xff]  ;;  %v1407_v28 = vld [vmem:[#allocation2 + $0x91] sm:$0xff] }
  0x70   : > { %1239 = vmatpush.bf16.msra.mxu1 %v2179_v16  ;;  %1602 = vmatpush.bf16.msra.mxu0 %v2203_v59  ;;  %v521_v10 = vmax.f32 %v2877_v63, 0.0  ;;  %v2200_v16 = vld [vmem:[#allocation6 + $0x218] sm:$0xff]  ;;  %v468_v59 = vadd.f32 %v2637_v2, %v420_v13  ;;  %v491_v3 = vmax.f32 %v447_v14, 0.0  ;;  %v805_v29 = vpack.c.bf16 %v2900_v24, %v2898_v23  ;;  %v1165_v36 = vld [vmem:[#allocation2 + $0xe1] sm:$0xff] }
  0x71   : > { %1360 = vmatpush.bf16.msra.mxu2 %v2187_v12  ;;  %v2183_v12 = vld [vmem:[#allocation6 + $0x190] sm:$0xff]  ;;  %v1290_v43 = vpack.c.bf16 %v2898_v23, %v2868_v45  ;;  %v373_v23 = vld [vmem:[%s2619_s11 + $0xf8] sm:$0xff] }
  0x72   : > { %v512_v5 = vmax.f32 %v468_v59, 0.0  ;;  %535 = vst [vmem:[#allocation2 + $0x48] sm:$0xff] %v491_v3  ;;  %v1050_v53 = vpack.c.bf16 %v522_v26, %v521_v10  ;;  %v1406_v10 = vld [vmem:[#allocation2 + $0x89] sm:$0xff] }
  0x74   : > { %1240 = vmatpush.bf16.msra.mxu1 %v2178_v41  ;;  %1603 = vmatpush.bf16.msra.mxu0 %v2202_v46  ;;  %556 = vst [vmem:[#allocation2 + $0xf0] sm:$0xff] %v512_v5  ;;  %v581_v41 = vpack.c.bf16 %v487_v33, %v486_v56  ;;  %v929_v49 = vpack.c.bf16 %v512_v5, %v512_v5  ;;  %v2917_v56 = vld [vmem:[#allocation2 + $0x31] sm:$0xff]  ;;  %v2919_v33 = vld [vmem:[#allocation2 + $0x39] sm:$0xff] }
  0x75   : > { %1361 = vmatpush.bf16.msra.mxu2 %v2186_v39  ;;  %v479_v39 = vadd.f32 %v2637_v2, %v431_v19  ;;  %v806_v7 = vpack.c.bf16 %v2919_v33, %v2917_v56  ;;  %v352_v5 = vld [vmem:[%s2619_s11 + $0x50] sm:$0xff] }
  0x76   : > { %v400_v31 = vmul.f32 %v2632_v0, %v352_v5 }
  0x77   : > { %v523_v46 = vmax.f32 %v479_v39, 0.0 }
  0x78   : > { %1241 = vmatpush.bf16.msra.mxu1 %v2177_v34  ;;  %1604 = vmatpush.bf16.msra.mxu0 %v2201_v38  ;;  %v1402_v34 = vld [vmem:[#allocation2 + $0x69] sm:$0xff]  ;;  %v448_v45 = vadd.f32 %v2637_v2, %v400_v31 }
  0x79   : > { %1362 = vmatpush.bf16.msra.mxu2 %v2185_v30  ;;  %v2189_v30 = vld [vmem:[#allocation6 + $0x1c0] sm:$0xff]  ;;  %v1410_v35 = vpack.c.bf16 %v1402_v34, %v1401_v60  ;;  %v1051_v37 = vpack.c.bf16 %v523_v46, %v523_v46 }
  0x7a   : > { %1487 = vmatpush.bf16.msrb.mxu3 %v2189_v30  ;;  %v2927_v38 = vld [vmem:[#allocation2 + $0x41] sm:$0xff]  ;;  %v492_v39 = vmax.f32 %v448_v45, 0.0  ;;  %v1164_v30 = vld [vmem:[#allocation2 + $0xd9] sm:$0xff] }
  0x7b   : > { %774 = vmatmul.bf16.gmra.mxu1 %v580_v4  ;;  %1130 = vmatmul.bf16.gmra.mxu0 %v1048_v6  ;;  %v807_v40 = vpack.c.bf16 %v2927_v38, %v2927_v38  ;;  %v1405_v6 = vld [vmem:[#allocation2 + $0x81] sm:$0xff]  ;;  %v1166_v15 = vld [vmem:[#allocation2 + $0xe9] sm:$0xff] }
  0x7c   : > { %1242 = vmatpush.bf16.msra.mxu1 %v2176_v54  ;;  %1605 = vmatpush.bf16.msra.mxu0 %v2200_v16  ;;  %v410_v54 = vmul.f32 %v2632_v0, %v362_v50  ;;  %v1412_v11 = vpack.c.bf16 %v1406_v10, %v1405_v6  ;;  %v1161_v16 = vld [vmem:[#allocation2 + $0xc1] sm:$0xff]  ;;  %536 = vst [vmem:[#allocation2 + $0x50] sm:$0xff] %v492_v39 }
  0x7d   : > { %1363 = vmatpush.bf16.msra.mxu2 %v2184_v51  ;;  %v1159_v51 = vld [vmem:[#allocation2 + $0xb1] sm:$0xff]  ;;  %v1169_v13 = vpack.c.bf16 %v1162_v61, %v1161_v16  ;;  %v1171_v50 = vpack.c.bf16 %v1166_v15, %v1165_v36 }
  0x7e   : > { %886 = vmatmul.bf16.gmra.mxu2 %v804_v62  ;;  %1018 = vmatmul.bf16.gmra.mxu3 %v928_v8  ;;  %v1523_v62 = vld [vmem:[#allocation2 + $0x12] sm:$0xff]  ;;  %v458_v63 = vadd.f32 %v2637_v2, %v410_v54  ;;  %v1168_v1 = vpack.c.bf16 %v1160_v57, %v1159_v51  ;;  %v1525_v8 = vld [vmem:[#allocation2 + $0x22] sm:$0xff] }
  0x7f   : > { %v1531_v18 = vpack.c.bf16 %v1523_v62, %v1522_v58  ;;  %v1532_v14 = vpack.c.bf16 %v1525_v8, %v1524_v27 }
  0x80   : > { %1243 = vmatpush.bf16.msra.mxu1 %v2175_v52  ;;  %1606 = vmatpush.bf16.msra.mxu0 %v2199_v32  ;;  %v502_v4 = vmax.f32 %v458_v63, 0.0 }
  0x81   : > { %1364 = vmatpush.bf16.msra.mxu2 %v2183_v12  ;;  %v363_v12 = vld [vmem:[%s2619_s11 + $0xa8] sm:$0xff]  ;;  %s1697_s11 = scalar_lea.sflag [#allocation5], %s2615_s18 }
  0x82   : > { %546 = vst [vmem:[#allocation2 + $0xa0] sm:$0xff] %v502_v4  ;;  %v411_v26 = vmul.f32 %v2632_v0, %v363_v12 }
  0x83   : > { %v1288_v12 = vld [vmem:[#allocation2 + $0x49] sm:$0xff] }
  0x84   : > { %1244 = vmatpush.bf16.msra.mxu1 %v2174_v47  ;;  %1607 = vmatpush.bf16.msra.mxu0 %v2198_v25  ;;  %v459_v52 = vadd.f32 %v2637_v2, %v411_v26  ;;  %v1163_v25 = vld [vmem:[#allocation2 + $0xd1] sm:$0xff]  ;;  %v1293_v27 = vpack.c.bf16 %v1288_v12, %v1288_v12 }
  0x85   : > { %1365 = vmatpush.bf16.msra.mxu2 %v2182_v21  ;;  %v1530_v26 = vld [vmem:[#allocation2 + $0x4a] sm:$0xff] }
  0x86   : > { %v503_v21 = vmax.f32 %v459_v52, 0.0  ;;  %v1535_v52 = vpack.c.bf16 %v1530_v26, %v1530_v26 }
  0x88   : > { %1245 = vmatpush.bf16.msra.mxu1 %v2173_v17  ;;  %1608 = vmatpush.bf16.msra.mxu0 %v2197_v20  ;;  %547 = vst [vmem:[#allocation2 + $0xa8] sm:$0xff] %v503_v21  ;;  %v1527_v17 = vld [vmem:[#allocation2 + $0x32] sm:$0xff] }
  0x89   : > { %1366 = vmatpush.bf16.msra.mxu2 %v2181_v55  ;;  %v1408_v3 = vld [vmem:[#allocation2 + $0x99] sm:$0xff] }
  0x8a   : > { %v1413_v19 = vpack.c.bf16 %v1408_v3, %v1407_v28 }
  0x8b   : > { %779 = vmatmul.bf16.gmra.mxu1 %v581_v41  ;;  %1135 = vmatmul.bf16.gmra.mxu0 %v1049_v42 }
  0x8e   : > { %891 = vmatmul.bf16.gmra.mxu2 %v805_v29  ;;  %1023 = vmatmul.bf16.gmra.mxu3 %v929_v49  ;;  %v421_v29 = vmul.f32 %v2632_v0, %v373_v23  ;;  %v1291_v0 = vpack.c.bf16 %v2917_v56, %v2900_v24  ;;  %v1528_v24 = vld [vmem:[#allocation2 + $0x3a] sm:$0xff]  ;;  %v1529_v56 = vld [vmem:[#allocation2 + $0x42] sm:$0xff] }
  0x8f   : > { %v1409_v60 = vld [vmem:[#allocation2 + $0xa1] sm:$0xff]  ;;  %v1534_v51 = vpack.c.bf16 %v1529_v56, %v1528_v24 }
  0x90   : > { %v469_v41 = vadd.f32 %v2637_v2, %v421_v29 }
  0x92   : > { %v513_v49 = vmax.f32 %v469_v41, 0.0 }
  0x94   : > { %557 = vst [vmem:[#allocation2 + $0xf8] sm:$0xff] %v513_v49 }
  0x9b   : > { %784 = vmatmul.bf16.gmra.mxu1 %v582_v9  ;;  %1140 = vmatmul.bf16.gmra.mxu0 %v1050_v53  ;;  %v1170_v9 = vpack.c.bf16 %v1164_v30, %v1163_v25 }
  0x9e   : > { %896 = vmatmul.bf16.gmra.mxu2 %v806_v7  ;;  %1488 = vmatmul.bf16.vlgmr.msrb.gmra.mxu3 %v1410_v35  ;;  %v1414_v35 = vpack.c.bf16 %v1409_v60, %v1409_v60 }
  0xab   : > { %789 = vmatmul.bf16.gmra.mxu1 %v583_v22  ;;  %1145 = vmatmul.bf16.gmra.mxu0 %v1051_v37 }
  0xae   : > { %901 = vmatmul.bf16.gmra.mxu2 %v807_v40  ;;  %1493 = vmatmul.bf16.gmra.mxu3 %v1411_v48  ;;  %v1292_v48 = vpack.c.bf16 %v2927_v38, %v2919_v33  ;;  %v1167_v38 = vld [vmem:[#allocation2 + $0xf1] sm:$0xff] }
  0xbb   : > { %1246 = vmatmul.bf16.vlgmr.msra.gmra.mxu1 %v1168_v1  ;;  %1609 = vmatmul.bf16.vlgmr.msra.gmra.mxu0 %v1531_v18 }
  0xbe   : > { %1367 = vmatmul.bf16.vlgmr.msra.gmra.mxu2 %v1289_v44  ;;  %1498 = vmatmul.bf16.gmra.mxu3 %v1412_v11  ;;  %v1526_v44 = vld [vmem:[#allocation2 + $0x2a] sm:$0xff] }
  0xbf   : > { %v1533_v2 = vpack.c.bf16 %v1527_v17, %v1526_v44 }
  0xc8   : > { %v689_v32 = vpop.f32.mrf.mxu0  ;;  %v2941_v59 = vpop.f32.mrf.mxu1 }
  0xcb   : > { %1251 = vmatmul.bf16.gmra.mxu1 %v1169_v13  ;;  %1614 = vmatmul.bf16.gmra.mxu0 %v1532_v14 }
  0xce   : > { %1372 = vmatmul.bf16.gmra.mxu2 %v1290_v43  ;;  %1503 = vmatmul.bf16.gmra.mxu3 %v1413_v19  ;;  %v1172_v43 = vpack.c.bf16 %v1167_v38, %v1167_v38 }
  0xd0   : > { %v691_v46 = vpop.f32.mrf.mxu0  ;;  %v2951_v47 = vpop.f32.mrf.mxu1 }
  0xd1   : > { %v2949_v42 = vpop.f32.mrf.mxu2  ;;  %v1004_v55 = vpop.f32.mrf.mxu3 }
  0xd8   : > { %v694_v53 = vpop.f32.mrf.mxu0  ;;  %v2955_v20 = vpop.f32.mrf.mxu1 }
  0xd9   : > { %v711_v7 = vpop.f32.mrf.mxu2  ;;  %v1006_v34 = vpop.f32.mrf.mxu3 }
  0xdb   : > { %1256 = vmatmul.bf16.gmra.mxu1 %v1170_v9  ;;  %1619 = vmatmul.bf16.gmra.mxu0 %v1533_v2 }
  0xde   : > { %1377 = vmatmul.bf16.gmra.mxu2 %v1291_v0  ;;  %1508 = vmatmul.bf16.gmra.mxu3 %v1414_v35 }
  0xe0   : > { %v696_v40 = vpop.f32.mrf.mxu0  ;;  %v2957_v22 = vpop.f32.mrf.mxu1 }
  0xe1   : > { %v1009_v37 = vpop.f32.mrf.mxu3 }
  0xe8   : > { %v770_v54 = vpop.f32.mrf.mxu1  ;;  %v1126_v57 = vpop.f32.mrf.mxu0 }
  0xe9   : > { %v771_v58 = vadd.f32 %v770_v54, %v689_v32  ;;  %v1011_v62 = vpop.f32.mrf.mxu3 }
  0xeb   : > { %1261 = vmatmul.bf16.gmra.mxu1 %v1171_v50  ;;  %1624 = vmatmul.bf16.gmra.mxu0 %v1534_v51 }
  0xee   : > { %1382 = vmatmul.bf16.gmra.mxu2 %v1292_v48 }
  0xf0   : > { %v772_v4 = vpop.f32.mrf.mxu1  ;;  %v1128_v6 = vpop.f32.mrf.mxu0 }
  0xf1   : > { %v882_v63 = vpop.f32.mrf.mxu2  ;;  %v773_v10 = vadd.f32 %v772_v4, %v691_v46  ;;  %v1014_v16 = vpop.f32.mrf.mxu3 }
  0xf2   : > { %v906_v1 = vadd.f32 %v882_v63, %v771_v58 }
  0xf4   : > { %v1028_v18 = vadd.f32 %v1004_v55, %v906_v1 }
  0xf6   : > { %v2961_v11 = vadd.f32 %v1126_v57, %v1028_v18 }
  0xf8   : > { %v775_v13 = vpop.f32.mrf.mxu1  ;;  %v1131_v14 = vpop.f32.mrf.mxu0 }
  0xf9   : > { %v884_v33 = vpop.f32.mrf.mxu2  ;;  %v776_v21 = vadd.f32 %v775_v13, %v694_v53  ;;  %v1016_v28 = vpop.f32.mrf.mxu3 }
  0xfa   : > { %v907_v61 = vadd.f32 %v884_v33, %v773_v10 }
  0xfb   : > { %1266 = vmatmul.bf16.gmra.mxu1 %v1172_v43  ;;  %1629 = vmatmul.bf16.gmra.mxu0 %v1535_v52 }
  0xfc   : > { %v1029_v8 = vadd.f32 %v1006_v34, %v907_v61 }
  0xfe   : > { %1387 = vmatmul.bf16.gmra.mxu2 %v1293_v27  ;;  %v2963_v32 = vadd.f32 %v1128_v6, %v1029_v8 }
 0x100   : > { %v777_v19 = vpop.f32.mrf.mxu1  ;;  %v1133_v45 = vpop.f32.mrf.mxu0 }
 0x101   : > { %v887_v3 = vpop.f32.mrf.mxu2  ;;  %v778_v23 = vadd.f32 %v777_v19, %v696_v40  ;;  %v1019_v39 = vpop.f32.mrf.mxu3 }
 0x102   : > { %v908_v5 = vadd.f32 %v887_v3, %v776_v21 }
 0x104   : > { %v1030_v31 = vadd.f32 %v1009_v37, %v908_v5 }
 0x106   : > { %v2965_v29 = vadd.f32 %v1131_v14, %v1030_v31 }
 0x108   : > { %v780_v55 = vpop.f32.mrf.mxu1  ;;  %v1136_v25 = vpop.f32.mrf.mxu0 }
 0x109   : > { %v889_v41 = vpop.f32.mrf.mxu2  ;;  %v781_v30 = vadd.f32 %v780_v55, %v2941_v59  ;;  %v1021_v17 = vpop.f32.mrf.mxu3 }
 0x10a   : > { %v909_v46 = vadd.f32 %v889_v41, %v778_v23 }
 0x10c   : > { %v1031_v49 = vadd.f32 %v1011_v62, %v909_v46 }
 0x10e   : > { %v2968_v44 = vadd.f32 %v1133_v45, %v1031_v49  ;;  %v2995_v49 = vld [vmem:[%s3073_s5] ss:$0 sm:$0xff] }
 0x110   : > { %v782_v2 = vpop.f32.mrf.mxu1  ;;  %v1138_v53 = vpop.f32.mrf.mxu0 }
 0x111   : > { %v892_v0 = vpop.f32.mrf.mxu2  ;;  %v783_v60 = vadd.f32 %v782_v2, %v2951_v47  ;;  %v1024_v35 = vpop.f32.mrf.mxu3 }
 0x112   : > { %v910_v7 = vadd.f32 %v892_v0, %v781_v30 }
 0x114   : > { %v1032_v9 = vadd.f32 %v1014_v16, %v910_v7 }
 0x116   : > { %v2971_v34 = vadd.f32 %v1136_v25, %v1032_v9 }
 0x118   : > { %v785_v15 = vpop.f32.mrf.mxu1  ;;  %v1141_v24 = vpop.f32.mrf.mxu0 }
 0x119   : > { %v894_v40 = vpop.f32.mrf.mxu2  ;;  %v786_v59 = vadd.f32 %v785_v15, %v2955_v20  ;;  %v1026_v48 = vpop.f32.mrf.mxu3 }
 0x11a   : > { %v911_v37 = vadd.f32 %v894_v40, %v783_v60 }
 0x11c   : > { %v1033_v36 = vadd.f32 %v1016_v28, %v911_v37 }
 0x11e   : > { %v2974_v56 = vadd.f32 %v1138_v53, %v1033_v36 }
 0x120   : > { %v787_v57 = vpop.f32.mrf.mxu1  ;;  %v1143_v58 = vpop.f32.mrf.mxu0 }
 0x121   : > { %v897_v50 = vpop.f32.mrf.mxu2  ;;  %v788_v47 = vadd.f32 %v787_v57, %v2957_v22  ;;  %v1489_v63 = vpop.f32.mrf.mxu3 }
 0x122   : > { %v912_v51 = vadd.f32 %v897_v50, %v786_v59 }
 0x124   : > { %v1034_v54 = vadd.f32 %v1019_v39, %v912_v51  ;;  %v2989_v39 = vld [vmem:[%s3072_s4] ss:$0 sm:$0xff] }
 0x126   : > { %v2977_v62 = vadd.f32 %v1141_v24, %v1034_v54 }
 0x128   : > { %v790_v6 = vpop.f32.mrf.mxu1  ;;  %v1146_v10 = vpop.f32.mrf.mxu0 }
 0x129   : > { %v899_v1 = vpop.f32.mrf.mxu2  ;;  %v791_v20 = vadd.f32 %v790_v6, %v2949_v42  ;;  %v1491_v16 = vpop.f32.mrf.mxu3 }
 0x12a   : > { %v913_v18 = vadd.f32 %v899_v1, %v788_v47 }
 0x12c   : > { %v1035_v4 = vadd.f32 %v1021_v17, %v913_v18 }
 0x12e   : > { %v2980_v12 = vadd.f32 %v1143_v58, %v1035_v4 }
 0x130   : > { %v792_v61 = vpop.f32.mrf.mxu1  ;;  %v1148_v27 = vpop.f32.mrf.mxu0 }
 0x131   : > { %v902_v33 = vpop.f32.mrf.mxu2  ;;  %v1494_v22 = vpop.f32.mrf.mxu3 }
 0x132   : > { %v914_v38 = vadd.f32 %v902_v33, %v791_v20 }
 0x134   : > { %v1036_v26 = vadd.f32 %v1024_v35, %v914_v38 }
 0x136   : > { %v2982_v8 = vadd.f32 %v1146_v10, %v1036_v26 }
 0x138   : > { %v1247_v52 = vpop.f32.mrf.mxu1  ;;  %v1610_v13 = vpop.f32.mrf.mxu0 }
 0x139   : > { %v904_v43 = vpop.f32.mrf.mxu2  ;;  %v1271_v14 = vadd.f32 %v1247_v52, %v2961_v11  ;;  %v1496_v21 = vpop.f32.mrf.mxu3 }
 0x140   : > { %v1249_v5 = vpop.f32.mrf.mxu1  ;;  %v1612_v31 = vpop.f32.mrf.mxu0 }
 0x141   : > { %v1368_v28 = vpop.f32.mrf.mxu2  ;;  %v1272_v19 = vadd.f32 %v1249_v5, %v2963_v32  ;;  %v1499_v45 = vpop.f32.mrf.mxu3 }
 0x142   : > { %v1392_v3 = vadd.f32 %v1368_v28, %v1271_v14 }
 0x144   : > { %v1513_v42 = vadd.f32 %v1489_v63, %v1392_v3 }
 0x146   : > { %v1634_v23 = vadd.f32 %v1610_v13, %v1513_v42 }
 0x148   : > { %v1647_v11 = vmul.f32 %v2989_v39, %v1634_v23  ;;  %v1252_v25 = vpop.f32.mrf.mxu1  ;;  %v1615_v32 = vpop.f32.mrf.mxu0 }
 0x149   : > { %v1370_v41 = vpop.f32.mrf.mxu2  ;;  %v1273_v17 = vadd.f32 %v1252_v25, %v2965_v29  ;;  %v1501_v0 = vpop.f32.mrf.mxu3 }
 0x14a   : > { %v1393_v46 = vadd.f32 %v1370_v41, %v1272_v19  ;;  %v1660_v7 = vadd.f32 %v2995_v49, %v1647_v11 }
 0x14c   : > { %v1514_v55 = vadd.f32 %v1491_v16, %v1393_v46  ;;  %v1669_v35 = vmax.f32 %v1660_v7, 0.0 }
 0x14e   : > { %v1635_v30 = vadd.f32 %v1612_v31, %v1514_v55 }
 0x150   : > { %v1648_v9 = vmul.f32 %v2989_v39, %v1635_v30  ;;  %v1254_v36 = vpop.f32.mrf.mxu1  ;;  %v1617_v15 = vpop.f32.mrf.mxu0 }
 0x151   : > { %v1373_v2 = vpop.f32.mrf.mxu2  ;;  %v1274_v59 = vadd.f32 %v1254_v36, %v2968_v44  ;;  %v1504_v48 = vpop.f32.mrf.mxu3 }
 0x152   : > { %v1661_v53 = vadd.f32 %v2995_v49, %v1648_v9  ;;  %v1394_v60 = vadd.f32 %v1373_v2, %v1273_v17 }
 0x154   : > { %v1670_v40 = vmax.f32 %v1661_v53, 0.0  ;;  %v1515_v37 = vadd.f32 %v1494_v22, %v1394_v60 }
 0x156   : > { %v2208_v24 = vpack.c.bf16 %v1670_v40, %v1669_v35  ;;  %v1636_v29 = vadd.f32 %v1615_v32, %v1515_v37 }
 0x158   : > { %2209 = vst [vmem:[%s3003_s14] sm:$0xff] %v2208_v24   ;;  %v1649_v54 = vmul.f32 %v2989_v39, %v1636_v29  ;;  %v1257_v58 = vpop.f32.mrf.mxu1  ;;  %v1620_v47 = vpop.f32.mrf.mxu0 }
 0x159   : > { %v1375_v50 = vpop.f32.mrf.mxu2  ;;  %v1275_v1 = vadd.f32 %v1257_v58, %v2971_v34  ;;  %v1506_v18 = vpop.f32.mrf.mxu3 }
 0x15a   : > { %v1395_v51 = vadd.f32 %v1375_v50, %v1274_v59  ;;  %v1662_v44 = vadd.f32 %v2995_v49, %v1649_v54 }
 0x15c   : > { %v1516_v57 = vadd.f32 %v1496_v21, %v1395_v51  ;;  %v1671_v16 = vmax.f32 %v1662_v44, 0.0 }
 0x15e   : > { %v1637_v63 = vadd.f32 %v1617_v15, %v1516_v57 }
 0x160   : > { %v1650_v4 = vmul.f32 %v2989_v39, %v1637_v63  ;;  %v1259_v26 = vpop.f32.mrf.mxu1  ;;  %v1622_v61 = vpop.f32.mrf.mxu0 }
 0x161   : > { %v1378_v6 = vpop.f32.mrf.mxu2  ;;  %v1276_v22 = vadd.f32 %v1259_v26, %v2974_v56  ;;  %v1509_v43 = vpop.f32.mrf.mxu3 }
 0x162   : > { %v1663_v10 = vadd.f32 %v2995_v49, %v1650_v4  ;;  %v1396_v20 = vadd.f32 %v1378_v6, %v1275_v1 }
 0x164   : > { %v1672_v33 = vmax.f32 %v1663_v10, 0.0  ;;  %v1517_v38 = vadd.f32 %v1499_v45, %v1396_v20 }
 0x166   : > { %v2213_v27 = vpack.c.bf16 %v1672_v33, %v1671_v16  ;;  %v1638_v34 = vadd.f32 %v1620_v47, %v1517_v38 }
 0x168   : > { %2225 = vst [vmem:[%s3003_s14 + $0x8] sm:$0xff] %v2213_v27   ;;  %v1651_v14 = vmul.f32 %v2989_v39, %v1638_v34  ;;  %v1262_v28 = vpop.f32.mrf.mxu1  ;;  %v1625_v3 = vpop.f32.mrf.mxu0 }
 0x169   : > { %v1380_v52 = vpop.f32.mrf.mxu2  ;;  %v1277_v5 = vadd.f32 %v1262_v28, %v2977_v62  ;;  %v1511_v31 = vpop.f32.mrf.mxu3 }
 0x16a   : > { %v1397_v13 = vadd.f32 %v1380_v52, %v1276_v22  ;;  %v1664_v19 = vadd.f32 %v2995_v49, %v1651_v14 }
 0x16c   : > { %v1518_v21 = vadd.f32 %v1501_v0, %v1397_v13  ;;  %v1673_v46 = vmax.f32 %v1664_v19, 0.0 }
 0x16e   : > { %v1639_v42 = vadd.f32 %v1622_v61, %v1518_v21 }
 0x170   : > { %v1652_v45 = vmul.f32 %v2989_v39, %v1639_v42  ;;  %v1264_v25 = vpop.f32.mrf.mxu1  ;;  %v1627_v32 = vpop.f32.mrf.mxu0 }
 0x171   : > { %v1383_v56 = vpop.f32.mrf.mxu2  ;;  %v1278_v17 = vadd.f32 %v1264_v25, %v2980_v12 }
 0x172   : > { %v1665_v23 = vadd.f32 %v2995_v49, %v1652_v45  ;;  %v1398_v41 = vadd.f32 %v1383_v56, %v1277_v5 }
 0x174   : > { %v1674_v11 = vmax.f32 %v1665_v23, 0.0  ;;  %v1519_v55 = vadd.f32 %v1504_v48, %v1398_v41 }
 0x176   : > { %v2218_v30 = vpack.c.bf16 %v1674_v11, %v1673_v46  ;;  %v1640_v62 = vadd.f32 %v1625_v3, %v1519_v55 }
 0x178   : > { %2226 = vst [vmem:[%s3003_s14 + $0x10] sm:$0xff] %v2218_v30   ;;  %v1653_v9 = vmul.f32 %v2989_v39, %v1640_v62  ;;  %v1267_v53 = vpop.f32.mrf.mxu1  ;;  %v1630_v60 = vpop.f32.mrf.mxu0 }
 0x179   : > { %v1385_v0 = vpop.f32.mrf.mxu2  ;;  %v1279_v40 = vadd.f32 %v1267_v53, %v2982_v8 }
 0x17a   : > { %v1399_v7 = vadd.f32 %v1385_v0, %v1278_v17  ;;  %v1666_v37 = vadd.f32 %v2995_v49, %v1653_v9 }
 0x17c   : > { %v1520_v2 = vadd.f32 %v1506_v18, %v1399_v7  ;;  %v1675_v59 = vmax.f32 %v1666_v37, 0.0 }
 0x17e   : > { %v1641_v35 = vadd.f32 %v1627_v32, %v1520_v2 }
 0x180   : > { %v1654_v36 = vmul.f32 %v2989_v39, %v1641_v35  ;;  %v1269_v50 = vpop.f32.mrf.mxu1  ;;  %v1632_v51 = vpop.f32.mrf.mxu0 }
 0x181   : > { %v1388_v15 = vpop.f32.mrf.mxu2 }
 0x182   : > { %v1667_v12 = vadd.f32 %v2995_v49, %v1654_v36  ;;  %v1400_v24 = vadd.f32 %v1388_v15, %v1279_v40 }
 0x184   : > { %v1676_v48 = vmax.f32 %v1667_v12, 0.0  ;;  %v1521_v29 = vadd.f32 %v1509_v43, %v1400_v24 }
 0x186   : > { %v2223_v54 = vpack.c.bf16 %v1676_v48, %v1675_v59  ;;  %v1642_v57 = vadd.f32 %v1630_v60, %v1521_v29 }
 0x188   : > { %2227 = vst [vmem:[%s3003_s14 + $0x18] sm:$0xff] %v2223_v54   ;;  %v1655_v8 = vmul.f32 %v2989_v39, %v1642_v57 }
 0x189   : > { %v1390_v58 = vpop.f32.mrf.mxu2 }
 0x18a   : > { %v1668_v47 = vadd.f32 %v2995_v49, %v1655_v8 }
 0x18c   : > { %v1677_v63 = vmax.f32 %v1668_v47, 0.0 }
 0x18e   : > { %v1686_v1 = vpack.c.bf16 %v1677_v63, %v1677_v63 }
 0x190   : > { %1695 = vst [vmem:[%s3003_s14 + $0x20] sm:$0xf] %v1686_v1 }
 0x191   : > { %2419 = shalt.err (!%p2416_p0)
}
 0x192   : > { %s2485_s18 = smov 64   ;;  %s2486_s10 = smov 4  }
 0x193   : > { %2255 = dma.vmem_to_hbm [thread:$0]  (%p2597_p5), %s1711_s24, 576, %s1713_s28, %s1697_s11, %s2485_s18, %s2485_s18, %s2486_s10  }
 0x194 PF: > { %s1727_s14 = sand.u32 1, %s2458_s21   ;;  %p2266_p3 = pnand %p1838_p11, %p2571_p6 }
 0x195   : > { %s1728_s15 = scalar_lea.sflag [#allocation5], %s1727_s14 }
 0x196   : > { %p2267_p7 = pneg %p2266_p3 }
 0x198   : > { %2453 = dma.done.wait (%p2267_p7), %s1728_s15, 576  }
 0x199   : > { %2455 = vsyncadd (%p2267_p7), %s1728_s15, 4294966720  ;;  %s23_s26 = sadd.s32 1, %s2478_s26   ;;  %s3088_s19 = sld [smem:[#allocation13_spill]] }
 0x19a   : > { %p20_p9 = scmp.ge.s32.totalorder %s23_s26, 4   ;;  %s3089_s21 = smov %s2462_s22 }
 0x19b   : > { %s3090_s22 = smov %s2466_s23  ;;  %s3091_s23 = smov %s2606_s9 }
 0x19c   : > { %s3092_s24 = smov %s2474_s25  ;;  %22 = sbr.rel (!%p20_p9) target bundleno = 9 (0x9), region = 115 }
 0x19f   : > { %s3093_s25 = smov %s3088_s19 }
 0x1a1   :  { %1734 = vsyncpa [#allocation4], 1 }
 0x1a2   :  { %1736 = vsyncpa [#allocation4 + $0x1], 1 }
 0x1a3   :  { %1737 = vsyncpa [#allocation7], 1 }
 0x1a4   :  { %1738 = vsyncpa [#allocation5], 1 }
 0x1a5   :  { %1740 = vsyncpa [#allocation5 + $0x1], 1 }

// kernel: tpu_custom_call.1
= control target key start
LH: loop header
LB: loop body
LE: loop exit
PB: predicated region body
PF: predicated region fallthrough
CT: control target
= control target key end

     0   :  { %s3068_s0 = inlined_call_operand.hbm [shape: f32[2,4,88,128], index: 0, kind: input, shape index: {}]   ;;  %s3069_s1 = inlined_call_operand.hbm [shape: bf16[9,128,128], index: 1, kind: input, shape index: {}]   ;;  %s3070_s2 = inlined_call_operand.vmem [shape: f32[1,128], index: 2, kind: input, shape index: {}]   ;;  %s3071_s3 = inlined_call_operand.vmem [shape: f32[1,128], index: 3, kind: input, shape index: {}]   ;;  %s3072_s4 = inlined_call_operand.vmem [shape: f32[1,128], index: 4, kind: input, shape index: {}]   ;;  %s3073_s5 = inlined_call_operand.vmem [shape: f32[1,128], index: 5, kind: input, shape index: {}]   ;;  %s3074_s6 = inlined_call_operand.hbm [shape: bf16[2,72,128], index: 6, kind: output, shape index: {}]  }
   0x1   :  { %3077 = sst [smem:[#allocation14_spill]] %s3069_s1 }
   0x2   :  { %11 = vsyncpa [#allocation4], 0 }
   0x3   :  { %13 = vsyncpa [#allocation4 + $0x1], 0 }
   0x4   :  { %14 = vsyncpa [#allocation7], 0 }
   0x5   :  { %15 = vsyncpa [#allocation5], 0 }
   0x6   :  { %17 = vsyncpa [#allocation5 + $0x1], 0  ;;  %s2522_s21 = smov 0   ;;  %s2524_s22 = smov 0  }
   0x7   :  { %s2526_s23 = smov 0   ;;  %s2528_s24 = smov 0  }
   0x8   :  { %s2530_s25 = smov 0   ;;  %s2532_s26 = smov 0  }
   0x9 LB: > { %s1832_s27 = sadd.s32 4294967295, %s2478_s26   ;;  %s1833_s28 = sadd.s32 4294967294, %s2478_s26   ;;  %s2478_s26 = sphi %s2532_s26, %s23_s26   ;;  %s2474_s25 = sphi %s2530_s25, %s3093_s25   ;;  %s2470_s24 = sphi %s2528_s24, %s3092_s24   ;;  %s2466_s23 = sphi %s2526_s23, %s3091_s23   ;;  %s2462_s22 = sphi %s2524_s22, %s3090_s22   ;;  %s2458_s21 = sphi %s2522_s21, %s3089_s21  }
   0xa   : > { %p55_p0 = scmp.ne.s32.totalorder %s2462_s22, %s2458_s21  ;;  %p2556_p1 = scmp.eq.s32.totalorder %s1832_s27, 0 }
   0xb   : > { %p2560_p2 = scmp.eq.s32.totalorder %s1832_s27, 1  ;;  %p207_p3 = scmp.eq.s32.totalorder %s1833_s28, 1 }
   0xc   : > { %p2566_p4 = por %p2556_p1, %p55_p0  ;;  %p1834_p5 = scmp.ge.s32.totalorder %s2478_s26, 1 }
   0xd   : > { %p2571_p6 = por %p207_p3, %p55_p0  ;;  %p214_p7 = scmp.lt.s32.totalorder %s2478_s26, 3 }
   0xe   : > { %s3083_s1 = sld [smem:[#allocation14_spill]]  ;;  %s2480_s13 = smov [#allocation6]  }
   0xf   : > { %s3081_s8 = scalar_select %p2571_p6, 1, 0 }
  0x10   : > { %p2579_p8 = pnand %p1834_p5, %p214_p7  ;;  %s229_s14 = sshll.u32 %s2480_s13, 4  ;;  %s230_s14 = int_to_ptr.vmem [resolvable:$true] %s229_s14 }
  0x11   : > { %3082 = sst [smem:[#allocation12_spill]] %s3081_s8  ;;  %p1838_p11 = scmp.ge.s32.totalorder %s2478_s26, 2 }
  0x12   : > { %p2257_p9 = pneg %p2579_p8  ;;  %s2481_s15 = smov 64  }
  0x13   : > { %s2482_s16 = smov 4   ;;  %s35_s17 = sadd.s32 1, %s2474_s25 }
  0x14   : > { %s227_s11 = sshll.u32 %s3083_s1, 4  ;;  %p2258_p10 = pnand %p2257_p9, %p2556_p1  ;;  %s228_s11 = int_to_ptr.hbm [resolvable:$true] %s227_s11 }
  0x15   : > { %p37_p12 = scmp.ge.s32.totalorder %s35_s17, 2  ;;  %s42_s18 = sadd.s32 1, %s2466_s23 }
  0x16   : > { %2260 = dma.hbm_to_vmem [thread:$0]  (!%p2258_p10), %s228_s11, 9216, %s230_s14, [#allocation7], %s2481_s15, %s2481_s15, %s2482_s16  }
  0x17   : > { %p49_p13 = scmp.ne.s32.totalorder %s2466_s23, %s2462_s22  ;;  %p50_p0 = scmp.eq.s32.totalorder %s2478_s26, 0 }
  0x18   : > { %s3095_s17 = smov (%p37_p12, %s35_s17), 0  ;;  %p2270_p7 = scmp.lt.s32.totalorder %s2478_s26, 2 }
  0x19   : > { %3085 = sst [smem:[#allocation13_spill]] %s3095_s17  ;;  %p51_p3 = por %p50_p0, %p49_p13 }
  0x1a   : > { %p2597_p5 = por %p2560_p2, %p49_p13  ;;  %s39_s20 = ssub.s32 %s2474_s25, %s3095_s17 }
  0x1b   : > { %p40_p9 = scmp.eq.s32.totalorder %s39_s20, 0  ;;  %s261_s27 = sand.u32 1, %s2466_s23  }
  0x1c   : > { %s2244_s28 = smul.u32 352, %s261_s27  ;;  %p2262_p10 = pnand %p2270_p7, %p51_p3 }
  0x1d   : > { %s2606_s9 = scalar_select %p40_p9, %s2466_s23, %s42_s18  }
  0x1e   : > { %s2245_s10 = smul.u32 352, %s2474_s25  ;;  %s265_s11 = scalar_lea.vmem [#allocation3], %s2244_s28 }
  0x1f   : > { %s273_s13 = sshll.u32 %s265_s11, 4  ;;  %s262_s1 = scalar_lea.sflag [#allocation4], %s261_s27  ;;  %s274_s13 = int_to_ptr.vmem [resolvable:$true] %s273_s13 }
  0x20   : > { %s270_s16 = scalar_lea.hbm %s3068_s0, %s2245_s10  ;;  %s2483_s8 = smov 128  }
  0x21   : > { %s271_s30 = sshll.u32 %s270_s16, 4  ;;  %s2484_s17 = smov 8   ;;  %s272_s30 = int_to_ptr.hbm [resolvable:$true] %s271_s30 }
  0x22   : > { %2264 = dma.hbm_to_vmem [thread:$0]  (!%p2262_p10), %s272_s30, 5632, %s274_s13, %s262_s1, %s2483_s8, %s2483_s8, %s2484_s17  }
  0x23   : > { %285 = sbr.rel (%p2579_p8) target bundleno = 404 (0x194), region = 44  ;;  %s2615_s18 = sand.u32 (!%p2579_p8), 1, %s2462_s22  }
  0x24   : > { %s2246_s20 = smul.u32 (!%p2579_p8), 352, %s2615_s18  ;;  %s288_s28 = scalar_lea.sflag (!%p2579_p8), [#allocation4], %s2615_s18 }
  0x26   : > { %s2619_s11 = scalar_lea.vmem (!%p2579_p8), [#allocation3], %s2246_s20 }
  0x28   : > { %2445 = dma.done.wait (%p2566_p4), %s288_s28, 5632  }
  0x29   : > { %2447 = vsyncadd (%p2566_p4), %s288_s28, 4294961664 }
  0x2a   : > { %2449 = dma.done.wait (%p2556_p1), [#allocation7], 9216  }
  0x2b   : > { %2451 = vsyncadd (%p2556_p1), [#allocation7], 4294958080  ;;  %v2632_v0 = vld [vmem:[%s3070_s2] ss:$0 sm:$0xff]  ;;  %v2148_v1 = vld [vmem:[#allocation6 + $0x78] sm:$0xff]  ;;  %s2247_s13 = smul.u32 36, %s2615_s18 }
  0x2c   : > { %v2637_v2 = vld [vmem:[%s3071_s3] ss:$0 sm:$0xff]  ;;  %680 = vmatpush.bf16.msra.mxu0 %v2148_v1  ;;  %2228 = vmatpush.bf16.msra.mxu1 %v2148_v1  ;;  %v2147_v3 = vld [vmem:[#allocation6 + $0x70] sm:$0xff]  ;;  %v2164_v4 = vld [vmem:[#allocation6 + $0xf8] sm:$0xff]  ;;  %s2248_s15 = smul.u32 36, %s2470_s24  ;;  %s2412_s29 = scalar_lea.hbm %s3074_s6, 72 }
  0x2d   : > { %2229 = vmatpush.bf16.msra.mxu2 %v2148_v1  ;;  %v2163_v5 = vld [vmem:[#allocation6 + $0xf0] sm:$0xff]  ;;  %995 = vmatpush.bf16.msra.mxu3 %v2164_v4  ;;  %v353_v6 = vld [vmem:[%s2619_s11 + $0x58] sm:$0xff]  ;;  %v354_v7 = vld [vmem:[%s2619_s11 + $0x60] sm:$0xff]  ;;  %s3003_s14 = scalar_lea.vmem [#allocation8], %s2247_s13 }
  0x2e   : > { %v357_v8 = vld [vmem:[%s2619_s11 + $0x78] sm:$0xff]  ;;  %v401_v9 = vmul.f32 %v2632_v0, %v353_v6  ;;  %v358_v10 = vld [vmem:[%s2619_s11 + $0x80] sm:$0xff]  ;;  %v2146_v11 = vld [vmem:[#allocation6 + $0x68] sm:$0xff]  ;;  %v402_v12 = vmul.f32 %v2632_v0, %v354_v7  ;;  %s1709_s20 = scalar_lea.hbm %s3074_s6, %s2248_s15  ;;  %s1710_s24 = sshll.u32 %s3003_s14, 4  ;;  %s1711_s24 = int_to_ptr.vmem [resolvable:$true] %s1710_s24 }
  0x2f   : > { %v405_v13 = vmul.f32 %v2632_v0, %v357_v8  ;;  %v406_v14 = vmul.f32 %v2632_v0, %v358_v10  ;;  %v361_v16 = vld [vmem:[%s2619_s11 + $0x98] sm:$0xff]  ;;  %v2162_v20 = vld [vmem:[#allocation6 + $0xe8] sm:$0xff]  ;;  %v2145_v21 = vld [vmem:[#allocation6 + $0x60] sm:$0xff]  ;;  %s1712_s28 = sshll.u32 %s1709_s20, 4  ;;  %s1713_s28 = int_to_ptr.hbm [resolvable:$true] %s1712_s28 }
  0x30   : > { %681 = vmatpush.bf16.msra.mxu0 %v2147_v3  ;;  %2230 = vmatpush.bf16.msra.mxu1 %v2147_v3  ;;  %v2648_v15 = vadd.f32 %v2637_v2, %v401_v9  ;;  %v2652_v17 = vadd.f32 %v2637_v2, %v402_v12  ;;  %v409_v23 = vmul.f32 %v2632_v0, %v361_v16  ;;  %v355_v24 = vld [vmem:[%s2619_s11 + $0x68] sm:$0xff]  ;;  %v356_v26 = vld [vmem:[%s2619_s11 + $0x70] sm:$0xff]  ;;  %v2161_v35 = vld [vmem:[#allocation6 + $0xe0] sm:$0xff]  ;;  %s2406_s1 = sshra.s32 %s1713_s28, 4  ;;  %s2407_s1 = int_to_ptr.hbm [resolvable:$true] %s2406_s1 }
  0x31   : > { %2231 = vmatpush.bf16.msra.mxu2 %v2147_v3  ;;  %996 = vmatpush.bf16.msra.mxu3 %v2163_v5  ;;  %v2655_v18 = vadd.f32 %v2637_v2, %v405_v13  ;;  %v2658_v19 = vadd.f32 %v2637_v2, %v406_v14  ;;  %v403_v27 = vmul.f32 %v2632_v0, %v355_v24  ;;  %v359_v28 = vld [vmem:[%s2619_s11 + $0x88] sm:$0xff]  ;;  %v360_v29 = vld [vmem:[%s2619_s11 + $0x90] sm:$0xff]  ;;  %v2144_v37 = vld [vmem:[#allocation6 + $0x58] sm:$0xff]  ;;  %s2408_s8 = scalar_lea.hbm %s2407_s1, 36  ;;  %p2413_p8 = scmp.lt.s32.totalorder %s2407_s1, %s3074_s6 }
  0x32   : > { %v493_v22 = vmax.f32 %v2648_v15, 0.0  ;;  %v494_v25 = vmax.f32 %v2652_v17, 0.0  ;;  %v457_v31 = vadd.f32 %v2637_v2, %v409_v23  ;;  %v404_v32 = vmul.f32 %v2632_v0, %v356_v26  ;;  %v342_v43 = vld [vmem:[%s2619_s11] sm:$0xff]  ;;  %v343_v44 = vld [vmem:[%s2619_s11 + $0x8] sm:$0xff]  ;;  %v344_v45 = vld [vmem:[%s2619_s11 + $0x10] sm:$0xff]  ;;  %p2409_p1 = scmp.ne.s32.totalorder %s2407_s1, %s2408_s8  ;;  %p2414_p12 = scmp.lt.s32.totalorder %s2412_s29, %s2408_s8 }
  0x33   : > { %v497_v30 = vmax.f32 %v2655_v18, 0.0  ;;  %v407_v33 = vmul.f32 %v2632_v0, %v359_v28  ;;  %v498_v34 = vmax.f32 %v2658_v19, 0.0  ;;  %v2676_v36 = vadd.f32 %v2637_v2, %v403_v27  ;;  %v2160_v48 = vld [vmem:[#allocation6 + $0xd8] sm:$0xff]  ;;  %v364_v50 = vld [vmem:[%s2619_s11 + $0xb0] sm:$0xff]  ;;  %v2142_v6 = vld [vmem:[#allocation6 + $0x48] sm:$0xff] }
  0x34   : > { %682 = vmatpush.bf16.msra.mxu0 %v2146_v11  ;;  %2232 = vmatpush.bf16.msra.mxu1 %v2146_v11  ;;  %538 = vst [vmem:[#allocation2 + $0x60] sm:$0xff] %v494_v25  ;;  %v2680_v38 = vmax.f32 %v457_v31, 0.0  ;;  %v2683_v39 = vadd.f32 %v2637_v2, %v404_v32  ;;  %v408_v40 = vmul.f32 %v2632_v0, %v360_v29  ;;  %v365_v51 = vld [vmem:[%s2619_s11 + $0xb8] sm:$0xff]  ;;  %v2143_v58 = vld [vmem:[#allocation6 + $0x50] sm:$0xff]  ;;  %v2158_v9 = vld [vmem:[#allocation6 + $0xc8] sm:$0xff]  ;;  %p2410_p2 = pnand %p2409_p1, %p2597_p5  ;;  %p2415_p13 = por %p2414_p12, %p2413_p8 }
  0x35   : > { %2233 = vmatpush.bf16.msra.mxu2 %v2146_v11  ;;  %997 = vmatpush.bf16.msra.mxu3 %v2162_v20  ;;  %541 = vst [vmem:[#allocation2 + $0x78] sm:$0xff] %v497_v30  ;;  %v2687_v41 = vadd.f32 %v2637_v2, %v407_v33  ;;  %v495_v42 = vmax.f32 %v2676_v36, 0.0  ;;  %v390_v52 = vmul.f32 %v2632_v0, %v342_v43  ;;  %v2159_v1 = vld [vmem:[#allocation6 + $0xd0] sm:$0xff]  ;;  %v375_v10 = vld [vmem:[%s2619_s11 + $0x108] sm:$0xff]  ;;  %v2141_v12 = vld [vmem:[#allocation6 + $0x40] sm:$0xff] }
  0x36   : > { %542 = vst [vmem:[#allocation2 + $0x80] sm:$0xff] %v498_v34  ;;  %v496_v46 = vmax.f32 %v2683_v39, 0.0  ;;  %v2698_v47 = vadd.f32 %v2637_v2, %v408_v40  ;;  %v391_v53 = vmul.f32 %v2632_v0, %v343_v44  ;;  %v392_v54 = vmul.f32 %v2632_v0, %v344_v45  ;;  %v376_v11 = vld [vmem:[%s2619_s11 + $0x110] sm:$0xff]  ;;  %v2140_v16 = vld [vmem:[#allocation6 + $0x38] sm:$0xff]  ;;  %v2157_v29 = vld [vmem:[#allocation6 + $0xc0] sm:$0xff]  ;;  %p2411_p4 = pneg %p2410_p2 }
  0x37   : > { %545 = vst [vmem:[#allocation2 + $0x98] sm:$0xff] %v2680_v38  ;;  %v499_v49 = vmax.f32 %v2687_v41, 0.0  ;;  %v412_v56 = vmul.f32 %v2632_v0, %v364_v50  ;;  %v413_v57 = vmul.f32 %v2632_v0, %v365_v51  ;;  %v2716_v59 = vadd.f32 %v2637_v2, %v390_v52  ;;  %v2156_v20 = vld [vmem:[#allocation6 + $0xb8] sm:$0xff]  ;;  %v346_v15 = vld [vmem:[%s2619_s11 + $0x20] sm:$0xff]  ;;  %v2155_v17 = vld [vmem:[#allocation6 + $0xb0] sm:$0xff] }
  0x38   : > { %683 = vmatpush.bf16.msra.mxu0 %v2145_v21  ;;  %2234 = vmatpush.bf16.msra.mxu1 %v2145_v21  ;;  %539 = vst [vmem:[#allocation2 + $0x68] sm:$0xff] %v495_v42  ;;  %v500_v55 = vmax.f32 %v2698_v47, 0.0  ;;  %v2719_v60 = vadd.f32 %v2637_v2, %v391_v53  ;;  %v2722_v61 = vadd.f32 %v2637_v2, %v392_v54  ;;  %v345_v32 = vld [vmem:[%s2619_s11 + $0x18] sm:$0xff]  ;;  %v2171_v33 = vld [vmem:[#allocation6 + $0x130] sm:$0xff]  ;;  %v2138_v45 = vld [vmem:[#allocation6 + $0x28] sm:$0xff]  ;;  %p2416_p0 = pnand %p2415_p13, %p2411_p4 }
  0x39   : > { %2235 = vmatpush.bf16.msra.mxu2 %v2145_v21  ;;  %998 = vmatpush.bf16.msra.mxu3 %v2161_v35  ;;  %540 = vst [vmem:[#allocation2 + $0x70] sm:$0xff] %v496_v46  ;;  %v460_v62 = vadd.f32 %v2637_v2, %v412_v56  ;;  %v461_v63 = vadd.f32 %v2637_v2, %v413_v57  ;;  %v482_v3 = vmax.f32 %v2716_v59, 0.0  ;;  %v2172_v21 = vld [vmem:[#allocation6 + $0x138] sm:$0xff]  ;;  %v366_v35 = vld [vmem:[%s2619_s11 + $0xc0] sm:$0xff]  ;;  %v2195_v51 = vld [vmem:[#allocation6 + $0x1f0] sm:$0xff] }
  0x3a   : > { %543 = vst [vmem:[#allocation2 + $0x88] sm:$0xff] %v499_v49  ;;  %v483_v5 = vmax.f32 %v2719_v60, 0.0  ;;  %v484_v8 = vmax.f32 %v2722_v61, 0.0  ;;  %v423_v13 = vmul.f32 %v2632_v0, %v375_v10  ;;  %v424_v14 = vmul.f32 %v2632_v0, %v376_v11  ;;  %v2196_v18 = vld [vmem:[#allocation6 + $0x1f8] sm:$0xff]  ;;  %v2154_v53 = vld [vmem:[#allocation6 + $0xa8] sm:$0xff]  ;;  %v2167_v41 = vld [vmem:[#allocation6 + $0x110] sm:$0xff] }
  0x3b   : > { %544 = vst [vmem:[#allocation2 + $0x90] sm:$0xff] %v500_v55  ;;  %v504_v4 = vmax.f32 %v460_v62, 0.0  ;;  %v505_v7 = vmax.f32 %v461_v63, 0.0  ;;  %v610_v26 = vpack.c.bf16 %v494_v25, %v493_v22  ;;  %v612_v27 = vpack.c.bf16 %v498_v34, %v497_v30  ;;  %v2139_v22 = vld [vmem:[#allocation6 + $0x30] sm:$0xff]  ;;  %v2170_v54 = vld [vmem:[#allocation6 + $0x128] sm:$0xff]  ;;  %v2137_v62 = vld [vmem:[#allocation6 + $0x20] sm:$0xff] }
  0x3c   : > { %684 = vmatpush.bf16.msra.mxu0 %v2144_v37  ;;  %2236 = vmatpush.bf16.msra.mxu1 %v2144_v37  ;;  %526 = vst [vmem:[#allocation2] sm:$0xff] %v482_v3  ;;  %v2742_v23 = vadd.f32 %v2637_v2, %v423_v13  ;;  %v2745_v24 = vadd.f32 %v2637_v2, %v424_v14  ;;  %v2153_v63 = vld [vmem:[#allocation6 + $0xa0] sm:$0xff]  ;;  %v2136_v10 = vld [vmem:[#allocation6 + $0x18] sm:$0xff]  ;;  %v2203_v59 = vld [vmem:[#allocation6 + $0x230] sm:$0xff] }
  0x3d   : > { %2237 = vmatpush.bf16.msra.mxu2 %v2144_v37  ;;  %999 = vmatpush.bf16.msra.mxu3 %v2160_v48  ;;  %548 = vst [vmem:[#allocation2 + $0xb0] sm:$0xff] %v504_v4  ;;  %v614_v28 = vpack.c.bf16 %v2680_v38, %v2680_v38  ;;  %v393_v25 = vmul.f32 %v2632_v0, %v345_v32  ;;  %v367_v37 = vld [vmem:[%s2619_s11 + $0xc8] sm:$0xff]  ;;  %v2152_v11 = vld [vmem:[#allocation6 + $0x98] sm:$0xff] }
  0x3e   : > { %549 = vst [vmem:[#allocation2 + $0xb8] sm:$0xff] %v505_v7  ;;  %v515_v31 = vmax.f32 %v2742_v23, 0.0  ;;  %v516_v19 = vmax.f32 %v2745_v24, 0.0  ;;  %v394_v30 = vmul.f32 %v2632_v0, %v346_v15  ;;  %v925_v34 = vpack.c.bf16 %v505_v7, %v504_v4  ;;  %v377_v4 = vld [vmem:[%s2619_s11 + $0x118] sm:$0xff]  ;;  %v370_v24 = vld [vmem:[%s2619_s11 + $0xe0] sm:$0xff] }
  0x3f   : > { %527 = vst [vmem:[#allocation2 + $0x8] sm:$0xff] %v483_v5  ;;  %v414_v38 = vmul.f32 %v2632_v0, %v366_v35  ;;  %v415_v40 = vmul.f32 %v2632_v0, %v367_v37  ;;  %v2768_v43 = vadd.f32 %v2637_v2, %v393_v25  ;;  %v425_v7 = vmul.f32 %v2632_v0, %v377_v4  ;;  %v369_v47 = vld [vmem:[%s2619_s11 + $0xd8] sm:$0xff]  ;;  %v2166_v35 = vld [vmem:[#allocation6 + $0x108] sm:$0xff] }
  0x40   : > { %685 = vmatpush.bf16.msra.mxu0 %v2143_v58  ;;  %2238 = vmatpush.bf16.msra.mxu1 %v2143_v58  ;;  %528 = vst [vmem:[#allocation2 + $0x10] sm:$0xff] %v484_v8  ;;  %v2771_v44 = vadd.f32 %v2637_v2, %v394_v30  ;;  %v417_v15 = vmul.f32 %v2632_v0, %v369_v47 }
  0x41   : > { %2239 = vmatpush.bf16.msra.mxu2 %v2143_v58  ;;  %1000 = vmatpush.bf16.msra.mxu3 %v2159_v1  ;;  %v462_v48 = vadd.f32 %v2637_v2, %v414_v38  ;;  %v463_v50 = vadd.f32 %v2637_v2, %v415_v40  ;;  %v485_v52 = vmax.f32 %v2768_v43, 0.0  ;;  %v2169_v1 = vld [vmem:[#allocation6 + $0x120] sm:$0xff]  ;;  %v2786_v13 = vadd.f32 %v2637_v2, %v425_v7  ;;  %v2191_v43 = vld [vmem:[#allocation6 + $0x1d0] sm:$0xff] }
  0x42   : > { %v486_v56 = vmax.f32 %v2771_v44, 0.0  ;;  %v465_v30 = vadd.f32 %v2637_v2, %v417_v15 }
  0x43   : > { %v506_v57 = vmax.f32 %v462_v48, 0.0  ;;  %529 = vst [vmem:[#allocation2 + $0x18] sm:$0xff] %v485_v52  ;;  %v507_v58 = vmax.f32 %v463_v50, 0.0  ;;  %v2133_v48 = vld [vmem:[#allocation6] sm:$0xff] }
  0x44   : > { %686 = vmatpush.bf16.msra.mxu0 %v2142_v6  ;;  %2240 = vmatpush.bf16.msra.mxu1 %v2142_v6  ;;  %530 = vst [vmem:[#allocation2 + $0x20] sm:$0xff] %v486_v56  ;;  %v509_v40 = vmax.f32 %v465_v30, 0.0  ;;  %v2165_v50 = vld [vmem:[#allocation6 + $0x100] sm:$0xff] }
  0x45   : > { %2241 = vmatpush.bf16.msra.mxu2 %v2142_v6  ;;  %1001 = vmatpush.bf16.msra.mxu3 %v2158_v9  ;;  %550 = vst [vmem:[#allocation2 + $0xc0] sm:$0xff] %v506_v57  ;;  %v378_v6 = vld [vmem:[%s2619_s11 + $0x120] sm:$0xff] }
  0x46   : > { %551 = vst [vmem:[#allocation2 + $0xc8] sm:$0xff] %v507_v58  ;;  %v426_v9 = vmul.f32 %v2632_v0, %v378_v6  ;;  %v2185_v30 = vld [vmem:[#allocation6 + $0x1a0] sm:$0xff] }
  0x47   : > { %553 = vst [vmem:[#allocation2 + $0xd8] sm:$0xff] %v509_v40 }
  0x48   : > { %687 = vmatpush.bf16.msra.mxu0 %v2141_v12  ;;  %2242 = vmatpush.bf16.msra.mxu1 %v2141_v12  ;;  %v2789_v14 = vadd.f32 %v2637_v2, %v426_v9 }
  0x49   : > { %2243 = vmatpush.bf16.msra.mxu2 %v2141_v12  ;;  %1002 = vmatpush.bf16.msra.mxu3 %v2157_v29  ;;  %v2168_v12 = vld [vmem:[#allocation6 + $0x118] sm:$0xff]  ;;  %v2135_v29 = vld [vmem:[#allocation6 + $0x10] sm:$0xff] }
  0x4a   : > { %v518_v32 = vmax.f32 %v2789_v14, 0.0 }
  0x4b   : > { %688 = vmatmul.bf16.vlgmr.msra.gmra.mxu0 %v610_v26  ;;  %698 = vmatmul.bf16.vlgmr.msra.gmra.mxu1 %v612_v27  ;;  %v347_v26 = vld [vmem:[%s2619_s11 + $0x28] sm:$0xff]  ;;  %v348_v27 = vld [vmem:[%s2619_s11 + $0x30] sm:$0xff] }
  0x4c   : > { %761 = vmatpush.bf16.msrb.mxu1 %v2140_v16  ;;  %1117 = vmatpush.bf16.msrb.mxu0 %v2172_v21  ;;  %v611_v16 = vpack.c.bf16 %v496_v46, %v495_v42  ;;  %v517_v21 = vmax.f32 %v2786_v13, 0.0  ;;  %v395_v36 = vmul.f32 %v2632_v0, %v347_v26  ;;  %v396_v39 = vmul.f32 %v2632_v0, %v348_v27  ;;  %v368_v46 = vld [vmem:[%s2619_s11 + $0xd0] sm:$0xff]  ;;  %v349_v26 = vld [vmem:[%s2619_s11 + $0x38] sm:$0xff]  ;;  %v350_v27 = vld [vmem:[%s2619_s11 + $0x40] sm:$0xff] }
  0x4d   : > { %873 = vmatpush.bf16.msrb.mxu2 %v2156_v20  ;;  %1480 = vmatpush.bf16.msrb.mxu3 %v2196_v18  ;;  %v613_v20 = vpack.c.bf16 %v500_v55, %v499_v49  ;;  %v926_v42 = vpack.c.bf16 %v507_v58, %v506_v57  ;;  %v2194_v49 = vld [vmem:[#allocation6 + $0x1e8] sm:$0xff]  ;;  %v416_v55 = vmul.f32 %v2632_v0, %v368_v46  ;;  %v2180_v57 = vld [vmem:[#allocation6 + $0x178] sm:$0xff] }
  0x4e   : > { %708 = vmatmul.bf16.vlgmr.msra.gmra.mxu2 %v614_v28  ;;  %1003 = vmatmul.bf16.vlgmr.msra.gmra.mxu3 %v925_v34  ;;  %v2151_v28 = vld [vmem:[#allocation6 + $0x90] sm:$0xff]  ;;  %v2134_v18 = vld [vmem:[#allocation6 + $0x8] sm:$0xff] }
  0x4f   : > { %v464_v25 = vadd.f32 %v2637_v2, %v416_v55  ;;  %v2150_v34 = vld [vmem:[#allocation6 + $0x88] sm:$0xff]  ;;  %v2192_v55 = vld [vmem:[#allocation6 + $0x1d8] sm:$0xff] }
  0x50   : > { %762 = vmatpush.bf16.msrb.mxu1 %v2139_v22  ;;  %1118 = vmatpush.bf16.msrb.mxu0 %v2171_v33  ;;  %v2813_v22 = vadd.f32 %v2637_v2, %v396_v39  ;;  %v379_v58 = vld [vmem:[%s2619_s11 + $0x128] sm:$0xff] }
  0x51   : > { %874 = vmatpush.bf16.msrb.mxu2 %v2155_v17  ;;  %1481 = vmatpush.bf16.msrb.mxu3 %v2195_v51  ;;  %v2810_v17 = vadd.f32 %v2637_v2, %v395_v36  ;;  %v508_v38 = vmax.f32 %v464_v25, 0.0  ;;  %v794_v51 = vld [vmem:[#allocation2 + $0x1] sm:$0xff] }
  0x52   : > { %v488_v37 = vmax.f32 %v2813_v22, 0.0  ;;  %v2186_v39 = vld [vmem:[#allocation6 + $0x1a8] sm:$0xff] }
  0x53   : > { %v487_v33 = vmax.f32 %v2810_v17, 0.0  ;;  %552 = vst [vmem:[#allocation2 + $0xd0] sm:$0xff] %v508_v38  ;;  %v927_v23 = vpack.c.bf16 %v509_v40, %v508_v38  ;;  %v2202_v46 = vld [vmem:[#allocation6 + $0x228] sm:$0xff]  ;;  %v2201_v38 = vld [vmem:[#allocation6 + $0x220] sm:$0xff]  ;;  %v2866_v40 = vld [vmem:[#allocation2 + $0x11] sm:$0xff] }
  0x54   : > { %763 = vmatpush.bf16.msrb.mxu1 %v2138_v45  ;;  %1119 = vmatpush.bf16.msrb.mxu0 %v2170_v54  ;;  %532 = vst [vmem:[#allocation2 + $0x30] sm:$0xff] %v488_v37  ;;  %v2149_v45 = vld [vmem:[#allocation6 + $0x80] sm:$0xff]  ;;  %v2188_v54 = vld [vmem:[#allocation6 + $0x1b8] sm:$0xff] }
  0x55   : > { %875 = vmatpush.bf16.msrb.mxu2 %v2154_v53  ;;  %1482 = vmatpush.bf16.msrb.mxu3 %v2194_v49  ;;  %531 = vst [vmem:[#allocation2 + $0x28] sm:$0xff] %v487_v33  ;;  %v2823_v53 = vld [vmem:[#allocation2 + $0x9] sm:$0xff]  ;;  %v2173_v17 = vld [vmem:[#allocation6 + $0x140] sm:$0xff] }
  0x56   : > { %v803_v6 = vpack.c.bf16 %v2823_v53, %v794_v51  ;;  %v2184_v51 = vld [vmem:[#allocation6 + $0x198] sm:$0xff]  ;;  %v1289_v44 = vpack.c.bf16 %v2866_v40, %v2823_v53 }
  0x58   : > { %764 = vmatpush.bf16.msrb.mxu1 %v2137_v62  ;;  %1120 = vmatpush.bf16.msrb.mxu0 %v2169_v1  ;;  %v380_v62 = vld [vmem:[%s2619_s11 + $0x130] sm:$0xff]  ;;  %v427_v1 = vmul.f32 %v2632_v0, %v379_v58 }
  0x59   : > { %876 = vmatpush.bf16.msrb.mxu2 %v2153_v63  ;;  %v2204_v63 = vld [vmem:[#allocation6 + $0x238] sm:$0xff]  ;;  %v428_v4 = vmul.f32 %v2632_v0, %v380_v62 }
  0x5a   : > { %v2831_v7 = vadd.f32 %v2637_v2, %v427_v1 }
  0x5b   : > { %693 = vmatmul.bf16.gmra.mxu0 %v611_v16  ;;  %703 = vmatmul.bf16.gmra.mxu1 %v613_v20  ;;  %v2834_v9 = vadd.f32 %v2637_v2, %v428_v4  ;;  %v2179_v16 = vld [vmem:[#allocation6 + $0x170] sm:$0xff]  ;;  %v580_v4 = vpack.c.bf16 %v485_v52, %v484_v8 }
  0x5c   : > { %765 = vmatpush.bf16.msrb.mxu1 %v2136_v10  ;;  %1121 = vmatpush.bf16.msrb.mxu0 %v2168_v12  ;;  %v579_v10 = vpack.c.bf16 %v483_v5, %v482_v3  ;;  %v2187_v12 = vld [vmem:[#allocation6 + $0x1b0] sm:$0xff]  ;;  %v519_v20 = vmax.f32 %v2831_v7, 0.0  ;;  %v397_v3 = vmul.f32 %v2632_v0, %v349_v26  ;;  %v398_v5 = vmul.f32 %v2632_v0, %v350_v27 }
  0x5d   : > { %877 = vmatpush.bf16.msrb.mxu2 %v2152_v11  ;;  %v1047_v11 = vpack.c.bf16 %v516_v19, %v515_v31  ;;  %v520_v60 = vmax.f32 %v2834_v9, 0.0  ;;  %v371_v31 = vld [vmem:[%s2619_s11 + $0xe8] sm:$0xff]  ;;  %v418_v19 = vmul.f32 %v2632_v0, %v370_v24  ;;  %v372_v27 = vld [vmem:[%s2619_s11 + $0xf0] sm:$0xff] }
  0x5e   : > { %1008 = vmatmul.bf16.gmra.mxu3 %v926_v42  ;;  %v2855_v36 = vadd.f32 %v2637_v2, %v397_v3  ;;  %v446_v42 = vadd.f32 %v2637_v2, %v398_v5  ;;  %v2175_v52 = vld [vmem:[#allocation6 + $0x150] sm:$0xff]  ;;  %v420_v13 = vmul.f32 %v2632_v0, %v372_v27  ;;  %v1524_v27 = vld [vmem:[#allocation2 + $0x1a] sm:$0xff] }
  0x5f   : > { %v466_v47 = vadd.f32 %v2637_v2, %v418_v19  ;;  %v2900_v24 = vld [vmem:[#allocation2 + $0x29] sm:$0xff] }
  0x60   : > { %766 = vmatpush.bf16.msrb.mxu1 %v2135_v29  ;;  %1122 = vmatpush.bf16.msrb.mxu0 %v2167_v41  ;;  %v419_v29 = vmul.f32 %v2632_v0, %v371_v31  ;;  %v2178_v41 = vld [vmem:[#allocation6 + $0x168] sm:$0xff]  ;;  %v489_v15 = vmax.f32 %v2855_v36, 0.0  ;;  %v1403_v36 = vld [vmem:[#allocation2 + $0x71] sm:$0xff] }
  0x61   : > { %878 = vmatpush.bf16.msrb.mxu2 %v2151_v28  ;;  %v2193_v28 = vld [vmem:[#allocation6 + $0x1e0] sm:$0xff]  ;;  %v510_v25 = vmax.f32 %v466_v47, 0.0  ;;  %v383_v31 = vld [vmem:[%s2619_s11 + $0x148] sm:$0xff] }
  0x62   : > { %1483 = vmatpush.bf16.msrb.mxu3 %v2193_v28  ;;  %v467_v49 = vadd.f32 %v2637_v2, %v419_v29  ;;  %533 = vst [vmem:[#allocation2 + $0x38] sm:$0xff] %v489_v15  ;;  %v2190_v28 = vld [vmem:[#allocation6 + $0x1c8] sm:$0xff]  ;;  %v431_v19 = vmul.f32 %v2632_v0, %v383_v31  ;;  %v582_v9 = vpack.c.bf16 %v489_v15, %v488_v37  ;;  %v1404_v15 = vld [vmem:[#allocation2 + $0x79] sm:$0xff] }
  0x63   : > { %554 = vst [vmem:[#allocation2 + $0xe0] sm:$0xff] %v510_v25  ;;  %v2174_v47 = vld [vmem:[#allocation6 + $0x148] sm:$0xff] }
  0x64   : > { %767 = vmatpush.bf16.msrb.mxu1 %v2134_v18  ;;  %1123 = vmatpush.bf16.msrb.mxu0 %v2166_v35  ;;  %v2861_v18 = vmax.f32 %v446_v42, 0.0  ;;  %v511_v35 = vmax.f32 %v467_v49, 0.0  ;;  %v1049_v42 = vpack.c.bf16 %v520_v60, %v519_v20  ;;  %v2197_v20 = vld [vmem:[#allocation6 + $0x200] sm:$0xff] }
  0x65   : > { %879 = vmatpush.bf16.msrb.mxu2 %v2150_v34  ;;  %v2177_v34 = vld [vmem:[#allocation6 + $0x160] sm:$0xff] }
  0x66   : > { %534 = vst [vmem:[#allocation2 + $0x40] sm:$0xff] %v2861_v18  ;;  %1484 = vmatpush.bf16.msrb.mxu3 %v2192_v55  ;;  %v928_v8 = vpack.c.bf16 %v511_v35, %v510_v25  ;;  %v2181_v55 = vld [vmem:[#allocation6 + $0x180] sm:$0xff]  ;;  %v2198_v25 = vld [vmem:[#allocation6 + $0x208] sm:$0xff]  ;;  %v583_v22 = vpack.c.bf16 %v2861_v18, %v2861_v18 }
  0x67   : > { %555 = vst [vmem:[#allocation2 + $0xe8] sm:$0xff] %v511_v35  ;;  %v1401_v60 = vld [vmem:[#allocation2 + $0x61] sm:$0xff] }
  0x68   : > { %768 = vmatpush.bf16.msrb.mxu1 %v2133_v48  ;;  %1124 = vmatpush.bf16.msrb.mxu0 %v2165_v50  ;;  %v381_v48 = vld [vmem:[%s2619_s11 + $0x138] sm:$0xff]  ;;  %v382_v50 = vld [vmem:[%s2619_s11 + $0x140] sm:$0xff] }
  0x69   : > { %880 = vmatpush.bf16.msrb.mxu2 %v2149_v45  ;;  %v2868_v45 = vld [vmem:[#allocation2 + $0x19] sm:$0xff]  ;;  %v430_v58 = vmul.f32 %v2632_v0, %v382_v50 }
  0x6a   : > { %v804_v62 = vpack.c.bf16 %v2868_v45, %v2866_v40  ;;  %1485 = vmatpush.bf16.msrb.mxu3 %v2191_v43  ;;  %v362_v50 = vld [vmem:[%s2619_s11 + $0xa0] sm:$0xff] }
  0x6b   : > { %769 = vmatmul.bf16.vlgmr.msrb.gmra.mxu1 %v579_v10  ;;  %1125 = vmatmul.bf16.vlgmr.msrb.gmra.mxu0 %v1047_v11  ;;  %v2880_v1 = vadd.f32 %v2637_v2, %v430_v58  ;;  %v351_v11 = vld [vmem:[%s2619_s11 + $0x48] sm:$0xff] }
  0x6c   : > { %1238 = vmatpush.bf16.msra.mxu1 %v2180_v57  ;;  %1601 = vmatpush.bf16.msra.mxu0 %v2204_v63  ;;  %v429_v57 = vmul.f32 %v2632_v0, %v381_v48  ;;  %v399_v61 = vmul.f32 %v2632_v0, %v351_v11  ;;  %v1411_v48 = vpack.c.bf16 %v1404_v15, %v1403_v36  ;;  %v1522_v58 = vld [vmem:[#allocation2 + $0xa] sm:$0xff] }
  0x6d   : > { %1359 = vmatpush.bf16.msra.mxu2 %v2188_v54  ;;  %v2176_v54 = vld [vmem:[#allocation6 + $0x158] sm:$0xff]  ;;  %v522_v26 = vmax.f32 %v2880_v1, 0.0 }
  0x6e   : > { %881 = vmatmul.bf16.vlgmr.msrb.gmra.mxu2 %v803_v6  ;;  %1013 = vmatmul.bf16.gmra.mxu3 %v927_v23  ;;  %v2877_v63 = vadd.f32 %v2637_v2, %v429_v57  ;;  %v1048_v6 = vpack.c.bf16 %v518_v32, %v517_v21  ;;  %v447_v14 = vadd.f32 %v2637_v2, %v399_v61  ;;  %v2182_v21 = vld [vmem:[#allocation6 + $0x188] sm:$0xff]  ;;  %v2199_v32 = vld [vmem:[#allocation6 + $0x210] sm:$0xff]  ;;  %v1160_v57 = vld [vmem:[#allocation2 + $0xb9] sm:$0xff] }
  0x6f   : > { %1486 = vmatpush.bf16.msrb.mxu3 %v2190_v28  ;;  %v2898_v23 = vld [vmem:[#allocation2 + $0x21] sm:$0xff]  ;;  %v1162_v61 = vld [vmem:[#allocation2 + $0xc9] sm:$0xff]  ;;  %v1407_v28 = vld [vmem:[#allocation2 + $0x91] sm:$0xff] }
  0x70   : > { %1239 = vmatpush.bf16.msra.mxu1 %v2179_v16  ;;  %1602 = vmatpush.bf16.msra.mxu0 %v2203_v59  ;;  %v521_v10 = vmax.f32 %v2877_v63, 0.0  ;;  %v2200_v16 = vld [vmem:[#allocation6 + $0x218] sm:$0xff]  ;;  %v468_v59 = vadd.f32 %v2637_v2, %v420_v13  ;;  %v491_v3 = vmax.f32 %v447_v14, 0.0  ;;  %v805_v29 = vpack.c.bf16 %v2900_v24, %v2898_v23  ;;  %v1165_v36 = vld [vmem:[#allocation2 + $0xe1] sm:$0xff] }
  0x71   : > { %1360 = vmatpush.bf16.msra.mxu2 %v2187_v12  ;;  %v2183_v12 = vld [vmem:[#allocation6 + $0x190] sm:$0xff]  ;;  %v1290_v43 = vpack.c.bf16 %v2898_v23, %v2868_v45  ;;  %v373_v23 = vld [vmem:[%s2619_s11 + $0xf8] sm:$0xff] }
  0x72   : > { %v512_v5 = vmax.f32 %v468_v59, 0.0  ;;  %535 = vst [vmem:[#allocation2 + $0x48] sm:$0xff] %v491_v3  ;;  %v1050_v53 = vpack.c.bf16 %v522_v26, %v521_v10  ;;  %v1406_v10 = vld [vmem:[#allocation2 + $0x89] sm:$0xff] }
  0x74   : > { %1240 = vmatpush.bf16.msra.mxu1 %v2178_v41  ;;  %1603 = vmatpush.bf16.msra.mxu0 %v2202_v46  ;;  %556 = vst [vmem:[#allocation2 + $0xf0] sm:$0xff] %v512_v5  ;;  %v581_v41 = vpack.c.bf16 %v487_v33, %v486_v56  ;;  %v929_v49 = vpack.c.bf16 %v512_v5, %v512_v5  ;;  %v2917_v56 = vld [vmem:[#allocation2 + $0x31] sm:$0xff]  ;;  %v2919_v33 = vld [vmem:[#allocation2 + $0x39] sm:$0xff] }
  0x75   : > { %1361 = vmatpush.bf16.msra.mxu2 %v2186_v39  ;;  %v479_v39 = vadd.f32 %v2637_v2, %v431_v19  ;;  %v806_v7 = vpack.c.bf16 %v2919_v33, %v2917_v56  ;;  %v352_v5 = vld [vmem:[%s2619_s11 + $0x50] sm:$0xff] }
  0x76   : > { %v400_v31 = vmul.f32 %v2632_v0, %v352_v5 }
  0x77   : > { %v523_v46 = vmax.f32 %v479_v39, 0.0 }
  0x78   : > { %1241 = vmatpush.bf16.msra.mxu1 %v2177_v34  ;;  %1604 = vmatpush.bf16.msra.mxu0 %v2201_v38  ;;  %v1402_v34 = vld [vmem:[#allocation2 + $0x69] sm:$0xff]  ;;  %v448_v45 = vadd.f32 %v2637_v2, %v400_v31 }
  0x79   : > { %1362 = vmatpush.bf16.msra.mxu2 %v2185_v30  ;;  %v2189_v30 = vld [vmem:[#allocation6 + $0x1c0] sm:$0xff]  ;;  %v1410_v35 = vpack.c.bf16 %v1402_v34, %v1401_v60  ;;  %v1051_v37 = vpack.c.bf16 %v523_v46, %v523_v46 }
  0x7a   : > { %1487 = vmatpush.bf16.msrb.mxu3 %v2189_v30  ;;  %v2927_v38 = vld [vmem:[#allocation2 + $0x41] sm:$0xff]  ;;  %v492_v39 = vmax.f32 %v448_v45, 0.0  ;;  %v1164_v30 = vld [vmem:[#allocation2 + $0xd9] sm:$0xff] }
  0x7b   : > { %774 = vmatmul.bf16.gmra.mxu1 %v580_v4  ;;  %1130 = vmatmul.bf16.gmra.mxu0 %v1048_v6  ;;  %v807_v40 = vpack.c.bf16 %v2927_v38, %v2927_v38  ;;  %v1405_v6 = vld [vmem:[#allocation2 + $0x81] sm:$0xff]  ;;  %v1166_v15 = vld [vmem:[#allocation2 + $0xe9] sm:$0xff] }
  0x7c   : > { %1242 = vmatpush.bf16.msra.mxu1 %v2176_v54  ;;  %1605 = vmatpush.bf16.msra.mxu0 %v2200_v16  ;;  %v410_v54 = vmul.f32 %v2632_v0, %v362_v50  ;;  %v1412_v11 = vpack.c.bf16 %v1406_v10, %v1405_v6  ;;  %v1161_v16 = vld [vmem:[#allocation2 + $0xc1] sm:$0xff]  ;;  %536 = vst [vmem:[#allocation2 + $0x50] sm:$0xff] %v492_v39 }
  0x7d   : > { %1363 = vmatpush.bf16.msra.mxu2 %v2184_v51  ;;  %v1159_v51 = vld [vmem:[#allocation2 + $0xb1] sm:$0xff]  ;;  %v1169_v13 = vpack.c.bf16 %v1162_v61, %v1161_v16  ;;  %v1171_v50 = vpack.c.bf16 %v1166_v15, %v1165_v36 }
  0x7e   : > { %886 = vmatmul.bf16.gmra.mxu2 %v804_v62  ;;  %1018 = vmatmul.bf16.gmra.mxu3 %v928_v8  ;;  %v1523_v62 = vld [vmem:[#allocation2 + $0x12] sm:$0xff]  ;;  %v458_v63 = vadd.f32 %v2637_v2, %v410_v54  ;;  %v1168_v1 = vpack.c.bf16 %v1160_v57, %v1159_v51  ;;  %v1525_v8 = vld [vmem:[#allocation2 + $0x22] sm:$0xff] }
  0x7f   : > { %v1531_v18 = vpack.c.bf16 %v1523_v62, %v1522_v58  ;;  %v1532_v14 = vpack.c.bf16 %v1525_v8, %v1524_v27 }
  0x80   : > { %1243 = vmatpush.bf16.msra.mxu1 %v2175_v52  ;;  %1606 = vmatpush.bf16.msra.mxu0 %v2199_v32  ;;  %v502_v4 = vmax.f32 %v458_v63, 0.0 }
  0x81   : > { %1364 = vmatpush.bf16.msra.mxu2 %v2183_v12  ;;  %v363_v12 = vld [vmem:[%s2619_s11 + $0xa8] sm:$0xff]  ;;  %s1697_s11 = scalar_lea.sflag [#allocation5], %s2615_s18 }
  0x82   : > { %546 = vst [vmem:[#allocation2 + $0xa0] sm:$0xff] %v502_v4  ;;  %v411_v26 = vmul.f32 %v2632_v0, %v363_v12 }
  0x83   : > { %v1288_v12 = vld [vmem:[#allocation2 + $0x49] sm:$0xff] }
  0x84   : > { %1244 = vmatpush.bf16.msra.mxu1 %v2174_v47  ;;  %1607 = vmatpush.bf16.msra.mxu0 %v2198_v25  ;;  %v459_v52 = vadd.f32 %v2637_v2, %v411_v26  ;;  %v1163_v25 = vld [vmem:[#allocation2 + $0xd1] sm:$0xff]  ;;  %v1293_v27 = vpack.c.bf16 %v1288_v12, %v1288_v12 }
  0x85   : > { %1365 = vmatpush.bf16.msra.mxu2 %v2182_v21  ;;  %v1530_v26 = vld [vmem:[#allocation2 + $0x4a] sm:$0xff] }
  0x86   : > { %v503_v21 = vmax.f32 %v459_v52, 0.0  ;;  %v1535_v52 = vpack.c.bf16 %v1530_v26, %v1530_v26 }
  0x88   : > { %1245 = vmatpush.bf16.msra.mxu1 %v2173_v17  ;;  %1608 = vmatpush.bf16.msra.mxu0 %v2197_v20  ;;  %547 = vst [vmem:[#allocation2 + $0xa8] sm:$0xff] %v503_v21  ;;  %v1527_v17 = vld [vmem:[#allocation2 + $0x32] sm:$0xff] }
  0x89   : > { %1366 = vmatpush.bf16.msra.mxu2 %v2181_v55  ;;  %v1408_v3 = vld [vmem:[#allocation2 + $0x99] sm:$0xff] }
  0x8a   : > { %v1413_v19 = vpack.c.bf16 %v1408_v3, %v1407_v28 }
  0x8b   : > { %779 = vmatmul.bf16.gmra.mxu1 %v581_v41  ;;  %1135 = vmatmul.bf16.gmra.mxu0 %v1049_v42 }
  0x8e   : > { %891 = vmatmul.bf16.gmra.mxu2 %v805_v29  ;;  %1023 = vmatmul.bf16.gmra.mxu3 %v929_v49  ;;  %v421_v29 = vmul.f32 %v2632_v0, %v373_v23  ;;  %v1291_v0 = vpack.c.bf16 %v2917_v56, %v2900_v24  ;;  %v1528_v24 = vld [vmem:[#allocation2 + $0x3a] sm:$0xff]  ;;  %v1529_v56 = vld [vmem:[#allocation2 + $0x42] sm:$0xff] }
  0x8f   : > { %v1409_v60 = vld [vmem:[#allocation2 + $0xa1] sm:$0xff]  ;;  %v1534_v51 = vpack.c.bf16 %v1529_v56, %v1528_v24 }
  0x90   : > { %v469_v41 = vadd.f32 %v2637_v2, %v421_v29 }
  0x92   : > { %v513_v49 = vmax.f32 %v469_v41, 0.0 }
  0x94   : > { %557 = vst [vmem:[#allocation2 + $0xf8] sm:$0xff] %v513_v49 }
  0x9b   : > { %784 = vmatmul.bf16.gmra.mxu1 %v582_v9  ;;  %1140 = vmatmul.bf16.gmra.mxu0 %v1050_v53  ;;  %v1170_v9 = vpack.c.bf16 %v1164_v30, %v1163_v25 }
  0x9e   : > { %896 = vmatmul.bf16.gmra.mxu2 %v806_v7  ;;  %1488 = vmatmul.bf16.vlgmr.msrb.gmra.mxu3 %v1410_v35  ;;  %v1414_v35 = vpack.c.bf16 %v1409_v60, %v1409_v60 }
  0xab   : > { %789 = vmatmul.bf16.gmra.mxu1 %v583_v22  ;;  %1145 = vmatmul.bf16.gmra.mxu0 %v1051_v37 }
  0xae   : > { %901 = vmatmul.bf16.gmra.mxu2 %v807_v40  ;;  %1493 = vmatmul.bf16.gmra.mxu3 %v1411_v48  ;;  %v1292_v48 = vpack.c.bf16 %v2927_v38, %v2919_v33  ;;  %v1167_v38 = vld [vmem:[#allocation2 + $0xf1] sm:$0xff] }
  0xbb   : > { %1246 = vmatmul.bf16.vlgmr.msra.gmra.mxu1 %v1168_v1  ;;  %1609 = vmatmul.bf16.vlgmr.msra.gmra.mxu0 %v1531_v18 }
  0xbe   : > { %1367 = vmatmul.bf16.vlgmr.msra.gmra.mxu2 %v1289_v44  ;;  %1498 = vmatmul.bf16.gmra.mxu3 %v1412_v11  ;;  %v1526_v44 = vld [vmem:[#allocation2 + $0x2a] sm:$0xff] }
  0xbf   : > { %v1533_v2 = vpack.c.bf16 %v1527_v17, %v1526_v44 }
  0xc8   : > { %v689_v32 = vpop.f32.mrf.mxu0  ;;  %v2941_v59 = vpop.f32.mrf.mxu1 }
  0xcb   : > { %1251 = vmatmul.bf16.gmra.mxu1 %v1169_v13  ;;  %1614 = vmatmul.bf16.gmra.mxu0 %v1532_v14 }
  0xce   : > { %1372 = vmatmul.bf16.gmra.mxu2 %v1290_v43  ;;  %1503 = vmatmul.bf16.gmra.mxu3 %v1413_v19  ;;  %v1172_v43 = vpack.c.bf16 %v1167_v38, %v1167_v38 }
  0xd0   : > { %v691_v46 = vpop.f32.mrf.mxu0  ;;  %v2951_v47 = vpop.f32.mrf.mxu1 }
  0xd1   : > { %v2949_v42 = vpop.f32.mrf.mxu2  ;;  %v1004_v55 = vpop.f32.mrf.mxu3 }
  0xd8   : > { %v694_v53 = vpop.f32.mrf.mxu0  ;;  %v2955_v20 = vpop.f32.mrf.mxu1 }
  0xd9   : > { %v711_v7 = vpop.f32.mrf.mxu2  ;;  %v1006_v34 = vpop.f32.mrf.mxu3 }
  0xdb   : > { %1256 = vmatmul.bf16.gmra.mxu1 %v1170_v9  ;;  %1619 = vmatmul.bf16.gmra.mxu0 %v1533_v2 }
  0xde   : > { %1377 = vmatmul.bf16.gmra.mxu2 %v1291_v0  ;;  %1508 = vmatmul.bf16.gmra.mxu3 %v1414_v35 }
  0xe0   : > { %v696_v40 = vpop.f32.mrf.mxu0  ;;  %v2957_v22 = vpop.f32.mrf.mxu1 }
  0xe1   : > { %v1009_v37 = vpop.f32.mrf.mxu3 }
  0xe8   : > { %v770_v54 = vpop.f32.mrf.mxu1  ;;  %v1126_v57 = vpop.f32.mrf.mxu0 }
  0xe9   : > { %v771_v58 = vadd.f32 %v770_v54, %v689_v32  ;;  %v1011_v62 = vpop.f32.mrf.mxu3 }
  0xeb   : > { %1261 = vmatmul.bf16.gmra.mxu1 %v1171_v50  ;;  %1624 = vmatmul.bf16.gmra.mxu0 %v1534_v51 }
  0xee   : > { %1382 = vmatmul.bf16.gmra.mxu2 %v1292_v48 }
  0xf0   : > { %v772_v4 = vpop.f32.mrf.mxu1  ;;  %v1128_v6 = vpop.f32.mrf.mxu0 }
  0xf1   : > { %v882_v63 = vpop.f32.mrf.mxu2  ;;  %v773_v10 = vadd.f32 %v772_v4, %v691_v46  ;;  %v1014_v16 = vpop.f32.mrf.mxu3 }
  0xf2   : > { %v906_v1 = vadd.f32 %v882_v63, %v771_v58 }
  0xf4   : > { %v1028_v18 = vadd.f32 %v1004_v55, %v906_v1 }
  0xf6   : > { %v2961_v11 = vadd.f32 %v1126_v57, %v1028_v18 }
  0xf8   : > { %v775_v13 = vpop.f32.mrf.mxu1  ;;  %v1131_v14 = vpop.f32.mrf.mxu0 }
  0xf9   : > { %v884_v33 = vpop.f32.mrf.mxu2  ;;  %v776_v21 = vadd.f32 %v775_v13, %v694_v53  ;;  %v1016_v28 = vpop.f32.mrf.mxu3 }
  0xfa   : > { %v907_v61 = vadd.f32 %v884_v33, %v773_v10 }
  0xfb   : > { %1266 = vmatmul.bf16.gmra.mxu1 %v1172_v43  ;;  %1629 = vmatmul.bf16.gmra.mxu0 %v1535_v52 }
  0xfc   : > { %v1029_v8 = vadd.f32 %v1006_v34, %v907_v61 }
  0xfe   : > { %1387 = vmatmul.bf16.gmra.mxu2 %v1293_v27  ;;  %v2963_v32 = vadd.f32 %v1128_v6, %v1029_v8 }
 0x100   : > { %v777_v19 = vpop.f32.mrf.mxu1  ;;  %v1133_v45 = vpop.f32.mrf.mxu0 }
 0x101   : > { %v887_v3 = vpop.f32.mrf.mxu2  ;;  %v778_v23 = vadd.f32 %v777_v19, %v696_v40  ;;  %v1019_v39 = vpop.f32.mrf.mxu3 }
 0x102   : > { %v908_v5 = vadd.f32 %v887_v3, %v776_v21 }
 0x104   : > { %v1030_v31 = vadd.f32 %v1009_v37, %v908_v5 }
 0x106   : > { %v2965_v29 = vadd.f32 %v1131_v14, %v1030_v31 }
 0x108   : > { %v780_v55 = vpop.f32.mrf.mxu1  ;;  %v1136_v25 = vpop.f32.mrf.mxu0 }
 0x109   : > { %v889_v41 = vpop.f32.mrf.mxu2  ;;  %v781_v30 = vadd.f32 %v780_v55, %v2941_v59  ;;  %v1021_v17 = vpop.f32.mrf.mxu3 }
 0x10a   : > { %v909_v46 = vadd.f32 %v889_v41, %v778_v23 }
 0x10c   : > { %v1031_v49 = vadd.f32 %v1011_v62, %v909_v46 }
 0x10e   : > { %v2968_v44 = vadd.f32 %v1133_v45, %v1031_v49  ;;  %v2995_v49 = vld [vmem:[%s3073_s5] ss:$0 sm:$0xff] }
 0x110   : > { %v782_v2 = vpop.f32.mrf.mxu1  ;;  %v1138_v53 = vpop.f32.mrf.mxu0 }
 0x111   : > { %v892_v0 = vpop.f32.mrf.mxu2  ;;  %v783_v60 = vadd.f32 %v782_v2, %v2951_v47  ;;  %v1024_v35 = vpop.f32.mrf.mxu3 }
 0x112   : > { %v910_v7 = vadd.f32 %v892_v0, %v781_v30 }
 0x114   : > { %v1032_v9 = vadd.f32 %v1014_v16, %v910_v7 }
 0x116   : > { %v2971_v34 = vadd.f32 %v1136_v25, %v1032_v9 }
 0x118   : > { %v785_v15 = vpop.f32.mrf.mxu1  ;;  %v1141_v24 = vpop.f32.mrf.mxu0 }
 0x119   : > { %v894_v40 = vpop.f32.mrf.mxu2  ;;  %v786_v59 = vadd.f32 %v785_v15, %v2955_v20  ;;  %v1026_v48 = vpop.f32.mrf.mxu3 }
 0x11a   : > { %v911_v37 = vadd.f32 %v894_v40, %v783_v60 }
 0x11c   : > { %v1033_v36 = vadd.f32 %v1016_v28, %v911_v37 }
 0x11e   : > { %v2974_v56 = vadd.f32 %v1138_v53, %v1033_v36 }
 0x120   : > { %v787_v57 = vpop.f32.mrf.mxu1  ;;  %v1143_v58 = vpop.f32.mrf.mxu0 }
 0x121   : > { %v897_v50 = vpop.f32.mrf.mxu2  ;;  %v788_v47 = vadd.f32 %v787_v57, %v2957_v22  ;;  %v1489_v63 = vpop.f32.mrf.mxu3 }
 0x122   : > { %v912_v51 = vadd.f32 %v897_v50, %v786_v59 }
 0x124   : > { %v1034_v54 = vadd.f32 %v1019_v39, %v912_v51  ;;  %v2989_v39 = vld [vmem:[%s3072_s4] ss:$0 sm:$0xff] }
 0x126   : > { %v2977_v62 = vadd.f32 %v1141_v24, %v1034_v54 }
 0x128   : > { %v790_v6 = vpop.f32.mrf.mxu1  ;;  %v1146_v10 = vpop.f32.mrf.mxu0 }
 0x129   : > { %v899_v1 = vpop.f32.mrf.mxu2  ;;  %v791_v20 = vadd.f32 %v790_v6, %v2949_v42  ;;  %v1491_v16 = vpop.f32.mrf.mxu3 }
 0x12a   : > { %v913_v18 = vadd.f32 %v899_v1, %v788_v47 }
 0x12c   : > { %v1035_v4 = vadd.f32 %v1021_v17, %v913_v18 }
 0x12e   : > { %v2980_v12 = vadd.f32 %v1143_v58, %v1035_v4 }
 0x130   : > { %v792_v61 = vpop.f32.mrf.mxu1  ;;  %v1148_v27 = vpop.f32.mrf.mxu0 }
 0x131   : > { %v902_v33 = vpop.f32.mrf.mxu2  ;;  %v1494_v22 = vpop.f32.mrf.mxu3 }
 0x132   : > { %v914_v38 = vadd.f32 %v902_v33, %v791_v20 }
 0x134   : > { %v1036_v26 = vadd.f32 %v1024_v35, %v914_v38 }
 0x136   : > { %v2982_v8 = vadd.f32 %v1146_v10, %v1036_v26 }
 0x138   : > { %v1247_v52 = vpop.f32.mrf.mxu1  ;;  %v1610_v13 = vpop.f32.mrf.mxu0 }
 0x139   : > { %v904_v43 = vpop.f32.mrf.mxu2  ;;  %v1271_v14 = vadd.f32 %v1247_v52, %v2961_v11  ;;  %v1496_v21 = vpop.f32.mrf.mxu3 }
 0x140   : > { %v1249_v5 = vpop.f32.mrf.mxu1  ;;  %v1612_v31 = vpop.f32.mrf.mxu0 }
 0x141   : > { %v1368_v28 = vpop.f32.mrf.mxu2  ;;  %v1272_v19 = vadd.f32 %v1249_v5, %v2963_v32  ;;  %v1499_v45 = vpop.f32.mrf.mxu3 }
 0x142   : > { %v1392_v3 = vadd.f32 %v1368_v28, %v1271_v14 }
 0x144   : > { %v1513_v42 = vadd.f32 %v1489_v63, %v1392_v3 }
 0x146   : > { %v1634_v23 = vadd.f32 %v1610_v13, %v1513_v42 }
 0x148   : > { %v1647_v11 = vmul.f32 %v2989_v39, %v1634_v23  ;;  %v1252_v25 = vpop.f32.mrf.mxu1  ;;  %v1615_v32 = vpop.f32.mrf.mxu0 }
 0x149   : > { %v1370_v41 = vpop.f32.mrf.mxu2  ;;  %v1273_v17 = vadd.f32 %v1252_v25, %v2965_v29  ;;  %v1501_v0 = vpop.f32.mrf.mxu3 }
 0x14a   : > { %v1393_v46 = vadd.f32 %v1370_v41, %v1272_v19  ;;  %v1660_v7 = vadd.f32 %v2995_v49, %v1647_v11 }
 0x14c   : > { %v1514_v55 = vadd.f32 %v1491_v16, %v1393_v46  ;;  %v1669_v35 = vmax.f32 %v1660_v7, 0.0 }
 0x14e   : > { %v1635_v30 = vadd.f32 %v1612_v31, %v1514_v55 }
 0x150   : > { %v1648_v9 = vmul.f32 %v2989_v39, %v1635_v30  ;;  %v1254_v36 = vpop.f32.mrf.mxu1  ;;  %v1617_v15 = vpop.f32.mrf.mxu0 }
 0x151   : > { %v1373_v2 = vpop.f32.mrf.mxu2  ;;  %v1274_v59 = vadd.f32 %v1254_v36, %v2968_v44  ;;  %v1504_v48 = vpop.f32.mrf.mxu3 }
 0x152   : > { %v1661_v53 = vadd.f32 %v2995_v49, %v1648_v9  ;;  %v1394_v60 = vadd.f32 %v1373_v2, %v1273_v17 }
 0x154   : > { %v1670_v40 = vmax.f32 %v1661_v53, 0.0  ;;  %v1515_v37 = vadd.f32 %v1494_v22, %v1394_v60 }
 0x156   : > { %v2208_v24 = vpack.c.bf16 %v1670_v40, %v1669_v35  ;;  %v1636_v29 = vadd.f32 %v1615_v32, %v1515_v37 }
 0x158   : > { %2209 = vst [vmem:[%s3003_s14] sm:$0xff] %v2208_v24   ;;  %v1649_v54 = vmul.f32 %v2989_v39, %v1636_v29  ;;  %v1257_v58 = vpop.f32.mrf.mxu1  ;;  %v1620_v47 = vpop.f32.mrf.mxu0 }
 0x159   : > { %v1375_v50 = vpop.f32.mrf.mxu2  ;;  %v1275_v1 = vadd.f32 %v1257_v58, %v2971_v34  ;;  %v1506_v18 = vpop.f32.mrf.mxu3 }
 0x15a   : > { %v1395_v51 = vadd.f32 %v1375_v50, %v1274_v59  ;;  %v1662_v44 = vadd.f32 %v2995_v49, %v1649_v54 }
 0x15c   : > { %v1516_v57 = vadd.f32 %v1496_v21, %v1395_v51  ;;  %v1671_v16 = vmax.f32 %v1662_v44, 0.0 }
 0x15e   : > { %v1637_v63 = vadd.f32 %v1617_v15, %v1516_v57 }
 0x160   : > { %v1650_v4 = vmul.f32 %v2989_v39, %v1637_v63  ;;  %v1259_v26 = vpop.f32.mrf.mxu1  ;;  %v1622_v61 = vpop.f32.mrf.mxu0 }
 0x161   : > { %v1378_v6 = vpop.f32.mrf.mxu2  ;;  %v1276_v22 = vadd.f32 %v1259_v26, %v2974_v56  ;;  %v1509_v43 = vpop.f32.mrf.mxu3 }
 0x162   : > { %v1663_v10 = vadd.f32 %v2995_v49, %v1650_v4  ;;  %v1396_v20 = vadd.f32 %v1378_v6, %v1275_v1 }
 0x164   : > { %v1672_v33 = vmax.f32 %v1663_v10, 0.0  ;;  %v1517_v38 = vadd.f32 %v1499_v45, %v1396_v20 }
 0x166   : > { %v2213_v27 = vpack.c.bf16 %v1672_v33, %v1671_v16  ;;  %v1638_v34 = vadd.f32 %v1620_v47, %v1517_v38 }
 0x168   : > { %2225 = vst [vmem:[%s3003_s14 + $0x8] sm:$0xff] %v2213_v27   ;;  %v1651_v14 = vmul.f32 %v2989_v39, %v1638_v34  ;;  %v1262_v28 = vpop.f32.mrf.mxu1  ;;  %v1625_v3 = vpop.f32.mrf.mxu0 }
 0x169   : > { %v1380_v52 = vpop.f32.mrf.mxu2  ;;  %v1277_v5 = vadd.f32 %v1262_v28, %v2977_v62  ;;  %v1511_v31 = vpop.f32.mrf.mxu3 }
 0x16a   : > { %v1397_v13 = vadd.f32 %v1380_v52, %v1276_v22  ;;  %v1664_v19 = vadd.f32 %v2995_v49, %v1651_v14 }
 0x16c   : > { %v1518_v21 = vadd.f32 %v1501_v0, %v1397_v13  ;;  %v1673_v46 = vmax.f32 %v1664_v19, 0.0 }
 0x16e   : > { %v1639_v42 = vadd.f32 %v1622_v61, %v1518_v21 }
 0x170   : > { %v1652_v45 = vmul.f32 %v2989_v39, %v1639_v42  ;;  %v1264_v25 = vpop.f32.mrf.mxu1  ;;  %v1627_v32 = vpop.f32.mrf.mxu0 }
 0x171   : > { %v1383_v56 = vpop.f32.mrf.mxu2  ;;  %v1278_v17 = vadd.f32 %v1264_v25, %v2980_v12 }
 0x172   : > { %v1665_v23 = vadd.f32 %v2995_v49, %v1652_v45  ;;  %v1398_v41 = vadd.f32 %v1383_v56, %v1277_v5 }
 0x174   : > { %v1674_v11 = vmax.f32 %v1665_v23, 0.0  ;;  %v1519_v55 = vadd.f32 %v1504_v48, %v1398_v41 }
 0x176   : > { %v2218_v30 = vpack.c.bf16 %v1674_v11, %v1673_v46  ;;  %v1640_v62 = vadd.f32 %v1625_v3, %v1519_v55 }
 0x178   : > { %2226 = vst [vmem:[%s3003_s14 + $0x10] sm:$0xff] %v2218_v30   ;;  %v1653_v9 = vmul.f32 %v2989_v39, %v1640_v62  ;;  %v1267_v53 = vpop.f32.mrf.mxu1  ;;  %v1630_v60 = vpop.f32.mrf.mxu0 }
 0x179   : > { %v1385_v0 = vpop.f32.mrf.mxu2  ;;  %v1279_v40 = vadd.f32 %v1267_v53, %v2982_v8 }
 0x17a   : > { %v1399_v7 = vadd.f32 %v1385_v0, %v1278_v17  ;;  %v1666_v37 = vadd.f32 %v2995_v49, %v1653_v9 }
 0x17c   : > { %v1520_v2 = vadd.f32 %v1506_v18, %v1399_v7  ;;  %v1675_v59 = vmax.f32 %v1666_v37, 0.0 }
 0x17e   : > { %v1641_v35 = vadd.f32 %v1627_v32, %v1520_v2 }
 0x180   : > { %v1654_v36 = vmul.f32 %v2989_v39, %v1641_v35  ;;  %v1269_v50 = vpop.f32.mrf.mxu1  ;;  %v1632_v51 = vpop.f32.mrf.mxu0 }
 0x181   : > { %v1388_v15 = vpop.f32.mrf.mxu2 }
 0x182   : > { %v1667_v12 = vadd.f32 %v2995_v49, %v1654_v36  ;;  %v1400_v24 = vadd.f32 %v1388_v15, %v1279_v40 }
 0x184   : > { %v1676_v48 = vmax.f32 %v1667_v12, 0.0  ;;  %v1521_v29 = vadd.f32 %v1509_v43, %v1400_v24 }
 0x186   : > { %v2223_v54 = vpack.c.bf16 %v1676_v48, %v1675_v59  ;;  %v1642_v57 = vadd.f32 %v1630_v60, %v1521_v29 }
 0x188   : > { %2227 = vst [vmem:[%s3003_s14 + $0x18] sm:$0xff] %v2223_v54   ;;  %v1655_v8 = vmul.f32 %v2989_v39, %v1642_v57 }
 0x189   : > { %v1390_v58 = vpop.f32.mrf.mxu2 }
 0x18a   : > { %v1668_v47 = vadd.f32 %v2995_v49, %v1655_v8 }
 0x18c   : > { %v1677_v63 = vmax.f32 %v1668_v47, 0.0 }
 0x18e   : > { %v1686_v1 = vpack.c.bf16 %v1677_v63, %v1677_v63 }
 0x190   : > { %1695 = vst [vmem:[%s3003_s14 + $0x20] sm:$0xf] %v1686_v1 }
 0x191   : > { %2419 = shalt.err (!%p2416_p0)
}
 0x192   : > { %s2485_s18 = smov 64   ;;  %s2486_s10 = smov 4  }
 0x193   : > { %2255 = dma.vmem_to_hbm [thread:$0]  (%p2597_p5), %s1711_s24, 576, %s1713_s28, %s1697_s11, %s2485_s18, %s2485_s18, %s2486_s10  }
 0x194 PF: > { %s1727_s14 = sand.u32 1, %s2458_s21   ;;  %p2266_p3 = pnand %p1838_p11, %p2571_p6 }
 0x195   : > { %s1728_s15 = scalar_lea.sflag [#allocation5], %s1727_s14 }
 0x196   : > { %p2267_p7 = pneg %p2266_p3 }
 0x198   : > { %2453 = dma.done.wait (%p2267_p7), %s1728_s15, 576  }
 0x199   : > { %2455 = vsyncadd (%p2267_p7), %s1728_s15, 4294966720  ;;  %s23_s26 = sadd.s32 1, %s2478_s26   ;;  %s3088_s19 = sld [smem:[#allocation13_spill]] }
 0x19a   : > { %p20_p9 = scmp.ge.s32.totalorder %s23_s26, 4   ;;  %s3089_s21 = smov %s2462_s22 }
 0x19b   : > { %s3090_s22 = smov %s2466_s23  ;;  %s3091_s23 = smov %s2606_s9 }
 0x19c   : > { %s3092_s24 = smov %s2474_s25  ;;  %22 = sbr.rel (!%p20_p9) target bundleno = 9 (0x9), region = 115 }
 0x19f   : > { %s3093_s25 = smov %s3088_s19 }
 0x1a1   :  { %1734 = vsyncpa [#allocation4], 1 }
 0x1a2   :  { %1736 = vsyncpa [#allocation4 + $0x1], 1 }
 0x1a3   :  { %1737 = vsyncpa [#allocation7], 1 }
 0x1a4   :  { %1738 = vsyncpa [#allocation5], 1 }
 0x1a5   :  { %1740 = vsyncpa [#allocation5 + $0x1], 1 }

</bundles_post_ra>
